<compile_context>
chip_gen: v7x
topology: tpu7x:2x2x1
jax: 0.10.0
libtpu: 0.0.40
codegen_flags: <defaults>
</compile_context>

<pallas_src>
import functools
import math

import jax
import jax.numpy as jnp
import numpy as np
from jax.experimental import pallas as pl
from jax.experimental.pallas import tpu as pltpu


def _mha_block_kernel(x_ref, wqkv_ref, bqkv_ref, wout_ref, bout_ref, o_ref,
                      q_scr, k_scr, v_scr, ctx_scr, *,
                      num_heads, head_dim, block_segments, segment_size,
                      compute_dtype):
    """One (branch, segment-block) tile: MHA over GB segments of one dilation branch."""
    H, hd = num_heads, head_dim
    D = H * hd
    GB, seg = block_segments, segment_size
    rows = GB * seg

    x = x_ref[...].reshape(rows, D)        # (rows, D)  compute_dtype (cast host-side)
    wqkv = wqkv_ref[...]                   # (D, 3D)    compute_dtype, q-cols pre-scaled
    bqkv = bqkv_ref[...]                   # (1, 3D)    f32
    wout = wout_ref[...]                   # (D, D)     compute_dtype, 1/R folded in
    bout = bout_ref[...]                   # (1, D)     f32, 1/R folded in

    # Single K=D QKV projection, f32 accumulation.
    qkv = jnp.dot(x, wqkv, preferred_element_type=jnp.float32) + bqkv   # (rows, 3D) f32

    # Stage q/k/v into bf16 VMEM scratch so the f32 intermediate dies here and the
    # per-head cast is done only once.
    q_scr[...] = qkv[:, 0 * D:1 * D].astype(compute_dtype)
    k_scr[...] = qkv[:, 1 * D:2 * D].astype(compute_dtype)
    v_scr[...] = qkv[:, 2 * D:3 * D].astype(compute_dtype)

    # Segment-local attention per head (batched over the GB segments).  Each head's
    # context goes into a (rows, D) scratch so the out-projection below is a single
    # K=D matmul instead of H K=hd matmuls.
    # TODO(synk): for hd < 128 the per-head column slices are lane-unaligned; grouping
    # heads into 128-wide column blocks would remove the per-head relayouts.
    for h in range(H):
        sl = slice(h * hd, (h + 1) * hd)
        qh = q_scr[:, sl].reshape(GB, seg, hd)
        kh = k_scr[:, sl].reshape(GB, seg, hd)
        vh = v_scr[:, sl].reshape(GB, seg, hd)

        s = jnp.einsum('gqd,gkd->gqk', qh, kh,
                       preferred_element_type=jnp.float32)      # (GB, seg, seg) f32
        s = s - jnp.max(s, axis=-1, keepdims=True)
        p = jnp.exp(s)
        p = p * pl.reciprocal(jnp.sum(p, axis=-1, keepdims=True), approx=True)

        oh = jnp.einsum('gqk,gkd->gqd', p.astype(compute_dtype), vh,
                        preferred_element_type=jnp.float32)     # (GB, seg, hd) f32
        ctx_scr[:, sl] = oh.reshape(rows, hd).astype(compute_dtype)

    # Single K=D out-projection (uniform 1/R branch weight already folded in).
    out = jnp.dot(ctx_scr[...], wout, preferred_element_type=jnp.float32) + bout
    o_ref[...] = out.reshape(GB, seg, D).astype(o_ref.dtype)


def _vmem_budget_bytes():
    """Scoped-VMEM budget derived from the chip (v5e/v6e: 128 MiB, v7x: 64 MiB)."""
    try:
        cap = int(pltpu.get_tpu_info().vmem_capacity_bytes)
    except Exception:
        cap = 64 * 1024 * 1024            # conservative (v7x-sized) fallback
    return min(int(cap * 0.75), 100 * 1024 * 1024)


def _pick_block_segments(num_groups, segment_size, d_model, weight_bytes, vmem_budget):
    """Largest divisor GB of num_groups whose (GB*segment_size)-row block fits VMEM."""
    # Rough bytes per row: x/out pipeline (bf16, double-buffered) + q/k/v/ctx scratch
    # (bf16) + f32 qkv/out transients + per-head f32 score tiles.
    per_row = 36 * d_model + 16 * segment_size
    avail = max(vmem_budget - weight_bytes, per_row * segment_size)
    max_rows = max(segment_size, min(2048, avail // per_row))
    best = 1
    for gb in range(1, num_groups + 1):
        if num_groups % gb == 0 and gb * segment_size <= max_rows:
            best = gb
    return best


def dilated_attention_forward(x, params, *, dilation_rate, segment_size, num_heads,
                              block_segments=None, compute_dtype=jnp.bfloat16):
    B, S, D = x.shape
    R = dilation_rate
    H = num_heads
    hd = D // H
    assert H * hd == D
    assert S % R == 0
    Sr = S // R
    assert Sr % segment_size == 0
    nseg = Sr // segment_size
    G = B * nseg
    # Lane-dense blocking of the branch axis needs D % 128 == 0 when R > 1
    # (block of width D inside a last dim of width R*D).
    # TODO(synk): pad D up to a multiple of 128 instead of asserting.
    assert R == 1 or D % 128 == 0, "D must be a multiple of 128 when dilation_rate > 1"

    vmem_budget = _vmem_budget_bytes()
    itemsize = np.dtype(compute_dtype).itemsize
    weight_bytes = (D * 3 * D + D * D) * itemsize       # single-buffered resident weights
    GB = (block_segments if block_segments is not None
          else _pick_block_segments(G, segment_size, D, weight_bytes, vmem_budget))
    assert G % GB == 0
    rows = GB * segment_size

    # bf16 I/O (kernel is HBM-bound at small/medium D). Free interleaved view:
    # x_view[g, t, r*D:(r+1)*D] is row t of segment g of dilation branch r
    # (g flattens (batch, segment)).
    x_view = x.astype(compute_dtype).reshape(G, segment_size, R * D)

    # Host-side folding (weights are only R*D*3D elements):
    #  * 1/sqrt(hd) into the q-columns of Wqkv / bqkv,
    #  * the uniform branch weight softmax(const) == 1/R into Wout / bout.
    scale = 1.0 / math.sqrt(hd)
    col_scale = jnp.concatenate(
        [jnp.full((D,), scale, jnp.float32), jnp.ones((2 * D,), jnp.float32)])
    wqkv = (params["wqkv"].astype(jnp.float32) * col_scale).astype(compute_dtype)
    bqkv = params["bqkv"].astype(jnp.float32) * col_scale
    wout = (params["wout"].astype(jnp.float32) * (1.0 / R)).astype(compute_dtype)
    bout = params["bout"].astype(jnp.float32) * (1.0 / R)

    kernel = functools.partial(
        _mha_block_kernel, num_heads=H, head_dim=hd, block_segments=GB,
        segment_size=segment_size, compute_dtype=compute_dtype)

    def run(weight_pipeline_mode):
        wkw = ({} if weight_pipeline_mode is None
               else {"pipeline_mode": weight_pipeline_mode})
        grid_spec = pltpu.PrefetchScalarGridSpec(
            num_scalar_prefetch=0,
            # Branch axis outermost: on v7x's 2 TensorCores each core keeps only one
            # branch's weights resident; weights stay constant along the fast g axis.
            grid=(R, G // GB),
            in_specs=[
                pl.BlockSpec((GB, segment_size, D), lambda r, g: (g, 0, r)),
                pl.BlockSpec((None, D, 3 * D), lambda r, g: (r, 0, 0), **wkw),
                pl.BlockSpec((None, 1, 3 * D), lambda r, g: (r, 0, 0), **wkw),
                pl.BlockSpec((None, D, D), lambda r, g: (r, 0, 0), **wkw),
                pl.BlockSpec((None, 1, D), lambda r, g: (r, 0, 0), **wkw),
            ],
            out_specs=pl.BlockSpec((GB, segment_size, D), lambda r, g: (g, 0, r)),
            scratch_shapes=[
                pltpu.VMEM((rows, D), compute_dtype),   # q
                pltpu.VMEM((rows, D), compute_dtype),   # k
                pltpu.VMEM((rows, D), compute_dtype),   # v
                pltpu.VMEM((rows, D), compute_dtype),   # context
            ])
        return pl.pallas_call(
            kernel,
            out_shape=jax.ShapeDtypeStruct((G, segment_size, R * D), compute_dtype),
            grid_spec=grid_spec,
            compiler_params=pltpu.CompilerParams(
                dimension_semantics=("parallel", "parallel"),
                vmem_limit_bytes=vmem_budget),
        )(x_view, wqkv, bqkv, wout, bout)

    # Weights are revisited along the fast grid axis: single-buffer them to halve the
    # resident weight VMEM (matters at large D on v7x).  Fall back to default
    # double-buffering if this Pallas version rejects pipeline_mode / Buffered(1).
    try:
        single = pl.Buffered(1) if hasattr(pl, "Buffered") else None
        out_view = run(single)
    except Exception:
        out_view = run(None)

    return out_view.reshape(B, S, D)


def reference_forward(x, params, *, dilation_rate, segment_size, num_heads):
    """Pure-JAX (f32) reference mirroring the torch module for validation."""
    B, S, D = x.shape
    R = dilation_rate
    hd = D // num_heads
    weights = jax.nn.softmax(jnp.full((R,), 1.0 / R, dtype=x.dtype))
    out = jnp.zeros_like(x)
    for r in range(R):
        xr = x[:, r::R, :]
        Sr = xr.shape[1]
        nseg = Sr // segment_size
        xs = xr.reshape(B * nseg, segment_size, D)
        qkv = xs @ params["wqkv"][r] + params["bqkv"][r]
        q, k, v = jnp.split(qkv, 3, axis=-1)

        def heads(t):
            return t.reshape(t.shape[0], segment_size, num_heads, hd).transpose(0, 2, 1, 3)

        qh, kh, vh = heads(q), heads(k), heads(v)
        s = jnp.einsum('bhqd,bhkd->bhqk', qh, kh) / (hd ** 0.5)
        p = jax.nn.softmax(s, axis=-1)
        o = jnp.einsum('bhqk,bhkd->bhqd', p, vh).transpose(0, 2, 1, 3)
        o = o.reshape(B * nseg, segment_size, D)
        o = o @ params["wout"][r] + params["bout"][r]
        o = o.reshape(B, Sr, D)
        scat = jnp.zeros_like(x).at[:, r::R, :].set(o)
        out = out + weights[r] * scat
    return out


if __name__ == "__main__":
    # Small shapes consistent with the module (D multiple of 128, seg multiple of 16
    # so bf16-staged reshapes stay layout-free).
    B, S, D = 2, 64, 128
    num_heads = 4
    dilation_rate = 2
    segment_size = 16

    key = jax.random.PRNGKey(0)
    kx, kw1, kb1, kw2, kb2 = jax.random.split(key, 5)

    x = jax.random.normal(kx, (B, S, D), dtype=jnp.float32)
    R = dilation_rate
    # Per-branch FlashMHA params: Wqkv (D,3D)+bias, Wout (D,D)+bias
    params = {
        "wqkv": 0.05 * jax.random.normal(kw1, (R, D, 3 * D), dtype=jnp.float32),
        "bqkv": 0.01 * jax.random.normal(kb1, (R, 1, 3 * D), dtype=jnp.float32),
        "wout": 0.05 * jax.random.normal(kw2, (R, D, D), dtype=jnp.float32),
        "bout": 0.01 * jax.random.normal(kb2, (R, 1, D), dtype=jnp.float32),
    }

    out = dilated_attention_forward(
        x, params, dilation_rate=dilation_rate,
        segment_size=segment_size, num_heads=num_heads)
    out = jax.block_until_ready(out)

    ref = reference_forward(
        x, params, dilation_rate=dilation_rate,
        segment_size=segment_size, num_heads=num_heads)
    ref = jax.block_until_ready(ref)

    # Kernel I/O and matmuls are bf16 with f32 accumulation (torch reference runs fp16).
    np.testing.assert_allclose(np.asarray(out.astype(jnp.float32)), np.asarray(ref),
                               rtol=2e-2, atol=2e-2)

    # TODO(synk): use_xpos / use_rel_pos_bias / casual branches are disabled by the
    # module's defaults and are not implemented; dropout(p=0.0) is identity.
    print("KERNEL_OK")
</pallas_src>

<mosaic_0001>
module attributes {stable_mosaic.version = 11 : i64} {
  func.func @_mha_block_kernel(%arg0: i32, %arg1: i32, %arg2: memref<4x16x128xbf16, #tpu.memory_space<vmem>>, %arg3: memref<1x128x384xbf16, #tpu.memory_space<vmem>>, %arg4: memref<1x1x384xf32, #tpu.memory_space<vmem>>, %arg5: memref<1x128x128xbf16, #tpu.memory_space<vmem>>, %arg6: memref<1x1x128xf32, #tpu.memory_space<vmem>>, %arg7: memref<4x16x128xbf16, #tpu.memory_space<vmem>>, %arg8: memref<64x128xbf16, #tpu.memory_space<vmem>>, %arg9: memref<64x128xbf16, #tpu.memory_space<vmem>>, %arg10: memref<64x128xbf16, #tpu.memory_space<vmem>>, %arg11: memref<64x128xbf16, #tpu.memory_space<vmem>>) attributes {dimension_semantics = [#tpu.dimension_semantics<parallel>, #tpu.dimension_semantics<parallel>], iteration_bounds = array<i64: 2, 1>, scalar_prefetch = 0 : i64, scratch_operands = 4 : i64, tpu.core_type = #tpu.core_type<tc>, window_params = [{transform_indices = @transform_0, window_bounds = array<i64: 4, 16, 128>}, {pipeline_mode = #tpu.pipeline_mode<synchronous>, transform_indices = @transform_1, window_bounds = array<i64: 1, 128, 384>}, {pipeline_mode = #tpu.pipeline_mode<synchronous>, transform_indices = @transform_2, window_bounds = array<i64: 1, 1, 384>}, {pipeline_mode = #tpu.pipeline_mode<synchronous>, transform_indices = @transform_3, window_bounds = array<i64: 1, 128, 128>}, {pipeline_mode = #tpu.pipeline_mode<synchronous>, transform_indices = @transform_4, window_bounds = array<i64: 1, 1, 128>}, {transform_indices = @transform_5, window_bounds = array<i64: 4, 16, 128>}]} {
    %c0 = arith.constant 0 : index
    %c0_0 = arith.constant 0 : index
    %c0_1 = arith.constant 0 : index
    %0 = vector.load %arg2[%c0, %c0_0, %c0_1] : memref<4x16x128xbf16, #tpu.memory_space<vmem>>, vector<4x16x128xbf16>
    %1 = vector.shape_cast %0 : vector<4x16x128xbf16> to vector<64x128xbf16>
    %c0_2 = arith.constant 0 : index
    %c0_3 = arith.constant 0 : index
    %c0_4 = arith.constant 0 : index
    %2 = vector.load %arg3[%c0_2, %c0_3, %c0_4] : memref<1x128x384xbf16, #tpu.memory_space<vmem>>, vector<1x128x384xbf16>
    %3 = vector.shape_cast %2 : vector<1x128x384xbf16> to vector<128x384xbf16>
    %c0_5 = arith.constant 0 : index
    %c0_6 = arith.constant 0 : index
    %c0_7 = arith.constant 0 : index
    %4 = vector.load %arg4[%c0_5, %c0_6, %c0_7] : memref<1x1x384xf32, #tpu.memory_space<vmem>>, vector<1x1x384xf32>
    %5 = vector.shape_cast %4 : vector<1x1x384xf32> to vector<1x384xf32>
    %c0_8 = arith.constant 0 : index
    %c0_9 = arith.constant 0 : index
    %c0_10 = arith.constant 0 : index
    %6 = vector.load %arg5[%c0_8, %c0_9, %c0_10] : memref<1x128x128xbf16, #tpu.memory_space<vmem>>, vector<1x128x128xbf16>
    %7 = vector.shape_cast %6 : vector<1x128x128xbf16> to vector<128x128xbf16>
    %c0_11 = arith.constant 0 : index
    %c0_12 = arith.constant 0 : index
    %c0_13 = arith.constant 0 : index
    %8 = vector.load %arg6[%c0_11, %c0_12, %c0_13] : memref<1x1x128xf32, #tpu.memory_space<vmem>>, vector<1x1x128xf32>
    %9 = vector.shape_cast %8 : vector<1x1x128xf32> to vector<1x128xf32>
    %cst = arith.constant dense<0.000000e+00> : vector<64x384xf32>
    %10 = tpu.matmul %1, %3, %cst {dimension_numbers = #tpu.dot_dimension_numbers<[1], [0], [0], [1], [0, 0, 1, 1], [], []>} : vector<64x128xbf16>, vector<128x384xbf16>, vector<64x384xf32> -> vector<64x384xf32>
    %11 = vector.broadcast %5 : vector<1x384xf32> to vector<64x384xf32>
    %12 = arith.addf %10, %11 : vector<64x384xf32>
    %13 = vector.extract_strided_slice %12 {offsets = [0, 0], sizes = [64, 128], strides = [1, 1]} : vector<64x384xf32> to vector<64x128xf32>
    %14 = arith.truncf %13 : vector<64x128xf32> to vector<64x128xbf16>
    %c0_14 = arith.constant 0 : index
    %c0_15 = arith.constant 0 : index
    %15 = vector.load %arg8[%c0_14, %c0_15] : memref<64x128xbf16, #tpu.memory_space<vmem>>, vector<64x128xbf16>
    tpu.vector_store %arg8[%c0_14, %c0_15], %14 {strides = array<i32>} : memref<64x128xbf16, #tpu.memory_space<vmem>>, vector<64x128xbf16>,
    %16 = vector.extract_strided_slice %12 {offsets = [0, 128], sizes = [64, 128], strides = [1, 1]} : vector<64x384xf32> to vector<64x128xf32>
    %17 = arith.truncf %16 : vector<64x128xf32> to vector<64x128xbf16>
    %c0_16 = arith.constant 0 : index
    %c0_17 = arith.constant 0 : index
    %18 = vector.load %arg9[%c0_16, %c0_17] : memref<64x128xbf16, #tpu.memory_space<vmem>>, vector<64x128xbf16>
    tpu.vector_store %arg9[%c0_16, %c0_17], %17 {strides = array<i32>} : memref<64x128xbf16, #tpu.memory_space<vmem>>, vector<64x128xbf16>,
    %19 = vector.extract_strided_slice %12 {offsets = [0, 256], sizes = [64, 128], strides = [1, 1]} : vector<64x384xf32> to vector<64x128xf32>
    %20 = arith.truncf %19 : vector<64x128xf32> to vector<64x128xbf16>
    %c0_18 = arith.constant 0 : index
    %c0_19 = arith.constant 0 : index
    %21 = vector.load %arg10[%c0_18, %c0_19] : memref<64x128xbf16, #tpu.memory_space<vmem>>, vector<64x128xbf16>
    tpu.vector_store %arg10[%c0_18, %c0_19], %20 {strides = array<i32>} : memref<64x128xbf16, #tpu.memory_space<vmem>>, vector<64x128xbf16>,
    %c0_20 = arith.constant 0 : index
    %c0_21 = arith.constant 0 : index
    %22 = vector.load %arg8[%c0_20, %c0_21] : memref<64x128xbf16, #tpu.memory_space<vmem>>, vector<64x32xbf16>
    %23 = vector.shape_cast %22 : vector<64x32xbf16> to vector<4x16x32xbf16>
    %c0_22 = arith.constant 0 : index
    %c0_23 = arith.constant 0 : index
    %24 = vector.load %arg9[%c0_22, %c0_23] : memref<64x128xbf16, #tpu.memory_space<vmem>>, vector<64x32xbf16>
    %25 = vector.shape_cast %24 : vector<64x32xbf16> to vector<4x16x32xbf16>
    %c0_24 = arith.constant 0 : index
    %c0_25 = arith.constant 0 : index
    %26 = vector.load %arg10[%c0_24, %c0_25] : memref<64x128xbf16, #tpu.memory_space<vmem>>, vector<64x32xbf16>
    %27 = vector.shape_cast %26 : vector<64x32xbf16> to vector<4x16x32xbf16>
    "tpu.trace_start"() <{level = 10 : i32, message = "gqd,gkd->gqk"}> : () -> ()
    %cst_26 = arith.constant dense<0.000000e+00> : vector<4x16x16xf32>
    %28 = tpu.matmul %23, %25, %cst_26 {dimension_numbers = #tpu.dot_dimension_numbers<[2], [2], [1], [1], [0, 0, 0, 1, 1, 1], [0], [0]>} : vector<4x16x32xbf16>, vector<4x16x32xbf16>, vector<4x16x16xf32> -> vector<4x16x16xf32>
    "tpu.trace_stop"() : () -> ()
    %cst_27 = arith.constant dense<0xFF800000> : vector<4x16xf32>
    %29 = vector.multi_reduction <maximumf>, %28, %cst_27 [2] : vector<4x16x16xf32> to vector<4x16xf32>
    %30 = vector.shape_cast %29 : vector<4x16xf32> to vector<4x16x1xf32>
    %31 = vector.broadcast %30 : vector<4x16x1xf32> to vector<4x16x16xf32>
    %32 = arith.subf %28, %31 : vector<4x16x16xf32>
    %33 = math.exp %32 : vector<4x16x16xf32>
    %cst_28 = arith.constant dense<0.000000e+00> : vector<4x16xf32>
    %34 = vector.multi_reduction <add>, %33, %cst_28 [2] : vector<4x16x16xf32> to vector<4x16xf32>
    %35 = vector.shape_cast %34 : vector<4x16xf32> to vector<4x16x1xf32>
    %36 = tpu.reciprocal %35 {approx = true} : vector<4x16x1xf32> -> vector<4x16x1xf32>
    %37 = vector.broadcast %36 : vector<4x16x1xf32> to vector<4x16x16xf32>
    %38 = arith.mulf %33, %37 : vector<4x16x16xf32>
    %39 = arith.truncf %38 : vector<4x16x16xf32> to vector<4x16x16xbf16>
    "tpu.trace_start"() <{level = 10 : i32, message = "gqk,gkd->gqd"}> : () -> ()
    %cst_29 = arith.constant dense<0.000000e+00> : vector<4x16x32xf32>
    %40 = tpu.matmul %39, %27, %cst_29 {dimension_numbers = #tpu.dot_dimension_numbers<[2], [1], [1], [2], [0, 0, 0, 1, 1, 2], [0], [0]>} : vector<4x16x16xbf16>, vector<4x16x32xbf16>, vector<4x16x32xf32> -> vector<4x16x32xf32>
    "tpu.trace_stop"() : () -> ()
    %41 = vector.shape_cast %40 : vector<4x16x32xf32> to vector<64x32xf32>
    %42 = arith.truncf %41 : vector<64x32xf32> to vector<64x32xbf16>
    %c0_30 = arith.constant 0 : index
    %c0_31 = arith.constant 0 : index
    %43 = vector.load %arg11[%c0_30, %c0_31] : memref<64x128xbf16, #tpu.memory_space<vmem>>, vector<64x32xbf16>
    tpu.vector_store %arg11[%c0_30, %c0_31], %42 {strides = array<i32>} : memref<64x128xbf16, #tpu.memory_space<vmem>>, vector<64x32xbf16>,
    %c0_32 = arith.constant 0 : index
    %c32 = arith.constant 32 : index
    %44 = vector.load %arg8[%c0_32, %c32] : memref<64x128xbf16, #tpu.memory_space<vmem>>, vector<64x32xbf16>
    %45 = vector.shape_cast %44 : vector<64x32xbf16> to vector<4x16x32xbf16>
    %c0_33 = arith.constant 0 : index
    %c32_34 = arith.constant 32 : index
    %46 = vector.load %arg9[%c0_33, %c32_34] : memref<64x128xbf16, #tpu.memory_space<vmem>>, vector<64x32xbf16>
    %47 = vector.shape_cast %46 : vector<64x32xbf16> to vector<4x16x32xbf16>
    %c0_35 = arith.constant 0 : index
    %c32_36 = arith.constant 32 : index
    %48 = vector.load %arg10[%c0_35, %c32_36] : memref<64x128xbf16, #tpu.memory_space<vmem>>, vector<64x32xbf16>
    %49 = vector.shape_cast %48 : vector<64x32xbf16> to vector<4x16x32xbf16>
    "tpu.trace_start"() <{level = 10 : i32, message = "gqd,gkd->gqk"}> : () -> ()
    %cst_37 = arith.constant dense<0.000000e+00> : vector<4x16x16xf32>
    %50 = tpu.matmul %45, %47, %cst_37 {dimension_numbers = #tpu.dot_dimension_numbers<[2], [2], [1], [1], [0, 0, 0, 1, 1, 1], [0], [0]>} : vector<4x16x32xbf16>, vector<4x16x32xbf16>, vector<4x16x16xf32> -> vector<4x16x16xf32>
    "tpu.trace_stop"() : () -> ()
    %cst_38 = arith.constant dense<0xFF800000> : vector<4x16xf32>
    %51 = vector.multi_reduction <maximumf>, %50, %cst_38 [2] : vector<4x16x16xf32> to vector<4x16xf32>
    %52 = vector.shape_cast %51 : vector<4x16xf32> to vector<4x16x1xf32>
    %53 = vector.broadcast %52 : vector<4x16x1xf32> to vector<4x16x16xf32>
    %54 = arith.subf %50, %53 : vector<4x16x16xf32>
    %55 = math.exp %54 : vector<4x16x16xf32>
    %cst_39 = arith.constant dense<0.000000e+00> : vector<4x16xf32>
    %56 = vector.multi_reduction <add>, %55, %cst_39 [2] : vector<4x16x16xf32> to vector<4x16xf32>
    %57 = vector.shape_cast %56 : vector<4x16xf32> to vector<4x16x1xf32>
    %58 = tpu.reciprocal %57 {approx = true} : vector<4x16x1xf32> -> vector<4x16x1xf32>
    %59 = vector.broadcast %58 : vector<4x16x1xf32> to vector<4x16x16xf32>
    %60 = arith.mulf %55, %59 : vector<4x16x16xf32>
    %61 = arith.truncf %60 : vector<4x16x16xf32> to vector<4x16x16xbf16>
    "tpu.trace_start"() <{level = 10 : i32, message = "gqk,gkd->gqd"}> : () -> ()
    %cst_40 = arith.constant dense<0.000000e+00> : vector<4x16x32xf32>
    %62 = tpu.matmul %61, %49, %cst_40 {dimension_numbers = #tpu.dot_dimension_numbers<[2], [1], [1], [2], [0, 0, 0, 1, 1, 2], [0], [0]>} : vector<4x16x16xbf16>, vector<4x16x32xbf16>, vector<4x16x32xf32> -> vector<4x16x32xf32>
    "tpu.trace_stop"() : () -> ()
    %63 = vector.shape_cast %62 : vector<4x16x32xf32> to vector<64x32xf32>
    %64 = arith.truncf %63 : vector<64x32xf32> to vector<64x32xbf16>
    %c0_41 = arith.constant 0 : index
    %c32_42 = arith.constant 32 : index
    %65 = vector.load %arg11[%c0_41, %c32_42] : memref<64x128xbf16, #tpu.memory_space<vmem>>, vector<64x32xbf16>
    tpu.vector_store %arg11[%c0_41, %c32_42], %64 {strides = array<i32>} : memref<64x128xbf16, #tpu.memory_space<vmem>>, vector<64x32xbf16>,
    %c0_43 = arith.constant 0 : index
    %c64 = arith.constant 64 : index
    %66 = vector.load %arg8[%c0_43, %c64] : memref<64x128xbf16, #tpu.memory_space<vmem>>, vector<64x32xbf16>
    %67 = vector.shape_cast %66 : vector<64x32xbf16> to vector<4x16x32xbf16>
    %c0_44 = arith.constant 0 : index
    %c64_45 = arith.constant 64 : index
    %68 = vector.load %arg9[%c0_44, %c64_45] : memref<64x128xbf16, #tpu.memory_space<vmem>>, vector<64x32xbf16>
    %69 = vector.shape_cast %68 : vector<64x32xbf16> to vector<4x16x32xbf16>
    %c0_46 = arith.constant 0 : index
    %c64_47 = arith.constant 64 : index
    %70 = vector.load %arg10[%c0_46, %c64_47] : memref<64x128xbf16, #tpu.memory_space<vmem>>, vector<64x32xbf16>
    %71 = vector.shape_cast %70 : vector<64x32xbf16> to vector<4x16x32xbf16>
    "tpu.trace_start"() <{level = 10 : i32, message = "gqd,gkd->gqk"}> : () -> ()
    %cst_48 = arith.constant dense<0.000000e+00> : vector<4x16x16xf32>
    %72 = tpu.matmul %67, %69, %cst_48 {dimension_numbers = #tpu.dot_dimension_numbers<[2], [2], [1], [1], [0, 0, 0, 1, 1, 1], [0], [0]>} : vector<4x16x32xbf16>, vector<4x16x32xbf16>, vector<4x16x16xf32> -> vector<4x16x16xf32>
    "tpu.trace_stop"() : () -> ()
    %cst_49 = arith.constant dense<0xFF800000> : vector<4x16xf32>
    %73 = vector.multi_reduction <maximumf>, %72, %cst_49 [2] : vector<4x16x16xf32> to vector<4x16xf32>
    %74 = vector.shape_cast %73 : vector<4x16xf32> to vector<4x16x1xf32>
    %75 = vector.broadcast %74 : vector<4x16x1xf32> to vector<4x16x16xf32>
    %76 = arith.subf %72, %75 : vector<4x16x16xf32>
    %77 = math.exp %76 : vector<4x16x16xf32>
    %cst_50 = arith.constant dense<0.000000e+00> : vector<4x16xf32>
    %78 = vector.multi_reduction <add>, %77, %cst_50 [2] : vector<4x16x16xf32> to vector<4x16xf32>
    %79 = vector.shape_cast %78 : vector<4x16xf32> to vector<4x16x1xf32>
    %80 = tpu.reciprocal %79 {approx = true} : vector<4x16x1xf32> -> vector<4x16x1xf32>
    %81 = vector.broadcast %80 : vector<4x16x1xf32> to vector<4x16x16xf32>
    %82 = arith.mulf %77, %81 : vector<4x16x16xf32>
    %83 = arith.truncf %82 : vector<4x16x16xf32> to vector<4x16x16xbf16>
    "tpu.trace_start"() <{level = 10 : i32, message = "gqk,gkd->gqd"}> : () -> ()
    %cst_51 = arith.constant dense<0.000000e+00> : vector<4x16x32xf32>
    %84 = tpu.matmul %83, %71, %cst_51 {dimension_numbers = #tpu.dot_dimension_numbers<[2], [1], [1], [2], [0, 0, 0, 1, 1, 2], [0], [0]>} : vector<4x16x16xbf16>, vector<4x16x32xbf16>, vector<4x16x32xf32> -> vector<4x16x32xf32>
    "tpu.trace_stop"() : () -> ()
    %85 = vector.shape_cast %84 : vector<4x16x32xf32> to vector<64x32xf32>
    %86 = arith.truncf %85 : vector<64x32xf32> to vector<64x32xbf16>
    %c0_52 = arith.constant 0 : index
    %c64_53 = arith.constant 64 : index
    %87 = vector.load %arg11[%c0_52, %c64_53] : memref<64x128xbf16, #tpu.memory_space<vmem>>, vector<64x32xbf16>
    tpu.vector_store %arg11[%c0_52, %c64_53], %86 {strides = array<i32>} : memref<64x128xbf16, #tpu.memory_space<vmem>>, vector<64x32xbf16>,
    %c0_54 = arith.constant 0 : index
    %c96 = arith.constant 96 : index
    %88 = vector.load %arg8[%c0_54, %c96] : memref<64x128xbf16, #tpu.memory_space<vmem>>, vector<64x32xbf16>
    %89 = vector.shape_cast %88 : vector<64x32xbf16> to vector<4x16x32xbf16>
    %c0_55 = arith.constant 0 : index
    %c96_56 = arith.constant 96 : index
    %90 = vector.load %arg9[%c0_55, %c96_56] : memref<64x128xbf16, #tpu.memory_space<vmem>>, vector<64x32xbf16>
    %91 = vector.shape_cast %90 : vector<64x32xbf16> to vector<4x16x32xbf16>
    %c0_57 = arith.constant 0 : index
    %c96_58 = arith.constant 96 : index
    %92 = vector.load %arg10[%c0_57, %c96_58] : memref<64x128xbf16, #tpu.memory_space<vmem>>, vector<64x32xbf16>
    %93 = vector.shape_cast %92 : vector<64x32xbf16> to vector<4x16x32xbf16>
    "tpu.trace_start"() <{level = 10 : i32, message = "gqd,gkd->gqk"}> : () -> ()
    %cst_59 = arith.constant dense<0.000000e+00> : vector<4x16x16xf32>
    %94 = tpu.matmul %89, %91, %cst_59 {dimension_numbers = #tpu.dot_dimension_numbers<[2], [2], [1], [1], [0, 0, 0, 1, 1, 1], [0], [0]>} : vector<4x16x32xbf16>, vector<4x16x32xbf16>, vector<4x16x16xf32> -> vector<4x16x16xf32>
    "tpu.trace_stop"() : () -> ()
    %cst_60 = arith.constant dense<0xFF800000> : vector<4x16xf32>
    %95 = vector.multi_reduction <maximumf>, %94, %cst_60 [2] : vector<4x16x16xf32> to vector<4x16xf32>
    %96 = vector.shape_cast %95 : vector<4x16xf32> to vector<4x16x1xf32>
    %97 = vector.broadcast %96 : vector<4x16x1xf32> to vector<4x16x16xf32>
    %98 = arith.subf %94, %97 : vector<4x16x16xf32>
    %99 = math.exp %98 : vector<4x16x16xf32>
    %cst_61 = arith.constant dense<0.000000e+00> : vector<4x16xf32>
    %100 = vector.multi_reduction <add>, %99, %cst_61 [2] : vector<4x16x16xf32> to vector<4x16xf32>
    %101 = vector.shape_cast %100 : vector<4x16xf32> to vector<4x16x1xf32>
    %102 = tpu.reciprocal %101 {approx = true} : vector<4x16x1xf32> -> vector<4x16x1xf32>
    %103 = vector.broadcast %102 : vector<4x16x1xf32> to vector<4x16x16xf32>
    %104 = arith.mulf %99, %103 : vector<4x16x16xf32>
    %105 = arith.truncf %104 : vector<4x16x16xf32> to vector<4x16x16xbf16>
    "tpu.trace_start"() <{level = 10 : i32, message = "gqk,gkd->gqd"}> : () -> ()
    %cst_62 = arith.constant dense<0.000000e+00> : vector<4x16x32xf32>
    %106 = tpu.matmul %105, %93, %cst_62 {dimension_numbers = #tpu.dot_dimension_numbers<[2], [1], [1], [2], [0, 0, 0, 1, 1, 2], [0], [0]>} : vector<4x16x16xbf16>, vector<4x16x32xbf16>, vector<4x16x32xf32> -> vector<4x16x32xf32>
    "tpu.trace_stop"() : () -> ()
    %107 = vector.shape_cast %106 : vector<4x16x32xf32> to vector<64x32xf32>
    %108 = arith.truncf %107 : vector<64x32xf32> to vector<64x32xbf16>
    %c0_63 = arith.constant 0 : index
    %c96_64 = arith.constant 96 : index
    %109 = vector.load %arg11[%c0_63, %c96_64] : memref<64x128xbf16, #tpu.memory_space<vmem>>, vector<64x32xbf16>
    tpu.vector_store %arg11[%c0_63, %c96_64], %108 {strides = array<i32>} : memref<64x128xbf16, #tpu.memory_space<vmem>>, vector<64x32xbf16>,
    %c0_65 = arith.constant 0 : index
    %c0_66 = arith.constant 0 : index
    %110 = vector.load %arg11[%c0_65, %c0_66] : memref<64x128xbf16, #tpu.memory_space<vmem>>, vector<64x128xbf16>
    %cst_67 = arith.constant dense<0.000000e+00> : vector<64x128xf32>
    %111 = tpu.matmul %110, %7, %cst_67 {dimension_numbers = #tpu.dot_dimension_numbers<[1], [0], [0], [1], [0, 0, 1, 1], [], []>} : vector<64x128xbf16>, vector<128x128xbf16>, vector<64x128xf32> -> vector<64x128xf32>
    %112 = vector.broadcast %9 : vector<1x128xf32> to vector<64x128xf32>
    %113 = arith.addf %111, %112 : vector<64x128xf32>
    %114 = vector.shape_cast %113 : vector<64x128xf32> to vector<4x16x128xf32>
    %115 = arith.truncf %114 : vector<4x16x128xf32> to vector<4x16x128xbf16>
    %c0_68 = arith.constant 0 : index
    %c0_69 = arith.constant 0 : index
    %c0_70 = arith.constant 0 : index
    %116 = vector.load %arg7[%c0_68, %c0_69, %c0_70] : memref<4x16x128xbf16, #tpu.memory_space<vmem>>, vector<4x16x128xbf16>
    tpu.vector_store %arg7[%c0_68, %c0_69, %c0_70], %115 {strides = array<i32>} : memref<4x16x128xbf16, #tpu.memory_space<vmem>>, vector<4x16x128xbf16>,
    return
  }
  func.func @transform_0(%arg0: i32, %arg1: i32) -> (i32, i32, i32) {
    %c0_i32 = arith.constant 0 : i32
    %c0_i32_0 = arith.constant 0 : i32
    return %arg1, %c0_i32, %arg0 : i32, i32, i32
  }
  func.func @transform_1(%arg0: i32, %arg1: i32) -> (i32, i32, i32) {
    %c0_i32 = arith.constant 0 : i32
    %c0_i32_0 = arith.constant 0 : i32
    %c0_i32_1 = arith.constant 0 : i32
    return %arg0, %c0_i32, %c0_i32_0 : i32, i32, i32
  }
  func.func @transform_2(%arg0: i32, %arg1: i32) -> (i32, i32, i32) {
    %c0_i32 = arith.constant 0 : i32
    %c0_i32_0 = arith.constant 0 : i32
    %c0_i32_1 = arith.constant 0 : i32
    return %arg0, %c0_i32, %c0_i32_0 : i32, i32, i32
  }
  func.func @transform_3(%arg0: i32, %arg1: i32) -> (i32, i32, i32) {
    %c0_i32 = arith.constant 0 : i32
    %c0_i32_0 = arith.constant 0 : i32
    %c0_i32_1 = arith.constant 0 : i32
    return %arg0, %c0_i32, %c0_i32_0 : i32, i32, i32
  }
  func.func @transform_4(%arg0: i32, %arg1: i32) -> (i32, i32, i32) {
    %c0_i32 = arith.constant 0 : i32
    %c0_i32_0 = arith.constant 0 : i32
    %c0_i32_1 = arith.constant 0 : i32
    return %arg0, %c0_i32, %c0_i32_0 : i32, i32, i32
  }
  func.func @transform_5(%arg0: i32, %arg1: i32) -> (i32, i32, i32) {
    %c0_i32 = arith.constant 0 : i32
    %c0_i32_0 = arith.constant 0 : i32
    return %arg1, %c0_i32, %arg0 : i32, i32, i32
  }
}

module attributes {stable_mosaic.version = 11 : i64} {
  func.func @_mha_block_kernel(%arg0: i32, %arg1: i32, %arg2: memref<4x16x128xbf16, #tpu.memory_space<vmem>>, %arg3: memref<1x128x384xbf16, #tpu.memory_space<vmem>>, %arg4: memref<1x1x384xf32, #tpu.memory_space<vmem>>, %arg5: memref<1x128x128xbf16, #tpu.memory_space<vmem>>, %arg6: memref<1x1x128xf32, #tpu.memory_space<vmem>>, %arg7: memref<4x16x128xbf16, #tpu.memory_space<vmem>>, %arg8: memref<64x128xbf16, #tpu.memory_space<vmem>>, %arg9: memref<64x128xbf16, #tpu.memory_space<vmem>>, %arg10: memref<64x128xbf16, #tpu.memory_space<vmem>>, %arg11: memref<64x128xbf16, #tpu.memory_space<vmem>>) attributes {dimension_semantics = [#tpu.dimension_semantics<parallel>, #tpu.dimension_semantics<parallel>], iteration_bounds = array<i64: 2, 1>, scalar_prefetch = 0 : i64, scratch_operands = 4 : i64, tpu.core_type = #tpu.core_type<tc>, window_params = [{transform_indices = @transform_0, window_bounds = array<i64: 4, 16, 128>}, {transform_indices = @transform_1, window_bounds = array<i64: 1, 128, 384>}, {transform_indices = @transform_2, window_bounds = array<i64: 1, 1, 384>}, {transform_indices = @transform_3, window_bounds = array<i64: 1, 128, 128>}, {transform_indices = @transform_4, window_bounds = array<i64: 1, 1, 128>}, {transform_indices = @transform_5, window_bounds = array<i64: 4, 16, 128>}]} {
    %c0 = arith.constant 0 : index
    %c0_0 = arith.constant 0 : index
    %c0_1 = arith.constant 0 : index
    %0 = vector.load %arg2[%c0, %c0_0, %c0_1] : memref<4x16x128xbf16, #tpu.memory_space<vmem>>, vector<4x16x128xbf16>
    %1 = vector.shape_cast %0 : vector<4x16x128xbf16> to vector<64x128xbf16>
    %c0_2 = arith.constant 0 : index
    %c0_3 = arith.constant 0 : index
    %c0_4 = arith.constant 0 : index
    %2 = vector.load %arg3[%c0_2, %c0_3, %c0_4] : memref<1x128x384xbf16, #tpu.memory_space<vmem>>, vector<1x128x384xbf16>
    %3 = vector.shape_cast %2 : vector<1x128x384xbf16> to vector<128x384xbf16>
    %c0_5 = arith.constant 0 : index
    %c0_6 = arith.constant 0 : index
    %c0_7 = arith.constant 0 : index
    %4 = vector.load %arg4[%c0_5, %c0_6, %c0_7] : memref<1x1x384xf32, #tpu.memory_space<vmem>>, vector<1x1x384xf32>
    %5 = vector.shape_cast %4 : vector<1x1x384xf32> to vector<1x384xf32>
    %c0_8 = arith.constant 0 : index
    %c0_9 = arith.constant 0 : index
    %c0_10 = arith.constant 0 : index
    %6 = vector.load %arg5[%c0_8, %c0_9, %c0_10] : memref<1x128x128xbf16, #tpu.memory_space<vmem>>, vector<1x128x128xbf16>
    %7 = vector.shape_cast %6 : vector<1x128x128xbf16> to vector<128x128xbf16>
    %c0_11 = arith.constant 0 : index
    %c0_12 = arith.constant 0 : index
    %c0_13 = arith.constant 0 : index
    %8 = vector.load %arg6[%c0_11, %c0_12, %c0_13] : memref<1x1x128xf32, #tpu.memory_space<vmem>>, vector<1x1x128xf32>
    %9 = vector.shape_cast %8 : vector<1x1x128xf32> to vector<1x128xf32>
    %cst = arith.constant dense<0.000000e+00> : vector<64x384xf32>
    %10 = tpu.matmul %1, %3, %cst {dimension_numbers = #tpu.dot_dimension_numbers<[1], [0], [0], [1], [0, 0, 1, 1], [], []>} : vector<64x128xbf16>, vector<128x384xbf16>, vector<64x384xf32> -> vector<64x384xf32>
    %11 = vector.broadcast %5 : vector<1x384xf32> to vector<64x384xf32>
    %12 = arith.addf %10, %11 : vector<64x384xf32>
    %13 = vector.extract_strided_slice %12 {offsets = [0, 0], sizes = [64, 128], strides = [1, 1]} : vector<64x384xf32> to vector<64x128xf32>
    %14 = arith.truncf %13 : vector<64x128xf32> to vector<64x128xbf16>
    %c0_14 = arith.constant 0 : index
    %c0_15 = arith.constant 0 : index
    %15 = vector.load %arg8[%c0_14, %c0_15] : memref<64x128xbf16, #tpu.memory_space<vmem>>, vector<64x128xbf16>
    tpu.vector_store %arg8[%c0_14, %c0_15], %14 {strides = array<i32>} : memref<64x128xbf16, #tpu.memory_space<vmem>>, vector<64x128xbf16>,
    %16 = vector.extract_strided_slice %12 {offsets = [0, 128], sizes = [64, 128], strides = [1, 1]} : vector<64x384xf32> to vector<64x128xf32>
    %17 = arith.truncf %16 : vector<64x128xf32> to vector<64x128xbf16>
    %c0_16 = arith.constant 0 : index
    %c0_17 = arith.constant 0 : index
    %18 = vector.load %arg9[%c0_16, %c0_17] : memref<64x128xbf16, #tpu.memory_space<vmem>>, vector<64x128xbf16>
    tpu.vector_store %arg9[%c0_16, %c0_17], %17 {strides = array<i32>} : memref<64x128xbf16, #tpu.memory_space<vmem>>, vector<64x128xbf16>,
    %19 = vector.extract_strided_slice %12 {offsets = [0, 256], sizes = [64, 128], strides = [1, 1]} : vector<64x384xf32> to vector<64x128xf32>
    %20 = arith.truncf %19 : vector<64x128xf32> to vector<64x128xbf16>
    %c0_18 = arith.constant 0 : index
    %c0_19 = arith.constant 0 : index
    %21 = vector.load %arg10[%c0_18, %c0_19] : memref<64x128xbf16, #tpu.memory_space<vmem>>, vector<64x128xbf16>
    tpu.vector_store %arg10[%c0_18, %c0_19], %20 {strides = array<i32>} : memref<64x128xbf16, #tpu.memory_space<vmem>>, vector<64x128xbf16>,
    %c0_20 = arith.constant 0 : index
    %c0_21 = arith.constant 0 : index
    %22 = vector.load %arg8[%c0_20, %c0_21] : memref<64x128xbf16, #tpu.memory_space<vmem>>, vector<64x32xbf16>
    %23 = vector.shape_cast %22 : vector<64x32xbf16> to vector<4x16x32xbf16>
    %c0_22 = arith.constant 0 : index
    %c0_23 = arith.constant 0 : index
    %24 = vector.load %arg9[%c0_22, %c0_23] : memref<64x128xbf16, #tpu.memory_space<vmem>>, vector<64x32xbf16>
    %25 = vector.shape_cast %24 : vector<64x32xbf16> to vector<4x16x32xbf16>
    %c0_24 = arith.constant 0 : index
    %c0_25 = arith.constant 0 : index
    %26 = vector.load %arg10[%c0_24, %c0_25] : memref<64x128xbf16, #tpu.memory_space<vmem>>, vector<64x32xbf16>
    %27 = vector.shape_cast %26 : vector<64x32xbf16> to vector<4x16x32xbf16>
    "tpu.trace_start"() <{level = 10 : i32, message = "gqd,gkd->gqk"}> : () -> ()
    %cst_26 = arith.constant dense<0.000000e+00> : vector<4x16x16xf32>
    %28 = tpu.matmul %23, %25, %cst_26 {dimension_numbers = #tpu.dot_dimension_numbers<[2], [2], [1], [1], [0, 0, 0, 1, 1, 1], [0], [0]>} : vector<4x16x32xbf16>, vector<4x16x32xbf16>, vector<4x16x16xf32> -> vector<4x16x16xf32>
    "tpu.trace_stop"() : () -> ()
    %cst_27 = arith.constant dense<0xFF800000> : vector<4x16xf32>
    %29 = vector.multi_reduction <maximumf>, %28, %cst_27 [2] : vector<4x16x16xf32> to vector<4x16xf32>
    %30 = vector.shape_cast %29 : vector<4x16xf32> to vector<4x16x1xf32>
    %31 = vector.broadcast %30 : vector<4x16x1xf32> to vector<4x16x16xf32>
    %32 = arith.subf %28, %31 : vector<4x16x16xf32>
    %33 = math.exp %32 : vector<4x16x16xf32>
    %cst_28 = arith.constant dense<0.000000e+00> : vector<4x16xf32>
    %34 = vector.multi_reduction <add>, %33, %cst_28 [2] : vector<4x16x16xf32> to vector<4x16xf32>
    %35 = vector.shape_cast %34 : vector<4x16xf32> to vector<4x16x1xf32>
    %36 = tpu.reciprocal %35 {approx = true} : vector<4x16x1xf32> -> vector<4x16x1xf32>
    %37 = vector.broadcast %36 : vector<4x16x1xf32> to vector<4x16x16xf32>
    %38 = arith.mulf %33, %37 : vector<4x16x16xf32>
    %39 = arith.truncf %38 : vector<4x16x16xf32> to vector<4x16x16xbf16>
    "tpu.trace_start"() <{level = 10 : i32, message = "gqk,gkd->gqd"}> : () -> ()
    %cst_29 = arith.constant dense<0.000000e+00> : vector<4x16x32xf32>
    %40 = tpu.matmul %39, %27, %cst_29 {dimension_numbers = #tpu.dot_dimension_numbers<[2], [1], [1], [2], [0, 0, 0, 1, 1, 2], [0], [0]>} : vector<4x16x16xbf16>, vector<4x16x32xbf16>, vector<4x16x32xf32> -> vector<4x16x32xf32>
    "tpu.trace_stop"() : () -> ()
    %41 = vector.shape_cast %40 : vector<4x16x32xf32> to vector<64x32xf32>
    %42 = arith.truncf %41 : vector<64x32xf32> to vector<64x32xbf16>
    %c0_30 = arith.constant 0 : index
    %c0_31 = arith.constant 0 : index
    %43 = vector.load %arg11[%c0_30, %c0_31] : memref<64x128xbf16, #tpu.memory_space<vmem>>, vector<64x32xbf16>
    tpu.vector_store %arg11[%c0_30, %c0_31], %42 {strides = array<i32>} : memref<64x128xbf16, #tpu.memory_space<vmem>>, vector<64x32xbf16>,
    %c0_32 = arith.constant 0 : index
    %c32 = arith.constant 32 : index
    %44 = vector.load %arg8[%c0_32, %c32] : memref<64x128xbf16, #tpu.memory_space<vmem>>, vector<64x32xbf16>
    %45 = vector.shape_cast %44 : vector<64x32xbf16> to vector<4x16x32xbf16>
    %c0_33 = arith.constant 0 : index
    %c32_34 = arith.constant 32 : index
    %46 = vector.load %arg9[%c0_33, %c32_34] : memref<64x128xbf16, #tpu.memory_space<vmem>>, vector<64x32xbf16>
    %47 = vector.shape_cast %46 : vector<64x32xbf16> to vector<4x16x32xbf16>
    %c0_35 = arith.constant 0 : index
    %c32_36 = arith.constant 32 : index
    %48 = vector.load %arg10[%c0_35, %c32_36] : memref<64x128xbf16, #tpu.memory_space<vmem>>, vector<64x32xbf16>
    %49 = vector.shape_cast %48 : vector<64x32xbf16> to vector<4x16x32xbf16>
    "tpu.trace_start"() <{level = 10 : i32, message = "gqd,gkd->gqk"}> : () -> ()
    %cst_37 = arith.constant dense<0.000000e+00> : vector<4x16x16xf32>
    %50 = tpu.matmul %45, %47, %cst_37 {dimension_numbers = #tpu.dot_dimension_numbers<[2], [2], [1], [1], [0, 0, 0, 1, 1, 1], [0], [0]>} : vector<4x16x32xbf16>, vector<4x16x32xbf16>, vector<4x16x16xf32> -> vector<4x16x16xf32>
    "tpu.trace_stop"() : () -> ()
    %cst_38 = arith.constant dense<0xFF800000> : vector<4x16xf32>
    %51 = vector.multi_reduction <maximumf>, %50, %cst_38 [2] : vector<4x16x16xf32> to vector<4x16xf32>
    %52 = vector.shape_cast %51 : vector<4x16xf32> to vector<4x16x1xf32>
    %53 = vector.broadcast %52 : vector<4x16x1xf32> to vector<4x16x16xf32>
    %54 = arith.subf %50, %53 : vector<4x16x16xf32>
    %55 = math.exp %54 : vector<4x16x16xf32>
    %cst_39 = arith.constant dense<0.000000e+00> : vector<4x16xf32>
    %56 = vector.multi_reduction <add>, %55, %cst_39 [2] : vector<4x16x16xf32> to vector<4x16xf32>
    %57 = vector.shape_cast %56 : vector<4x16xf32> to vector<4x16x1xf32>
    %58 = tpu.reciprocal %57 {approx = true} : vector<4x16x1xf32> -> vector<4x16x1xf32>
    %59 = vector.broadcast %58 : vector<4x16x1xf32> to vector<4x16x16xf32>
    %60 = arith.mulf %55, %59 : vector<4x16x16xf32>
    %61 = arith.truncf %60 : vector<4x16x16xf32> to vector<4x16x16xbf16>
    "tpu.trace_start"() <{level = 10 : i32, message = "gqk,gkd->gqd"}> : () -> ()
    %cst_40 = arith.constant dense<0.000000e+00> : vector<4x16x32xf32>
    %62 = tpu.matmul %61, %49, %cst_40 {dimension_numbers = #tpu.dot_dimension_numbers<[2], [1], [1], [2], [0, 0, 0, 1, 1, 2], [0], [0]>} : vector<4x16x16xbf16>, vector<4x16x32xbf16>, vector<4x16x32xf32> -> vector<4x16x32xf32>
    "tpu.trace_stop"() : () -> ()
    %63 = vector.shape_cast %62 : vector<4x16x32xf32> to vector<64x32xf32>
    %64 = arith.truncf %63 : vector<64x32xf32> to vector<64x32xbf16>
    %c0_41 = arith.constant 0 : index
    %c32_42 = arith.constant 32 : index
    %65 = vector.load %arg11[%c0_41, %c32_42] : memref<64x128xbf16, #tpu.memory_space<vmem>>, vector<64x32xbf16>
    tpu.vector_store %arg11[%c0_41, %c32_42], %64 {strides = array<i32>} : memref<64x128xbf16, #tpu.memory_space<vmem>>, vector<64x32xbf16>,
    %c0_43 = arith.constant 0 : index
    %c64 = arith.constant 64 : index
    %66 = vector.load %arg8[%c0_43, %c64] : memref<64x128xbf16, #tpu.memory_space<vmem>>, vector<64x32xbf16>
    %67 = vector.shape_cast %66 : vector<64x32xbf16> to vector<4x16x32xbf16>
    %c0_44 = arith.constant 0 : index
    %c64_45 = arith.constant 64 : index
    %68 = vector.load %arg9[%c0_44, %c64_45] : memref<64x128xbf16, #tpu.memory_space<vmem>>, vector<64x32xbf16>
    %69 = vector.shape_cast %68 : vector<64x32xbf16> to vector<4x16x32xbf16>
    %c0_46 = arith.constant 0 : index
    %c64_47 = arith.constant 64 : index
    %70 = vector.load %arg10[%c0_46, %c64_47] : memref<64x128xbf16, #tpu.memory_space<vmem>>, vector<64x32xbf16>
    %71 = vector.shape_cast %70 : vector<64x32xbf16> to vector<4x16x32xbf16>
    "tpu.trace_start"() <{level = 10 : i32, message = "gqd,gkd->gqk"}> : () -> ()
    %cst_48 = arith.constant dense<0.000000e+00> : vector<4x16x16xf32>
    %72 = tpu.matmul %67, %69, %cst_48 {dimension_numbers = #tpu.dot_dimension_numbers<[2], [2], [1], [1], [0, 0, 0, 1, 1, 1], [0], [0]>} : vector<4x16x32xbf16>, vector<4x16x32xbf16>, vector<4x16x16xf32> -> vector<4x16x16xf32>
    "tpu.trace_stop"() : () -> ()
    %cst_49 = arith.constant dense<0xFF800000> : vector<4x16xf32>
    %73 = vector.multi_reduction <maximumf>, %72, %cst_49 [2] : vector<4x16x16xf32> to vector<4x16xf32>
    %74 = vector.shape_cast %73 : vector<4x16xf32> to vector<4x16x1xf32>
    %75 = vector.broadcast %74 : vector<4x16x1xf32> to vector<4x16x16xf32>
    %76 = arith.subf %72, %75 : vector<4x16x16xf32>
    %77 = math.exp %76 : vector<4x16x16xf32>
    %cst_50 = arith.constant dense<0.000000e+00> : vector<4x16xf32>
    %78 = vector.multi_reduction <add>, %77, %cst_50 [2] : vector<4x16x16xf32> to vector<4x16xf32>
    %79 = vector.shape_cast %78 : vector<4x16xf32> to vector<4x16x1xf32>
    %80 = tpu.reciprocal %79 {approx = true} : vector<4x16x1xf32> -> vector<4x16x1xf32>
    %81 = vector.broadcast %80 : vector<4x16x1xf32> to vector<4x16x16xf32>
    %82 = arith.mulf %77, %81 : vector<4x16x16xf32>
    %83 = arith.truncf %82 : vector<4x16x16xf32> to vector<4x16x16xbf16>
    "tpu.trace_start"() <{level = 10 : i32, message = "gqk,gkd->gqd"}> : () -> ()
    %cst_51 = arith.constant dense<0.000000e+00> : vector<4x16x32xf32>
    %84 = tpu.matmul %83, %71, %cst_51 {dimension_numbers = #tpu.dot_dimension_numbers<[2], [1], [1], [2], [0, 0, 0, 1, 1, 2], [0], [0]>} : vector<4x16x16xbf16>, vector<4x16x32xbf16>, vector<4x16x32xf32> -> vector<4x16x32xf32>
    "tpu.trace_stop"() : () -> ()
    %85 = vector.shape_cast %84 : vector<4x16x32xf32> to vector<64x32xf32>
    %86 = arith.truncf %85 : vector<64x32xf32> to vector<64x32xbf16>
    %c0_52 = arith.constant 0 : index
    %c64_53 = arith.constant 64 : index
    %87 = vector.load %arg11[%c0_52, %c64_53] : memref<64x128xbf16, #tpu.memory_space<vmem>>, vector<64x32xbf16>
    tpu.vector_store %arg11[%c0_52, %c64_53], %86 {strides = array<i32>} : memref<64x128xbf16, #tpu.memory_space<vmem>>, vector<64x32xbf16>,
    %c0_54 = arith.constant 0 : index
    %c96 = arith.constant 96 : index
    %88 = vector.load %arg8[%c0_54, %c96] : memref<64x128xbf16, #tpu.memory_space<vmem>>, vector<64x32xbf16>
    %89 = vector.shape_cast %88 : vector<64x32xbf16> to vector<4x16x32xbf16>
    %c0_55 = arith.constant 0 : index
    %c96_56 = arith.constant 96 : index
    %90 = vector.load %arg9[%c0_55, %c96_56] : memref<64x128xbf16, #tpu.memory_space<vmem>>, vector<64x32xbf16>
    %91 = vector.shape_cast %90 : vector<64x32xbf16> to vector<4x16x32xbf16>
    %c0_57 = arith.constant 0 : index
    %c96_58 = arith.constant 96 : index
    %92 = vector.load %arg10[%c0_57, %c96_58] : memref<64x128xbf16, #tpu.memory_space<vmem>>, vector<64x32xbf16>
    %93 = vector.shape_cast %92 : vector<64x32xbf16> to vector<4x16x32xbf16>
    "tpu.trace_start"() <{level = 10 : i32, message = "gqd,gkd->gqk"}> : () -> ()
    %cst_59 = arith.constant dense<0.000000e+00> : vector<4x16x16xf32>
    %94 = tpu.matmul %89, %91, %cst_59 {dimension_numbers = #tpu.dot_dimension_numbers<[2], [2], [1], [1], [0, 0, 0, 1, 1, 1], [0], [0]>} : vector<4x16x32xbf16>, vector<4x16x32xbf16>, vector<4x16x16xf32> -> vector<4x16x16xf32>
    "tpu.trace_stop"() : () -> ()
    %cst_60 = arith.constant dense<0xFF800000> : vector<4x16xf32>
    %95 = vector.multi_reduction <maximumf>, %94, %cst_60 [2] : vector<4x16x16xf32> to vector<4x16xf32>
    %96 = vector.shape_cast %95 : vector<4x16xf32> to vector<4x16x1xf32>
    %97 = vector.broadcast %96 : vector<4x16x1xf32> to vector<4x16x16xf32>
    %98 = arith.subf %94, %97 : vector<4x16x16xf32>
    %99 = math.exp %98 : vector<4x16x16xf32>
    %cst_61 = arith.constant dense<0.000000e+00> : vector<4x16xf32>
    %100 = vector.multi_reduction <add>, %99, %cst_61 [2] : vector<4x16x16xf32> to vector<4x16xf32>
    %101 = vector.shape_cast %100 : vector<4x16xf32> to vector<4x16x1xf32>
    %102 = tpu.reciprocal %101 {approx = true} : vector<4x16x1xf32> -> vector<4x16x1xf32>
    %103 = vector.broadcast %102 : vector<4x16x1xf32> to vector<4x16x16xf32>
    %104 = arith.mulf %99, %103 : vector<4x16x16xf32>
    %105 = arith.truncf %104 : vector<4x16x16xf32> to vector<4x16x16xbf16>
    "tpu.trace_start"() <{level = 10 : i32, message = "gqk,gkd->gqd"}> : () -> ()
    %cst_62 = arith.constant dense<0.000000e+00> : vector<4x16x32xf32>
    %106 = tpu.matmul %105, %93, %cst_62 {dimension_numbers = #tpu.dot_dimension_numbers<[2], [1], [1], [2], [0, 0, 0, 1, 1, 2], [0], [0]>} : vector<4x16x16xbf16>, vector<4x16x32xbf16>, vector<4x16x32xf32> -> vector<4x16x32xf32>
    "tpu.trace_stop"() : () -> ()
    %107 = vector.shape_cast %106 : vector<4x16x32xf32> to vector<64x32xf32>
    %108 = arith.truncf %107 : vector<64x32xf32> to vector<64x32xbf16>
    %c0_63 = arith.constant 0 : index
    %c96_64 = arith.constant 96 : index
    %109 = vector.load %arg11[%c0_63, %c96_64] : memref<64x128xbf16, #tpu.memory_space<vmem>>, vector<64x32xbf16>
    tpu.vector_store %arg11[%c0_63, %c96_64], %108 {strides = array<i32>} : memref<64x128xbf16, #tpu.memory_space<vmem>>, vector<64x32xbf16>,
    %c0_65 = arith.constant 0 : index
    %c0_66 = arith.constant 0 : index
    %110 = vector.load %arg11[%c0_65, %c0_66] : memref<64x128xbf16, #tpu.memory_space<vmem>>, vector<64x128xbf16>
    %cst_67 = arith.constant dense<0.000000e+00> : vector<64x128xf32>
    %111 = tpu.matmul %110, %7, %cst_67 {dimension_numbers = #tpu.dot_dimension_numbers<[1], [0], [0], [1], [0, 0, 1, 1], [], []>} : vector<64x128xbf16>, vector<128x128xbf16>, vector<64x128xf32> -> vector<64x128xf32>
    %112 = vector.broadcast %9 : vector<1x128xf32> to vector<64x128xf32>
    %113 = arith.addf %111, %112 : vector<64x128xf32>
    %114 = vector.shape_cast %113 : vector<64x128xf32> to vector<4x16x128xf32>
    %115 = arith.truncf %114 : vector<4x16x128xf32> to vector<4x16x128xbf16>
    %c0_68 = arith.constant 0 : index
    %c0_69 = arith.constant 0 : index
    %c0_70 = arith.constant 0 : index
    %116 = vector.load %arg7[%c0_68, %c0_69, %c0_70] : memref<4x16x128xbf16, #tpu.memory_space<vmem>>, vector<4x16x128xbf16>
    tpu.vector_store %arg7[%c0_68, %c0_69, %c0_70], %115 {strides = array<i32>} : memref<4x16x128xbf16, #tpu.memory_space<vmem>>, vector<4x16x128xbf16>,
    return
  }
  func.func @transform_0(%arg0: i32, %arg1: i32) -> (i32, i32, i32) {
    %c0_i32 = arith.constant 0 : i32
    %c0_i32_0 = arith.constant 0 : i32
    return %arg1, %c0_i32, %arg0 : i32, i32, i32
  }
  func.func @transform_1(%arg0: i32, %arg1: i32) -> (i32, i32, i32) {
    %c0_i32 = arith.constant 0 : i32
    %c0_i32_0 = arith.constant 0 : i32
    %c0_i32_1 = arith.constant 0 : i32
    return %arg0, %c0_i32, %c0_i32_0 : i32, i32, i32
  }
  func.func @transform_2(%arg0: i32, %arg1: i32) -> (i32, i32, i32) {
    %c0_i32 = arith.constant 0 : i32
    %c0_i32_0 = arith.constant 0 : i32
    %c0_i32_1 = arith.constant 0 : i32
    return %arg0, %c0_i32, %c0_i32_0 : i32, i32, i32
  }
  func.func @transform_3(%arg0: i32, %arg1: i32) -> (i32, i32, i32) {
    %c0_i32 = arith.constant 0 : i32
    %c0_i32_0 = arith.constant 0 : i32
    %c0_i32_1 = arith.constant 0 : i32
    return %arg0, %c0_i32, %c0_i32_0 : i32, i32, i32
  }
  func.func @transform_4(%arg0: i32, %arg1: i32) -> (i32, i32, i32) {
    %c0_i32 = arith.constant 0 : i32
    %c0_i32_0 = arith.constant 0 : i32
    %c0_i32_1 = arith.constant 0 : i32
    return %arg0, %c0_i32, %c0_i32_0 : i32, i32, i32
  }
  func.func @transform_5(%arg0: i32, %arg1: i32) -> (i32, i32, i32) {
    %c0_i32 = arith.constant 0 : i32
    %c0_i32_0 = arith.constant 0 : i32
    return %arg1, %c0_i32, %arg0 : i32, i32, i32
  }
}

</mosaic_0001>

<bundles_post_ra>
// kernel: tpu_custom_call.1
= control target key start
LH: loop header
LB: loop body
LE: loop exit
PB: predicated region body
PF: predicated region fallthrough
CT: control target
= control target key end

     0   :  { %10 = vsyncpa [#allocation7], 0  ;;  %s4852_s0 = inlined_call_operand.hbm [shape: bf16[4,16,256], index: 0, kind: input, shape index: {}]   ;;  %s4853_s1 = inlined_call_operand.hbm [shape: bf16[2,128,384], index: 1, kind: input, shape index: {}]   ;;  %s4854_s2 = inlined_call_operand.vmem [shape: f32[2,1,384], index: 2, kind: input, shape index: {}]   ;;  %s4855_s3 = inlined_call_operand.hbm [shape: bf16[2,128,128], index: 3, kind: input, shape index: {}]   ;;  %s4856_s4 = inlined_call_operand.vmem [shape: f32[2,1,128], index: 4, kind: input, shape index: {}]   ;;  %s4857_s5 = inlined_call_operand.hbm [shape: bf16[4,16,256], index: 5, kind: output, shape index: {}]  }
   0x1   :  { %12 = vsyncpa [#allocation7 + $0x1], 0 }
   0x2   :  { %13 = vsyncpa [#allocation10], 0 }
   0x3   :  { %14 = vsyncpa [#allocation8], 0 }
   0x4   :  { %16 = vsyncpa [#allocation8 + $0x1], 0  ;;  %s4059_s18 = smov 0   ;;  %s4061_s19 = smov 0  }
   0x5   :  { %s4063_s20 = smov 0   ;;  %s4065_s21 = smov 0  }
   0x6   :  { %s4067_s22 = smov 0   ;;  %s4069_s23 = smov 0  }
   0x7 LB: > { %s3119_s24 = sadd.s32 4294967295, %s4010_s23   ;;  %s3120_s25 = sadd.s32 4294967294, %s4010_s23   ;;  %s4010_s23 = sphi %s4069_s23, %s22_s23   ;;  %s4006_s22 = sphi %s4067_s22, %s4877_s22   ;;  %s4002_s21 = sphi %s4065_s21, %s4876_s21   ;;  %s3998_s20 = sphi %s4063_s20, %s4875_s20   ;;  %s3994_s19 = sphi %s4061_s19, %s4874_s19   ;;  %s3990_s18 = sphi %s4059_s18, %s4873_s18  }
   0x8   : > { %p56_p0 = scmp.ne.s32.totalorder %s3994_s19, %s3990_s18  ;;  %p57_p1 = scmp.eq.s32.totalorder %s3119_s24, 0 }
   0x9   : > { %p4093_p2 = scmp.eq.s32.totalorder %s3119_s24, 1  ;;  %p192_p3 = scmp.eq.s32.totalorder %s3120_s25, 1 }
   0xa   : > { %p4097_p4 = por %p57_p1, %p56_p0  ;;  %p3121_p5 = scmp.ge.s32.totalorder %s4010_s23, 1 }
   0xb   : > { %s4861_s26 = scalar_select %p4093_p2, 1, 0 }
   0xc   : > { %s4862_s27 = scalar_select %p4097_p4, 1, 0 }
   0xd   : > { %p4102_p6 = por %p192_p3, %p56_p0  ;;  %p199_p7 = scmp.lt.s32.totalorder %s4010_s23, 3 }
   0xe   : > { %s3572_s29 = smul.u32 3072, %s4002_s21  ;;  %s4012_s6 = smov [#allocation9]  }
   0xf   : > { %s4863_s28 = scalar_select %p4102_p6, 1, 0 }
  0x10   : > { %p4108_p8 = pnand %p3121_p5, %p199_p7  ;;  %s214_s7 = sshll.u32 %s4012_s6, 4  ;;  %s4117_s7 = int_to_ptr.vmem [resolvable:$true] %s214_s7 }
  0x11   : > { %s4115_s10 = scalar_lea.hbm %s4853_s1, %s3572_s29  ;;  %s3212_s11 = sshll.u32 %s4002_s21, 10 }
  0x12   : > { %s4864_s30 = scalar_select %p4108_p8, 1, 0 }
  0x13   : > { %p3582_p9 = pneg %p4108_p8  ;;  %s4132_s15 = scalar_lea.hbm %s4855_s3, %s3212_s11 }
  0x14   : > { %s4013_s16 = smov [#allocation11]   ;;  %s3834_s24 = scalar_lea.hbm %s4115_s10, 3072 }
  0x15   : > { %p4124_p10 = pnand %p3582_p9, %p4097_p4  ;;  %s4134_s17 = sshll.u32 %s4013_s16, 4  ;;  %s238_s17 = int_to_ptr.vmem [resolvable:$true] %s4134_s17 }
  0x16   : > { %p3835_p12 = scmp.ne.s32.totalorder %s4115_s10, %s3834_s24  ;;  %s3839_s6 = scalar_lea.hbm %s4853_s1, 6144 }
  0x17   : > { %p3836_p13 = pneg %p4124_p10  ;;  %p3840_p3 = scmp.lt.u32.totalorder %s4115_s10, %s4853_s1 }
  0x18   : > { %p3841_p5 = scmp.lt.u32.totalorder %s3839_s6, %s3834_s24  ;;  %p3843_p9 = scmp.lt.u32.totalorder %s3834_s24, %s4115_s10 }
  0x19   : > { %p3837_p0 = pnand %p3836_p13, %p3835_p12 }
  0x1a   : > { %p3842_p7 = por %p3841_p5, %p3840_p3 }
  0x1b   : > { %p3838_p1 = pneg %p3837_p0 }
  0x1c   : > { %p3844_p11 = por %p3843_p9, %p3842_p7 }
  0x1e   : > { %p3845_p6 = pnand %p3844_p11, %p3838_p1 }
  0x20   : > { %3848 = shalt.err (!%p3845_p6)
}
  0x21   : > { %s3849_s11 = scalar_lea.vmem %s4117_s7, 3072  ;;  %p3857_p8 = scmp.lt.s32.totalorder %s4117_s7, %s4117_s7 }
  0x22   : > { %p3850_p12 = scmp.ne.s32.totalorder %s4117_s7, %s3849_s11  ;;  %p3858_p2 = scmp.lt.s32.totalorder %s3849_s11, %s3849_s11 }
  0x24   : > { %p3852_p0 = pnand %p3850_p12, %p3836_p13  ;;  %p3859_p3 = por %p3858_p2, %p3857_p8 }
  0x26   : > { %p3853_p4 = pneg %p3852_p0 }
  0x28   : > { %p3860_p5 = pnand %p3859_p3, %p3853_p4 }
  0x2a   : > { %3863 = shalt.err (!%p3860_p5)
}
  0x2b   : > { %s4014_s13 = smov 192   ;;  %s4015_s14 = smov 12  }
  0x2c   : > { %3585 = dma.hbm_to_vmem [thread:$0]  (!%p4124_p10), %s4115_s10, 3072, %s4117_s7, [#allocation10], %s4014_s13, %s4014_s13, %s4015_s14  }
  0x2d   : > { %s3864_s16 = scalar_lea.hbm %s4132_s15, 1024  ;;  %s3869_s29 = scalar_lea.hbm %s4855_s3, 2048 }
  0x2e   : > { %p3865_p6 = scmp.ne.s32.totalorder %s4132_s15, %s3864_s16  ;;  %p3870_p8 = scmp.lt.u32.totalorder %s4132_s15, %s4855_s3 }
  0x2f   : > { %p3871_p11 = scmp.lt.u32.totalorder %s3869_s29, %s3864_s16  ;;  %p3873_p7 = scmp.lt.u32.totalorder %s3864_s16, %s4132_s15 }
  0x30   : > { %p3867_p2 = pnand %p3865_p6, %p3836_p13 }
  0x31   : > { %p3872_p1 = por %p3871_p11, %p3870_p8 }
  0x32   : > { %p3868_p4 = pneg %p3867_p2 }
  0x33   : > { %p3874_p9 = por %p3873_p7, %p3872_p1 }
  0x35   : > { %p3875_p12 = pnand %p3874_p9, %p3868_p4 }
  0x37   : > { %3878 = shalt.err (!%p3875_p12)
}
  0x38   : > { %s3879_s7 = scalar_lea.vmem %s238_s17, 1024  ;;  %p3887_p6 = scmp.lt.s32.totalorder %s238_s17, %s238_s17 }
  0x39   : > { %p3880_p0 = scmp.ne.s32.totalorder %s238_s17, %s3879_s7  ;;  %p3888_p2 = scmp.lt.s32.totalorder %s3879_s7, %s3879_s7 }
  0x3b   : > { %p3882_p3 = pnand %p3880_p0, %p3836_p13  ;;  %p3889_p8 = por %p3888_p2, %p3887_p6 }
  0x3d   : > { %p3883_p5 = pneg %p3882_p3 }
  0x3f   : > { %p3890_p11 = pnand %p3889_p8, %p3883_p5 }
  0x41   : > { %3893 = shalt.err (!%p3890_p11)
}
  0x42   : > { %s4016_s10 = smov 64   ;;  %s4017_s9 = smov 4  }
  0x43   : > { %3588 = dma.hbm_to_vmem [thread:$0]  (!%p4124_p10), %s4132_s15, 1024, %s238_s17, [#allocation10], %s4016_s10, %s4016_s10, %s4017_s9  }
  0x44   : > { %s43_s11 = sadd.s32 1, %s3998_s20  ;;  %s34_s13 = sadd.s32 1, %s4006_s22 }
  0x45   : > { %p50_p13 = scmp.ne.s32.totalorder %s3998_s20, %s3994_s19  ;;  %p36_p4 = scmp.ge.s32.totalorder %s34_s13, 2 }
  0x46   : > { %p51_p1 = scmp.eq.s32.totalorder %s4010_s23, 0  ;;  %p4866_p7 = scmp.ne.s32.totalorder %s4861_s26, 0 }
  0x47   : > { %p3597_p12 = scmp.lt.s32.totalorder %s4010_s23, 2  ;;  %s4879_s13 = smov (%p36_p4, %s34_s13), 0 }
  0x48   : > { %p4192_p9 = por %p4866_p7, %p50_p13  ;;  %p52_p0 = por %p51_p1, %p50_p13 }
  0x49   : > { %s257_s12 = sand.u32 1, %s3998_s20   ;;  %s39_s16 = ssub.s32 %s4006_s22, %s4879_s13 }
  0x4a   : > { %p41_p3 = scmp.eq.s32.totalorder %s39_s16, 0  ;;  %s3126_s15 = sshll.u32 %s257_s12, 5 }
  0x4b   : > { %s3127_s17 = sshll.u32 %s4006_s22, 6  ;;  %s261_s6 = scalar_lea.vmem [#allocation6], %s3126_s15 }
  0x4c   : > { %s4204_s24 = scalar_select %p41_p3, %s3998_s20, %s43_s11  }
  0x4d   : > { %s4209_s26 = scalar_lea.hbm %s4852_s0, %s3127_s17  ;;  %s270_s8 = sshll.u32 %s261_s6, 4  ;;  %s4211_s8 = int_to_ptr.vmem [resolvable:$true] %s270_s8 }
  0x4e   : > { %p4215_p10 = pnand %p3597_p12, %p52_p0  ;;  %s4219_s11 = scalar_lea.sflag [#allocation7], %s257_s12 }
  0x4f   : > { %s3894_s16 = scalar_lea.hbm %s4209_s26, 512  ;;  %s3899_s25 = scalar_lea.hbm %s4852_s0, 1024 }
  0x50   : > { %p3895_p5 = scmp.ne.s32.totalorder %s4209_s26, %s3894_s16  ;;  %p3896_p6 = pneg %p4215_p10 }
  0x51   : > { %p3900_p11 = scmp.lt.u32.totalorder %s4209_s26, %s4852_s0  ;;  %p3901_p13 = scmp.lt.u32.totalorder %s3899_s25, %s3894_s16 }
  0x52   : > { %p3897_p2 = pnand %p3896_p6, %p3895_p5  ;;  %p3903_p1 = scmp.lt.u32.totalorder %s3894_s16, %s4209_s26 }
  0x53   : > { %p3902_p4 = por %p3901_p13, %p3900_p11 }
  0x54   : > { %p3898_p8 = pneg %p3897_p2 }
  0x55   : > { %p3904_p7 = por %p3903_p1, %p3902_p4 }
  0x57   : > { %p3905_p12 = pnand %p3904_p7, %p3898_p8 }
  0x59   : > { %3908 = shalt.err (!%p3905_p12)
}
  0x5a   : > { %s3909_s12 = scalar_lea.vmem %s4211_s8, 512  ;;  %s4018_s15 = smov [#allocation6]  }
  0x5b   : > { %p3910_p0 = scmp.ne.s32.totalorder %s4211_s8, %s3909_s12  ;;  %s3914_s17 = sshll.u32 %s4018_s15, 4  ;;  %s3915_s17 = int_to_ptr.vmem [resolvable:$false] %s3914_s17 }
  0x5c   : > { %s3916_s29 = scalar_lea.vmem %s3915_s17, 1024  ;;  %p3917_p2 = scmp.lt.s32.totalorder %s4211_s8, %s3915_s17 }
  0x5d   : > { %p3912_p3 = pnand %p3910_p0, %p3896_p6  ;;  %p3918_p11 = scmp.lt.s32.totalorder %s3916_s29, %s3909_s12 }
  0x5f   : > { %p3913_p5 = pneg %p3912_p3  ;;  %p3919_p13 = por %p3918_p11, %p3917_p2 }
  0x61   : > { %p3920_p4 = pnand %p3919_p13, %p3913_p5 }
  0x63   : > { %3923 = shalt.err (!%p3920_p4)
}
  0x64   : > { %s4019_s16 = smov 128   ;;  %p4869_p6 = scmp.ne.s32.totalorder %s4864_s30, 0 }
  0x65   : > { %3592 = dma.hbm_to_vmem [thread:$0]  (!%p4215_p10), %s4209_s26, 512, %s4211_s8, %s4219_s11, %s4019_s16, %s4016_s10, %s4017_s9  }
  0x66   : > { %282 = sbr.rel (%p4869_p6) target bundleno = 3343 (0xd0f), region = 40  ;;  %s4252_s25 = sand.u32 (!%p4869_p6), 1, %s3994_s19  }
  0x67   : > { %s3129_s6 = sshll.u32 (!%p4869_p6), %s4252_s25, 5  ;;  %s285_s12 = scalar_lea.sflag (!%p4869_p6), [#allocation7], %s4252_s25 }
  0x68   : > { %s4258_s7 = scalar_lea.vmem (!%p4869_p6), [#allocation6], %s3129_s6  ;;  %p4870_p8 = scmp.ne.s32.totalorder (!%p4869_p6), %s4862_s27, 0 }
  0x6d   : > { %3977 = dma.done.wait (%p4870_p8), %s285_s12, 512  }
  0x6e   : > { %3979 = vsyncadd (%p4870_p8), %s285_s12, 4294966784 }
  0x6f   : > { %3981 = dma.done.wait (%p4870_p8), [#allocation10], 4096  }
  0x70   : > { %3983 = vsyncadd (%p4870_p8), [#allocation10], 4294963200  ;;  %v4020_v0 = vmov 0   ;;  %v3662_v1 = vld [vmem:[#allocation9 + $0x4] ss:$12 sps:$4 sm:$0xff]   ;;  %v3687_v22 = vld [vmem:[%s4258_s7 + $0x8] sm:$0xff]   ;;  %v399_v30 = vlaneseq }
  0x71   : > { %598 = vmatprep.mubr.bf16.mxu1 %v4020_v0  ;;  %v3664_v2 = vld [vmem:[#allocation9] ss:$12 sps:$4 sm:$0xff]   ;;  %566 = vmatprep.subr.bf16.mxu1 %v3662_v1  ;;  %v3665_v3 = vld [vmem:[#allocation9 + $0x1c] ss:$12 sps:$4 sm:$0xff]   ;;  %v3667_v4 = vld [vmem:[#allocation9 + $0x18] ss:$12 sps:$4 sm:$0xff]  }
  0x72   : > { %567 = vmatpush1.bf16.msra.mxu1 %v3664_v2  ;;  %v3668_v5 = vld [vmem:[#allocation9 + $0x34] ss:$12 sps:$4 sm:$0xff]   ;;  %v3670_v6 = vld [vmem:[#allocation9 + $0x30] ss:$12 sps:$4 sm:$0xff]   ;;  %v3671_v7 = vld [vmem:[#allocation9 + $0x4c] ss:$12 sps:$4 sm:$0xff]  }
  0x73   : > { %568 = vmatprep.subr.bf16.mxu1 %v3665_v3  ;;  %v3673_v8 = vld [vmem:[#allocation9 + $0x48] ss:$12 sps:$4 sm:$0xff]   ;;  %v3686_v9 = vld [vmem:[%s4258_s7] sm:$0xff]   ;;  %v3682_v18 = vld [vmem:[#allocation9 + $0x90] ss:$12 sps:$4 sm:$0xff]   ;;  %v4021_v29 = vmov 0.0  }
  0x74   : > { %v3674_v10 = vld [vmem:[#allocation9 + $0x64] ss:$12 sps:$4 sm:$0xff]   ;;  %v3676_v11 = vld [vmem:[#allocation9 + $0x60] ss:$12 sps:$4 sm:$0xff]   ;;  %3348 = vmatprep.mubr.bf16.mxu0 %v3686_v9  ;;  %v3677_v12 = vld [vmem:[#allocation9 + $0x7c] ss:$12 sps:$4 sm:$0xff]  }
  0x75   : > { %v3690_v13 = vld [vmem:[#allocation9 + $0x8] ss:$12 sps:$4 sm:$0xff]   ;;  %v3691_v14 = vld [vmem:[#allocation9 + $0x20] ss:$12 sps:$4 sm:$0xff]   ;;  %v3679_v15 = vld [vmem:[#allocation9 + $0x78] ss:$12 sps:$4 sm:$0xff]  }
  0x76   : > { %569 = vmatpush1.bf16.msra.mxu1 %v3667_v4  ;;  %3332 = vmatprep.subr.bf16.mxu0 %v3690_v13  ;;  %v3680_v16 = vld [vmem:[#allocation9 + $0x94] ss:$12 sps:$4 sm:$0xff]   ;;  %v3692_v17 = vld [vmem:[#allocation9 + $0x38] ss:$12 sps:$4 sm:$0xff]   ;;  %v3693_v19 = vld [vmem:[#allocation9 + $0x50] ss:$12 sps:$4 sm:$0xff]  }
  0x77   : > { %570 = vmatprep.subr.bf16.mxu1 %v3668_v5  ;;  %3333 = vmatpush3.bf16.msra.mxu0 %v3690_v13  ;;  %v3683_v20 = vld [vmem:[#allocation9 + $0xac] ss:$12 sps:$4 sm:$0xff]   ;;  %v3685_v21 = vld [vmem:[#allocation9 + $0xa8] ss:$12 sps:$4 sm:$0xff]   ;;  %v3697_v28 = vld [vmem:[#allocation9 + $0xb0] ss:$12 sps:$4 sm:$0xff]  }
  0x78   : > { %3334 = vmatprep.subr.bf16.mxu0 %v3691_v14  ;;  %v3688_v23 = vld [vmem:[%s4258_s7 + $0x10] sm:$0xff]   ;;  %v3689_v24 = vld [vmem:[%s4258_s7 + $0x18] sm:$0xff]   ;;  %v3695_v26 = vld [vmem:[#allocation9 + $0x80] ss:$12 sps:$4 sm:$0xff]   ;;  %vm4022_vm0 = vmmov 0   ;;  %p331_p10 = scmp.lt.s32.totalorder %s4002_s21, 1 }
  0x79   : > { %v3694_v25 = vld [vmem:[#allocation9 + $0x68] ss:$12 sps:$4 sm:$0xff]   ;;  %v3696_v27 = vld [vmem:[#allocation9 + $0x98] ss:$12 sps:$4 sm:$0xff]   ;;  %v4283_v31 = vshrl.u32 %v399_v30, 7  ;;  %vm740_vm1 = vcmask 261120  }
  0x7a   : > { %571 = vmatpush1.bf16.msra.mxu1 %v3670_v6  ;;  %s4280_s27 = scalar_select %p331_p10, %s4002_s21, 1  ;;  %vm929_vm2 = vcmask 130048   ;;  %vm1734_vm3 = vcmask 523520   ;;  %vm2267_vm4 = vcmask 785920   ;;  %vm2800_vm5 = vcmask 1048320  }
  0x7b   : > { %572 = vmatprep.subr.bf16.mxu1 %v3671_v7  ;;  %3335 = vmatpush3.bf16.msra.mxu0 %v3691_v14  ;;  %v401_v32 = vsub.s32 0, %v4283_v31  ;;  %v405_v34 = vsub.s32 1, %v4283_v31  ;;  %s4023_s8 = smov 96   ;;  %s4024_s11 = smov 64  }
  0x7c   : > { %3336 = vmatprep.subr.bf16.mxu0 %v3692_v17  ;;  %s3573_s30 = smul.u32 3, %s4280_s27  ;;  %s4025_s15 = smov 32  }
  0x7d   : > { %s337_s16 = scalar_lea.vmem %s4856_s4, %s4280_s27  ;;  %s329_s12 = scalar_lea.vmem [#allocation12], %s3129_s6 }
  0x7e   : > { %573 = vmatpush1.bf16.msra.mxu1 %v3673_v8  ;;  %s334_s26 = scalar_lea.vmem %s4854_s2, %s3573_s30  ;;  %s2984_s7 = sshll.u32 %s329_s12, 4  ;;  %s4797_s7 = int_to_ptr.vmem [resolvable:$true] %s2984_s7 }
  0x7f   : > { %574 = vmatprep.subr.bf16.mxu1 %v3674_v10  ;;  %3337 = vmatpush3.bf16.msra.mxu0 %v3692_v17  ;;  %v4289_v33 = vld [vmem:[%s334_s26] sm:$0x7]  ;;  %v409_v17 = vsub.s32 2, %v4283_v31  ;;  %s3209_s27 = sshll.u32 %s4002_s21, 6  ;;  %s2969_s21 = scalar_lea.sflag [#allocation8], %s4252_s25 }
  0x80   : > { %3338 = vmatprep.subr.bf16.mxu0 %v3693_v19  ;;  %v402_v35 = vrot.slane %v4289_v33, %v401_v32  ;;  %v406_v37 = vrot.slane %v4289_v33, %v405_v34  ;;  %s4802_s10 = scalar_lea.hbm %s4857_s5, %s3209_s27  ;;  %s3924_s9 = scalar_lea.vmem %s4797_s7, 512 }
  0x81   : > { %p3925_p1 = scmp.ne.s32.totalorder %s4797_s7, %s3924_s9  ;;  %s4026_s26 = smov [#allocation12]  }
  0x82   : > { %575 = vmatpush1.bf16.msra.mxu1 %v3676_v11 }
  0x83   : > { %576 = vmatprep.subr.bf16.mxu1 %v3677_v12  ;;  %3339 = vmatpush3.bf16.msra.mxu0 %v3693_v19  ;;  %p3926_p7 = pnand %p3925_p1, %p4192_p9 }
  0x84   : > { %3340 = vmatprep.subr.bf16.mxu0 %v3694_v25 }
  0x85   : > { %p3927_p12 = pneg %p3926_p7 }
  0x86   : > { %577 = vmatpush1.bf16.msra.mxu1 %v3679_v15 }
  0x87   : > { %578 = vmatprep.subr.bf16.mxu1 %v3680_v16  ;;  %3341 = vmatpush3.bf16.msra.mxu0 %v3694_v25 }
  0x88   : > { %3342 = vmatprep.subr.bf16.mxu0 %v3695_v26 }
  0x8a   : > { %579 = vmatpush1.bf16.msra.mxu1 %v3682_v18 }
  0x8b   : > { %580 = vmatprep.subr.bf16.mxu1 %v3683_v20  ;;  %3343 = vmatpush3.bf16.msra.mxu0 %v3695_v26  ;;  %v410_v20 = vrot.slane %v4289_v33, %v409_v17 }
  0x8c   : > { %3344 = vmatprep.subr.bf16.mxu0 %v3696_v27 }
  0x8e   : > { %581 = vmatpush1.bf16.msra.mxu1 %v3685_v21 }
  0x8f   : > { %3345 = vmatpush3.bf16.msra.mxu0 %v3696_v27  ;;  %3356 = vmatprep.subr.bf16.mxu1 %v4021_v29 }
  0x90   : > { %3346 = vmatprep.subr.bf16.mxu0 %v3697_v28 }
  0x91   : > { %599 = vmatmul.mubr.bf16.vlgmr.msra.gmra.mrb[0].mxu1 %v3686_v9 }
  0x92   : > { %608 = vmatprep.mubr.bf16.mxu1 %v4020_v0 }
  0x93   : > { %3347 = vmatpush3.bf16.msra.mxu0 %v3697_v28 }
  0x94   : > { %3368 = vmatprep.subr.bf16.mxu0 %v4021_v29 }
  0x96   : > { %3349 = vmatmul.mubr.bf16.vlgmr.msra.gmra.mrb[0].mxu0 %v3687_v22 }
  0x97   : > { %3352 = vmatprep.mubr.bf16.mxu0 %v3688_v23 }
  0x99   : > { %609 = vmatmul.mubr.bf16.gmra.mrb[4].mxu1 %v3687_v22 }
  0x9a   : > { %618 = vmatprep.mubr.bf16.mxu1 %v4020_v0 }
  0x9e   : > { %3353 = vmatmul.mubr.bf16.gmra.mrb[4].mxu0 %v3689_v24 }
  0x9f   : > { %3370 = vmatprep.mubr.msk.bf16.mxu0 %vm4022_vm0, %v4021_v29 }
  0xa1   : > { %619 = vmatmul.mubr.bf16.gmra.mrb[8].mxu1 %v3688_v23 }
  0xa2   : > { %628 = vmatprep.mubr.bf16.mxu1 %v4020_v0 }
  0xa9   : > { %629 = vmatmul.mubr.bf16.gmra.mrb[12].mxu1 %v3689_v24 }
  0xaa   : > { %3358 = vmatprep.mubr.msk.bf16.mxu1 %vm4022_vm0, %v4021_v29 }
 0x164   : > { %v600_v36 = vpop.f32.mrb[0].mxu1 }
 0x165   : > { %v602_v38 = vpop.f32.mrb[1].mxu1  ;;  %v601_v40 = vadd.f32 %v600_v36, %v402_v35 }
 0x166   : > { %v604_v39 = vpop.f32.mrb[2].mxu1  ;;  %v603_v43 = vadd.f32 %v602_v38, %v406_v37 }
 0x167   : > { %v605_v41 = vadd.f32 %v604_v39, %v402_v35  ;;  %v606_v42 = vpop.f32.mrb[3].mxu1 }
 0x168   : > { %v607_v44 = vadd.f32 %v606_v42, %v406_v37 }
 0x169   : > { %v4294_v45 = vpack.c.bf16 %v605_v41, %v601_v40  ;;  %v3350_v18 = vpop.f32.mrb[0].mxu0 }
 0x16a   : > { %v4296_v46 = vpack.c.bf16 %v607_v44, %v603_v43  ;;  %v673_v19 = vpop.f32.mrb[1].mxu0  ;;  %v682_v23 = vadd.f32 %v3350_v18, %v410_v20 }
 0x16b   : > { %v3351_v21 = vpop.f32.mrb[2].mxu0  ;;  %v674_v24 = vadd.f32 %v673_v19, %v410_v20 }
 0x16c   : > { %v610_v47 = vpop.f32.mrb[4].mxu1  ;;  %v745_v48 = vsel %vm740_vm1, %v4296_v46, 0  ;;  %v676_v22 = vpop.f32.mrb[3].mxu0  ;;  %v685_v25 = vadd.f32 %v3351_v21, %v410_v20 }
 0x16d   : > { %v612_v49 = vpop.f32.mrb[5].mxu1  ;;  %3357 = vmatpush3.bf16.xpose.msra.mxu1 %v745_v48  ;;  %v611_v51 = vadd.f32 %v610_v47, %v402_v35  ;;  %v677_v26 = vadd.f32 %v676_v22, %v410_v20 }
 0x16e   : > { %v614_v50 = vpop.f32.mrb[6].mxu1  ;;  %3362 = vmatprep.subr.bf16.mxu1 %v4021_v29  ;;  %v613_v54 = vadd.f32 %v612_v49, %v406_v37  ;;  %v4340_v27 = vpack.c.bf16 %v685_v25, %v682_v23 }
 0x16f   : > { %v615_v52 = vadd.f32 %v614_v50, %v402_v35  ;;  %v616_v53 = vpop.f32.mrb[7].mxu1  ;;  %v4342_v28 = vpack.c.bf16 %v677_v26, %v674_v24 }
 0x170   : > { %v617_v55 = vadd.f32 %v616_v53, %v406_v37 }
 0x171   : > { %v4301_v56 = vpack.c.bf16 %v615_v52, %v611_v51  ;;  %v3354_v30 = vpop.f32.mrb[4].mxu0 }
 0x172   : > { %v4303_v57 = vpack.c.bf16 %v617_v55, %v613_v54  ;;  %v689_v31 = vpop.f32.mrb[5].mxu0  ;;  %v698_v34 = vadd.f32 %v3354_v30, %v410_v20 }
 0x173   : > { %v3355_v32 = vpop.f32.mrb[6].mxu0 }
 0x174   : > { %v620_v58 = vpop.f32.mrb[8].mxu1  ;;  %3359 = vmatmul.mubr.msk.bf16.vlgmr.msra.gmra.mrb[16].mxu1 %vm740_vm1, %v4294_v45  ;;  %v792_v59 = vsel %vm740_vm1, %v4303_v57, 0  ;;  %v692_v33 = vpop.f32.mrb[7].mxu0  ;;  %v701_v36 = vadd.f32 %v3355_v32, %v410_v20 }
 0x175   : > { %v622_v60 = vpop.f32.mrb[9].mxu1  ;;  %3363 = vmatpush3.bf16.xpose.msra.mxu1 %v792_v59  ;;  %3364 = vmatprep.mubr.msk.bf16.mxu1 %vm4022_vm0, %v4021_v29  ;;  %v621_v62 = vadd.f32 %v620_v58, %v402_v35 }
 0x176   : > { %v624_v61 = vpop.f32.mrb[10].mxu1  ;;  %3374 = vmatprep.subr.bf16.mxu1 %v4021_v29  ;;  %v623_v1 = vadd.f32 %v622_v60, %v406_v37  ;;  %v4348_v38 = vpack.c.bf16 %v701_v36, %v698_v34 }
 0x177   : > { %v625_v63 = vadd.f32 %v624_v61, %v402_v35  ;;  %v626_v0 = vpop.f32.mrb[11].mxu1 }
 0x178   : > { %v627_v2 = vadd.f32 %v626_v0, %v406_v37 }
 0x179   : > { %v4312_v3 = vpack.c.bf16 %v625_v63, %v621_v62 }
 0x17a   : > { %v4314_v4 = vpack.c.bf16 %v627_v2, %v623_v1 }
 0x17c   : > { %v630_v5 = vpop.f32.mrb[12].mxu1  ;;  %3365 = vmatmul.mubr.msk.bf16.vlgmr.msra.gmra.mrb[20].mxu1 %vm740_vm1, %v4301_v56  ;;  %v839_v6 = vsel %vm740_vm1, %v4314_v4, 0 }
 0x17d   : > { %v631_v7 = vadd.f32 %v630_v5, %v402_v35  ;;  %v632_v8 = vpop.f32.mrb[13].mxu1  ;;  %3369 = vmatpush3.bf16.xpose.msra.mxu0 %v839_v6  ;;  %3376 = vmatprep.mubr.msk.bf16.mxu1 %vm4022_vm0, %v4021_v29 }
 0x17e   : > { %v633_v9 = vadd.f32 %v632_v8, %v406_v37  ;;  %v634_v10 = vpop.f32.mrb[14].mxu1  ;;  %3380 = vmatprep.subr.bf16.mxu0 %v4021_v29 }
 0x17f   : > { %v635_v11 = vadd.f32 %v634_v10, %v402_v35  ;;  %v636_v12 = vpop.f32.mrb[15].mxu1  ;;  %v690_v35 = vadd.f32 %v689_v31, %v410_v20 }
 0x180   : > { %v637_v13 = vadd.f32 %v636_v12, %v406_v37  ;;  %v693_v37 = vadd.f32 %v692_v33, %v410_v20 }
 0x181   : > { %v4323_v14 = vpack.c.bf16 %v635_v11, %v631_v7 }
 0x182   : > { %v4325_v15 = vpack.c.bf16 %v637_v13, %v633_v9  ;;  %v4350_v39 = vpack.c.bf16 %v693_v37, %v690_v35 }
 0x184   : > { %3371 = vmatmul.mubr.msk.bf16.vlgmr.msra.gmra.mrb[8].mxu0 %vm740_vm1, %v4312_v3  ;;  %v886_v16 = vsel %vm740_vm1, %v4325_v15, 0 }
 0x185   : > { %3375 = vmatpush3.bf16.xpose.msra.mxu1 %v886_v16  ;;  %3382 = vmatprep.mubr.msk.bf16.mxu0 %vm4022_vm0, %v4021_v29 }
 0x186   : > { %3386 = vmatprep.subr.bf16.mxu1 %v4021_v29  ;;  %3381 = vmatpush3.bf16.msra.mxu0 %v4342_v28 }
 0x187   : > { %3392 = vmatprep.subr.bf16.mxu0 %v4021_v29 }
 0x18c   : > { %3377 = vmatmul.mubr.msk.bf16.vlgmr.msra.gmra.mrb[24].mxu1 %vm740_vm1, %v4323_v14 }
 0x18d   : > { %3388 = vmatprep.mubr.msk.bf16.mxu1 %vm4022_vm0, %v4021_v29  ;;  %3387 = vmatpush3.bf16.msra.mxu1 %v4340_v27 }
 0x18e   : > { %3398 = vmatprep.subr.bf16.mxu1 %v4021_v29 }
 0x247   : > { %v781_v40 = vpop.f32.mrb[16].mxu1 }
 0x248   : > { %v3360_v41 = vpop.f32.mrb[17].mxu1  ;;  %v930_v42 = vsel %vm929_vm2, %v781_v40, -inf }
 0x249   : > { %931 = vmax.xlane.f32.xlu0 %v930_v42  ;;  %v784_v43 = vpop.f32.mrb[18].mxu1 }
 0x24a   : > { %v3361_v44 = vpop.f32.mrb[19].mxu1  ;;  %v933_v47 = vsel %vm929_vm2, %v784_v43, -inf }
 0x24d   : > { %934 = vmax.xlane.f32.xlu0 %v933_v47 }
 0x24f   : > { %v828_v48 = vpop.f32.mrb[20].mxu1 }
 0x250   : > { %v3366_v49 = vpop.f32.mrb[21].mxu1  ;;  %v936_v50 = vsel %vm929_vm2, %v828_v48, -inf }
 0x251   : > { %937 = vmax.xlane.f32.xlu1 %v936_v50  ;;  %v831_v51 = vpop.f32.mrb[22].mxu1 }
 0x252   : > { %v3367_v52 = vpop.f32.mrb[23].mxu1  ;;  %v939_v53 = vsel %vm929_vm2, %v831_v51, -inf }
 0x255   : > { %940 = vmax.xlane.f32.xlu1 %v939_v53 }
 0x257   : > { %v875_v54 = vpop.f32.mrb[8].mxu0 }
 0x258   : > { %v3372_v55 = vpop.f32.mrb[9].mxu0  ;;  %v942_v58 = vsel %vm929_vm2, %v875_v54, -inf }
 0x259   : > { %v878_v59 = vpop.f32.mrb[10].mxu0  ;;  %943 = vmax.xlane.f32.xlu0 %v942_v58 }
 0x25a   : > { %v3373_v60 = vpop.f32.mrb[11].mxu0  ;;  %v945_v61 = vsel %vm929_vm2, %v878_v59, -inf }
 0x25b   : > { %946 = vmax.xlane.f32.xlu1 %v945_v61 }
 0x25f   : > { %v922_v62 = vpop.f32.mrb[24].mxu1 }
 0x260   : > { %v3378_v63 = vpop.f32.mrb[25].mxu1  ;;  %v948_v0 = vsel %vm929_vm2, %v922_v62, -inf }
 0x261   : > { %949 = vmax.xlane.f32.xlu0 %v948_v0  ;;  %v925_v1 = vpop.f32.mrb[26].mxu1 }
 0x262   : > { %v951_v2 = vsel %vm929_vm2, %v925_v1, -inf  ;;  %v3379_v5 = vpop.f32.mrb[27].mxu1 }
 0x263   : > { %952 = vmax.xlane.f32.xlu1 %v951_v2 }
 0x2d6   : > { %v932_v6 = vpop.xlane.xlu0 %931 }
 0x2d7   : > { %v954_v7 = vsub.f32 %v781_v40, %v932_v6 }
 0x2d9   : > { %v962_v8 = vmul.f32 1.442695, %v954_v7 }
 0x2da   : > { %v935_v9 = vpop.xlane.xlu0 %934 }
 0x2db   : > { %3706 = vpow2.f32 %v962_v8  ;;  %v955_v10 = vsub.f32 %v784_v43, %v935_v9 }
 0x2dd   : > { %v964_v11 = vmul.f32 1.442695, %v955_v10 }
 0x2de   : > { %v938_v12 = vpop.xlane.xlu1 %937 }
 0x2df   : > { %3708 = vpow2.f32 %v964_v11  ;;  %v956_v13 = vsub.f32 %v828_v48, %v938_v12 }
 0x2e1   : > { %v966_v16 = vmul.f32 1.442695, %v956_v13 }
 0x2e2   : > { %v941_v17 = vpop.xlane.xlu1 %940 }
 0x2e3   : > { %3710 = vpow2.f32 %v966_v16  ;;  %v957_v18 = vsub.f32 %v831_v51, %v941_v17 }
 0x2e5   : > { %v3707_v19 = vpop.eup %3706  ;;  %v968_v20 = vmul.f32 1.442695, %v957_v18 }
 0x2e6   : > { %v944_v21 = vpop.xlane.xlu0 %943  ;;  %v978_v22 = vsel %vm929_vm2, %v3707_v19, 0.0 }
 0x2e7   : > { %3712 = vpow2.f32 %v968_v20  ;;  %v958_v23 = vsub.f32 %v875_v54, %v944_v21  ;;  %979 = vadd.xlane.f32.xlu0 %v978_v22 }
 0x2e8   : > { %v947_v24 = vpop.xlane.xlu1 %946 }
 0x2e9   : > { %v3709_v25 = vpop.eup %3708  ;;  %v970_v26 = vmul.f32 1.442695, %v958_v23  ;;  %v959_v30 = vsub.f32 %v878_v59, %v947_v24 }
 0x2ea   : > { %v981_v31 = vsel %vm929_vm2, %v3709_v25, 0.0 }
 0x2eb   : > { %3714 = vpow2.f32 %v970_v26  ;;  %v972_v32 = vmul.f32 1.442695, %v959_v30  ;;  %982 = vadd.xlane.f32.xlu1 %v981_v31 }
 0x2ed   : > { %v3711_v33 = vpop.eup %3710  ;;  %3716 = vpow2.f32 %v972_v32 }
 0x2ee   : > { %v950_v34 = vpop.xlane.xlu0 %949  ;;  %v984_v35 = vsel %vm929_vm2, %v3711_v33, 0.0 }
 0x2ef   : > { %v960_v36 = vsub.f32 %v922_v62, %v950_v34  ;;  %985 = vadd.xlane.f32.xlu0 %v984_v35 }
 0x2f0   : > { %v953_v50 = vpop.xlane.xlu1 %952 }
 0x2f1   : > { %v3713_v37 = vpop.eup %3712  ;;  %v974_v40 = vmul.f32 1.442695, %v960_v36  ;;  %v961_v51 = vsub.f32 %v925_v1, %v953_v50 }
 0x2f2   : > { %v987_v41 = vsel %vm929_vm2, %v3713_v37, 0.0 }
 0x2f3   : > { %3718 = vpow2.f32 %v974_v40  ;;  %988 = vadd.xlane.f32.xlu1 %v987_v41  ;;  %v976_v52 = vmul.f32 1.442695, %v961_v51 }
 0x2f5   : > { %v3715_v42 = vpop.eup %3714  ;;  %3720 = vpow2.f32 %v976_v52 }
 0x2f6   : > { %v990_v43 = vsel %vm929_vm2, %v3715_v42, 0.0 }
 0x2f7   : > { %v3717_v44 = vpop.eup %3716  ;;  %991 = vadd.xlane.f32.xlu0 %v990_v43 }
 0x2f8   : > { %v993_v47 = vsel %vm929_vm2, %v3717_v44, 0.0 }
 0x2f9   : > { %994 = vadd.xlane.f32.xlu1 %v993_v47 }
 0x2fd   : > { %v4366_v48 = vpop.eup %3718 }
 0x2fe   : > { %v996_v49 = vsel %vm929_vm2, %v4366_v48, 0.0 }
 0x2ff   : > { %997 = vadd.xlane.f32.xlu0 %v996_v49  ;;  %v4380_v53 = vpop.eup %3720 }
 0x300   : > { %v999_v54 = vsel %vm929_vm2, %v4380_v53, 0.0 }
 0x30a   : > { %1275 = vrot.lane.b32.xlu1 %v4303_v57, %s4023_s8 }
 0x30e   : > { %1219 = vrot.lane.b32.xlu1 %v4294_v45, %s4023_s8 }
 0x315   : > { %1222 = vrot.lane.b32.xlu0 %v4296_v46, %s4023_s8 }
 0x319   : > { %1272 = vrot.lane.b32.xlu0 %v4301_v56, %s4023_s8 }
 0x31d   : > { %1325 = vrot.lane.b32.xlu0 %v4312_v3, %s4023_s8 }
 0x332   : > { %1000 = vadd.xlane.f32.xlu1 %v999_v54 }
 0x343   : > { %1328 = vrot.lane.b32.xlu1 %v4314_v4, %s4023_s8 }
 0x347   : > { %1381 = vrot.lane.b32.xlu1 %v4325_v15, %s4023_s8 }
 0x34b   : > { %1378 = vrot.lane.b32.xlu1 %v4323_v14, %s4023_s8 }
 0x374   : > { %v980_v55 = vpop.xlane.xlu0 %979 }
 0x375   : > { %3722 = vrcp.f32 %v980_v55 }
 0x378   : > { %v983_v58 = vpop.xlane.xlu1 %982 }
 0x379   : > { %3724 = vrcp.f32 %v983_v58 }
 0x37c   : > { %v986_v59 = vpop.xlane.xlu0 %985 }
 0x37d   : > { %3726 = vrcp.f32 %v986_v59 }
 0x37f   : > { %v3723_v61 = vpop.eup %3722 }
 0x380   : > { %v989_v60 = vpop.xlane.xlu1 %988  ;;  %v1010_v63 = vmul.f32 %v3723_v61, %v3707_v19 }
 0x381   : > { %3728 = vrcp.f32 %v989_v60 }
 0x383   : > { %v3725_v62 = vpop.eup %3724 }
 0x384   : > { %v1011_v0 = vmul.f32 %v3725_v62, %v3709_v25  ;;  %v992_v1 = vpop.xlane.xlu0 %991 }
 0x385   : > { %3730 = vrcp.f32 %v992_v1 }
 0x386   : > { %v995_v2 = vpop.xlane.xlu1 %994  ;;  %v1018_v5 = vpack.c.bf16 %v1011_v0, %v1010_v63 }
 0x387   : > { %3732 = vrcp.f32 %v995_v2  ;;  %v3727_v6 = vpop.eup %3726 }
 0x388   : > { %3383 = vmatmul.mubr.msk.bf16.vlgmr.msra.gmra.mrb[12].mxu0 %vm929_vm2, %v1018_v5  ;;  %v1012_v8 = vmul.f32 %v3727_v6, %v3711_v33 }
 0x389   : > { %3393 = vmatpush3.bf16.msra.mxu0 %v4350_v39  ;;  %3394 = vmatprep.mubr.msk.bf16.mxu0 %vm4022_vm0, %v4021_v29 }
 0x38a   : > { %3404 = vmatprep.subr.bf16.mxu0 %v4021_v29  ;;  %v1276_v21 = vpop.permute.xlu1 %1275 }
 0x38b   : > { %v3729_v7 = vpop.eup %3728  ;;  %v1281_v36 = vsel %vm740_vm1, %v1276_v21, 0 }
 0x38c   : > { %v1013_v9 = vmul.f32 %v3729_v7, %v3713_v37  ;;  %v998_v10 = vpop.xlane.xlu0 %997 }
 0x38d   : > { %3734 = vrcp.f32 %v998_v10 }
 0x38e   : > { %v1019_v11 = vpack.c.bf16 %v1013_v9, %v1012_v8  ;;  %v1220_v22 = vpop.permute.xlu1 %1219 }
 0x38f   : > { %v3731_v12 = vpop.eup %3730 }
 0x390   : > { %3389 = vmatmul.mubr.msk.bf16.vlgmr.msra.gmra.mrb[28].mxu1 %vm929_vm2, %v1019_v11  ;;  %v1014_v16 = vmul.f32 %v3731_v12, %v3715_v42  ;;  %v1223_v18 = vpop.permute.xlu0 %1222 }
 0x391   : > { %v3733_v13 = vpop.eup %3732  ;;  %3399 = vmatpush3.bf16.msra.mxu1 %v4348_v38  ;;  %3400 = vmatprep.mubr.msk.bf16.mxu1 %vm4022_vm0, %v4021_v29  ;;  %v1228_v20 = vsel %vm740_vm1, %v1223_v18, 0 }
 0x392   : > { %v1015_v17 = vmul.f32 %v3733_v13, %v3717_v44  ;;  %3410 = vmatprep.subr.bf16.mxu1 %v4021_v29 }
 0x394   : > { %v1020_v19 = vpack.c.bf16 %v1015_v17, %v1014_v16  ;;  %v1273_v26 = vpop.permute.xlu0 %1272 }
 0x396   : > { %3395 = vmatmul.mubr.msk.bf16.vlgmr.msra.gmra.mrb[16].mxu0 %vm929_vm2, %v1020_v19 }
 0x397   : > { %3405 = vmatpush3.bf16.xpose.msra.mxu0 %v1228_v20  ;;  %3406 = vmatprep.mubr.msk.bf16.mxu0 %vm4022_vm0, %v4021_v29  ;;  %v3735_v30 = vpop.eup %3734 }
 0x398   : > { %3416 = vmatprep.subr.bf16.mxu0 %v4021_v29  ;;  %v1016_v32 = vmul.f32 %v3735_v30, %v4366_v48  ;;  %v1326_v33 = vpop.permute.xlu0 %1325 }
 0x39e   : > { %3407 = vmatmul.mubr.msk.bf16.vlgmr.msra.gmra.mrb[20].mxu0 %vm740_vm1, %v1220_v22 }
 0x39f   : > { %3418 = vmatprep.mubr.msk.bf16.mxu0 %vm4022_vm0, %v4021_v29 }
 0x3bf   : > { %v1001_v23 = vpop.xlane.xlu1 %1000 }
 0x3c0   : > { %3736 = vrcp.f32 %v1001_v23 }
 0x3c3   : > { %v1329_v24 = vpop.permute.xlu1 %1328 }
 0x3c4   : > { %v1334_v25 = vsel %vm740_vm1, %v1329_v24, 0 }
 0x3c5   : > { %3417 = vmatpush3.bf16.xpose.msra.mxu0 %v1334_v25 }
 0x3c6   : > { %3428 = vmatprep.subr.bf16.mxu0 %v4021_v29 }
 0x3c7   : > { %v1382_v37 = vpop.permute.xlu1 %1381 }
 0x3c8   : > { %v1387_v40 = vsel %vm740_vm1, %v1382_v37, 0 }
 0x3ca   : > { %v3737_v31 = vpop.eup %3736 }
 0x3cb   : > { %v1017_v34 = vmul.f32 %v3737_v31, %v4380_v53  ;;  %v1379_v41 = vpop.permute.xlu1 %1378 }
 0x3cc   : > { %3419 = vmatmul.mubr.msk.bf16.vlgmr.msra.gmra.mrb[24].mxu0 %vm740_vm1, %v1326_v33 }
 0x3cd   : > { %v1021_v35 = vpack.c.bf16 %v1017_v34, %v1016_v32  ;;  %3430 = vmatprep.mubr.msk.bf16.mxu0 %vm4022_vm0, %v4021_v29 }
 0x3cf   : > { %3401 = vmatmul.mubr.msk.bf16.vlgmr.msra.gmra.mrb[32].mxu1 %vm929_vm2, %v1021_v35 }
 0x3d0   : > { %3411 = vmatpush3.bf16.xpose.msra.mxu1 %v1281_v36  ;;  %3412 = vmatprep.mubr.msk.bf16.mxu1 %vm4022_vm0, %v4021_v29 }
 0x3d1   : > { %3422 = vmatprep.subr.bf16.mxu1 %v4021_v29 }
 0x3d7   : > { %3413 = vmatmul.mubr.msk.bf16.vlgmr.msra.gmra.mrb[36].mxu1 %vm740_vm1, %v1273_v26 }
 0x3d8   : > { %3423 = vmatpush3.bf16.xpose.msra.mxu1 %v1387_v40  ;;  %3424 = vmatprep.mubr.msk.bf16.mxu1 %vm4022_vm0, %v4021_v29 }
 0x3d9   : > { %3434 = vmatprep.subr.bf16.mxu1 %v4021_v29 }
 0x3df   : > { %3425 = vmatmul.mubr.msk.bf16.vlgmr.msra.gmra.mrb[40].mxu1 %vm740_vm1, %v1379_v41 }
 0x3e0   : > { %3436 = vmatprep.mubr.msk.bf16.mxu1 %vm4022_vm0, %v4021_v29 }
 0x45b   : > { %v1059_v42 = vpop.f32.mrb[12].mxu0 }
 0x45c   : > { %v3384_v43 = vpop.f32.mrb[13].mxu0 }
 0x45d   : > { %v1062_v44 = vpop.f32.mrb[14].mxu0 }
 0x45e   : > { %v1198_v47 = vpack.c.bf16 %v1062_v44, %v1059_v42  ;;  %v3385_v48 = vpop.f32.mrb[15].mxu0 }
 0x460   : > { %1202 = vst.msk [vmem:[#allocation5] sm:$0xff] %vm740_vm1, %v1198_v47 }
 0x463   : > { %v1103_v49 = vpop.f32.mrb[28].mxu1 }
 0x464   : > { %v3390_v50 = vpop.f32.mrb[29].mxu1 }
 0x465   : > { %v1106_v51 = vpop.f32.mrb[30].mxu1 }
 0x466   : > { %v1199_v52 = vpack.c.bf16 %v1106_v51, %v1103_v49  ;;  %v3391_v53 = vpop.f32.mrb[31].mxu1 }
 0x468   : > { %1203 = vst.msk [vmem:[#allocation5 + $0x8] sm:$0xff] %vm740_vm1, %v1199_v52 }
 0x469   : > { %v1147_v54 = vpop.f32.mrb[16].mxu0 }
 0x46a   : > { %v3396_v55 = vpop.f32.mrb[17].mxu0 }
 0x46b   : > { %v1150_v58 = vpop.f32.mrb[18].mxu0 }
 0x46c   : > { %v1200_v59 = vpack.c.bf16 %v1150_v58, %v1147_v54  ;;  %v3397_v60 = vpop.f32.mrb[19].mxu0 }
 0x46e   : > { %1204 = vst.msk [vmem:[#allocation5 + $0x10] sm:$0xff] %vm740_vm1, %v1200_v59 }
 0x471   : > { %v1264_v61 = vpop.f32.mrb[20].mxu0 }
 0x472   : > { %v3408_v62 = vpop.f32.mrb[21].mxu0  ;;  %v1430_v63 = vsel %vm929_vm2, %v1264_v61, -inf }
 0x473   : > { %1431 = vmax.xlane.f32.xlu0 %v1430_v63  ;;  %v1267_v0 = vpop.f32.mrb[22].mxu0 }
 0x474   : > { %v3409_v1 = vpop.f32.mrb[23].mxu0  ;;  %v1433_v2 = vsel %vm929_vm2, %v1267_v0, -inf }
 0x475   : > { %1434 = vmax.xlane.f32.xlu1 %v1433_v2 }
 0x49f   : > { %v4433_v5 = vpop.f32.mrb[24].mxu0 }
 0x4a0   : > { %v3420_v6 = vpop.f32.mrb[25].mxu0  ;;  %v1442_v25 = vsel %vm929_vm2, %v4433_v5, -inf }
 0x4a1   : > { %v1373_v7 = vpop.f32.mrb[26].mxu0 }
 0x4a2   : > { %v1191_v8 = vpop.f32.mrb[32].mxu1  ;;  %v3421_v9 = vpop.f32.mrb[27].mxu0  ;;  %v1445_v10 = vsel %vm929_vm2, %v1373_v7, -inf }
 0x4a3   : > { %1446 = vmax.xlane.f32.xlu1 %v1445_v10  ;;  %v3402_v11 = vpop.f32.mrb[33].mxu1 }
 0x4a4   : > { %v1194_v12 = vpop.f32.mrb[34].mxu1 }
 0x4a5   : > { %v1201_v13 = vpack.c.bf16 %v1194_v12, %v1191_v8  ;;  %v3403_v16 = vpop.f32.mrb[35].mxu1 }
 0x4a7   : > { %1205 = vst.msk [vmem:[#allocation5 + $0x18] sm:$0xff] %vm740_vm1, %v1201_v13 }
 0x4aa   : > { %v1317_v17 = vpop.f32.mrb[36].mxu1 }
 0x4ab   : > { %v3414_v18 = vpop.f32.mrb[37].mxu1  ;;  %v1436_v19 = vsel %vm929_vm2, %v1317_v17, -inf }
 0x4ac   : > { %1437 = vmax.xlane.f32.xlu0 %v1436_v19  ;;  %v1320_v20 = vpop.f32.mrb[38].mxu1 }
 0x4ad   : > { %v3415_v21 = vpop.f32.mrb[39].mxu1  ;;  %v1439_v22 = vsel %vm929_vm2, %v1320_v20, -inf }
 0x4b0   : > { %1440 = vmax.xlane.f32.xlu0 %v1439_v22 }
 0x4b2   : > { %v1423_v23 = vpop.f32.mrb[40].mxu1 }
 0x4b3   : > { %v3426_v24 = vpop.f32.mrb[41].mxu1  ;;  %v1448_v31 = vsel %vm929_vm2, %v1423_v23, -inf }
 0x4b4   : > { %1571 = vrot.lane.b32.xlu1 %v4340_v27, %s4023_s8  ;;  %1443 = vmax.xlane.f32.xlu0 %v1442_v25  ;;  %v4443_v26 = vpop.f32.mrb[42].mxu1 }
 0x4b5   : > { %v3427_v30 = vpop.f32.mrb[43].mxu1  ;;  %v1451_v32 = vsel %vm929_vm2, %v4443_v26, -inf }
 0x4b8   : > { %1619 = vrot.lane.b32.xlu1 %v4350_v39, %s4023_s8  ;;  %1449 = vmax.xlane.f32.xlu0 %v1448_v31 }
 0x4ce   : > { %1523 = vrot.lane.b32.xlu0 %v4342_v28, %s4023_s8 }
 0x4dc   : > { %1452 = vmax.xlane.f32.xlu1 %v1451_v32 }
 0x4ed   : > { %1667 = vrot.lane.b32.xlu1 %v4348_v38, %s4023_s8 }
 0x500   : > { %v1432_v33 = vpop.xlane.xlu0 %1431 }
 0x501   : > { %v1454_v34 = vsub.f32 %v1264_v61, %v1432_v33 }
 0x502   : > { %v1435_v35 = vpop.xlane.xlu1 %1434 }
 0x503   : > { %v1462_v36 = vmul.f32 1.442695, %v1454_v34  ;;  %v1455_v37 = vsub.f32 %v1267_v0, %v1435_v35 }
 0x505   : > { %3738 = vpow2.f32 %v1462_v36  ;;  %v1464_v40 = vmul.f32 1.442695, %v1455_v37 }
 0x507   : > { %3740 = vpow2.f32 %v1464_v40 }
 0x50f   : > { %v4454_v41 = vpop.eup %3738 }
 0x510   : > { %v1478_v42 = vsel %vm929_vm2, %v4454_v41, 0.0 }
 0x511   : > { %v4458_v43 = vpop.eup %3740  ;;  %1479 = vadd.xlane.f32.xlu0 %v1478_v42 }
 0x512   : > { %v1481_v44 = vsel %vm929_vm2, %v4458_v43, 0.0 }
 0x513   : > { %1482 = vadd.xlane.f32.xlu1 %v1481_v44 }
 0x530   : > { %v1447_v47 = vpop.xlane.xlu1 %1446 }
 0x531   : > { %v1459_v51 = vsub.f32 %v1373_v7, %v1447_v47 }
 0x533   : > { %v1472_v55 = vmul.f32 1.442695, %v1459_v51 }
 0x534   : > { %v1572_v48 = vpop.permute.xlu1 %1571 }
 0x535   : > { %3435 = vmatpush3.bf16.msra.mxu1 %v1572_v48 }
 0x536   : > { %3446 = vmatprep.subr.bf16.mxu1 %v4021_v29 }
 0x538   : > { %v1620_v16 = vpop.permute.xlu1 %1619 }
 0x539   : > { %v1438_v49 = vpop.xlane.xlu0 %1437 }
 0x53a   : > { %v1456_v50 = vsub.f32 %v1317_v17, %v1438_v49 }
 0x53c   : > { %v1466_v52 = vmul.f32 1.442695, %v1456_v50 }
 0x53d   : > { %v1441_v53 = vpop.xlane.xlu0 %1440 }
 0x53e   : > { %3742 = vpow2.f32 %v1466_v52  ;;  %v1457_v54 = vsub.f32 %v1320_v20, %v1441_v53 }
 0x540   : > { %v1468_v58 = vmul.f32 1.442695, %v1457_v54 }
 0x541   : > { %v1444_v59 = vpop.xlane.xlu0 %1443 }
 0x542   : > { %3744 = vpow2.f32 %v1468_v58  ;;  %v1458_v60 = vsub.f32 %v4433_v5, %v1444_v59 }
 0x543   : > { %3746 = vpow2.f32 %v1472_v55 }
 0x544   : > { %v1470_v61 = vmul.f32 1.442695, %v1458_v60 }
 0x545   : > { %v1450_v62 = vpop.xlane.xlu0 %1449 }
 0x546   : > { %3748 = vpow2.f32 %v1470_v61  ;;  %v1460_v63 = vsub.f32 %v1423_v23, %v1450_v62 }
 0x548   : > { %v3743_v0 = vpop.eup %3742  ;;  %v1474_v1 = vmul.f32 1.442695, %v1460_v63 }
 0x549   : > { %v1524_v2 = vpop.permute.xlu0 %1523  ;;  %v1484_v6 = vsel %vm929_vm2, %v3743_v0, 0.0 }
 0x54a   : > { %3750 = vpow2.f32 %v1474_v1  ;;  %1485 = vadd.xlane.f32.xlu0 %v1484_v6  ;;  %3429 = vmatpush3.bf16.msra.mxu0 %v1524_v2 }
 0x54b   : > { %3440 = vmatprep.subr.bf16.mxu0 %v4021_v29 }
 0x54c   : > { %v3745_v7 = vpop.eup %3744 }
 0x54d   : > { %v1487_v8 = vsel %vm929_vm2, %v3745_v7, 0.0  ;;  %v3747_v9 = vpop.eup %3746 }
 0x54e   : > { %1488 = vadd.xlane.f32.xlu1 %v1487_v8  ;;  %v1493_v11 = vsel %vm929_vm2, %v3747_v9, 0.0 }
 0x550   : > { %v3749_v5 = vpop.eup %3748 }
 0x551   : > { %v1490_v10 = vsel %vm929_vm2, %v3749_v5, 0.0 }
 0x552   : > { %1491 = vadd.xlane.f32.xlu0 %v1490_v10  ;;  %1494 = vadd.xlane.f32.xlu1 %v1493_v11 }
 0x554   : > { %v4469_v12 = vpop.eup %3750 }
 0x555   : > { %v1496_v13 = vsel %vm929_vm2, %v4469_v12, 0.0 }
 0x556   : > { %1497 = vadd.xlane.f32.xlu0 %v1496_v13 }
 0x563   : > { %1808 = vrot.lane.b32.xlu1 %v4303_v57, %s4024_s11 }
 0x569   : > { %v1453_v17 = vpop.xlane.xlu1 %1452 }
 0x56a   : > { %v1461_v18 = vsub.f32 %v4443_v26, %v1453_v17 }
 0x56c   : > { %1755 = vrot.lane.b32.xlu0 %v4296_v46, %s4024_s11  ;;  %v1476_v19 = vmul.f32 1.442695, %v1461_v18 }
 0x56d   : > { %v1668_v22 = vpop.permute.xlu1 %1667 }
 0x56e   : > { %3752 = vpow2.f32 %v1476_v19 }
 0x570   : > { %1752 = vrot.lane.b32.xlu0 %v4294_v45, %s4024_s11 }
 0x574   : > { %1805 = vrot.lane.b32.xlu0 %v4301_v56, %s4024_s11 }
 0x578   : > { %1858 = vrot.lane.b32.xlu0 %v4312_v3, %s4024_s11  ;;  %v4484_v20 = vpop.eup %3752 }
 0x579   : > { %v1499_v21 = vsel %vm929_vm2, %v4484_v20, 0.0 }
 0x587   : > { %1500 = vadd.xlane.f32.xlu1 %v1499_v21 }
 0x598   : > { %1861 = vrot.lane.b32.xlu1 %v4314_v4, %s4024_s11 }
 0x59c   : > { %1914 = vrot.lane.b32.xlu1 %v4325_v15, %s4024_s11 }
 0x59e   : > { %v1480_v23 = vpop.xlane.xlu0 %1479 }
 0x59f   : > { %3754 = vrcp.f32 %v1480_v23 }
 0x5a0   : > { %1911 = vrot.lane.b32.xlu1 %v4323_v14, %s4024_s11  ;;  %v1483_v24 = vpop.xlane.xlu1 %1482 }
 0x5a1   : > { %3756 = vrcp.f32 %v1483_v24 }
 0x5a9   : > { %v3755_v25 = vpop.eup %3754 }
 0x5aa   : > { %v1510_v30 = vmul.f32 %v3755_v25, %v4454_v41 }
 0x5ab   : > { %v3757_v26 = vpop.eup %3756 }
 0x5ac   : > { %v1511_v31 = vmul.f32 %v3757_v26, %v4458_v43 }
 0x5ae   : > { %v1518_v32 = vpack.c.bf16 %v1511_v31, %v1510_v30 }
 0x5b0   : > { %3431 = vmatmul.mubr.msk.bf16.vlgmr.msra.gmra.mrb[28].mxu0 %vm929_vm2, %v1518_v32 }
 0x5b1   : > { %3441 = vmatpush3.bf16.msra.mxu0 %v1620_v16  ;;  %3442 = vmatprep.mubr.msk.bf16.mxu0 %vm4022_vm0, %v4021_v29 }
 0x5b2   : > { %3452 = vmatprep.subr.bf16.mxu0 %v4021_v29 }
 0x5d7   : > { %v1486_v33 = vpop.xlane.xlu0 %1485 }
 0x5d8   : > { %3758 = vrcp.f32 %v1486_v33 }
 0x5db   : > { %v1489_v34 = vpop.xlane.xlu1 %1488 }
 0x5dc   : > { %3760 = vrcp.f32 %v1489_v34 }
 0x5df   : > { %v1492_v35 = vpop.xlane.xlu0 %1491  ;;  %v1495_v36 = vpop.xlane.xlu1 %1494 }
 0x5e0   : > { %3762 = vrcp.f32 %v1492_v35 }
 0x5e1   : > { %3764 = vrcp.f32 %v1495_v36 }
 0x5e2   : > { %v3759_v37 = vpop.eup %3758 }
 0x5e3   : > { %v1512_v41 = vmul.f32 %v3759_v37, %v3743_v0  ;;  %v1498_v43 = vpop.xlane.xlu0 %1497  ;;  %v1809_v55 = vpop.permute.xlu1 %1808 }
 0x5e4   : > { %3766 = vrcp.f32 %v1498_v43 }
 0x5e6   : > { %v3761_v40 = vpop.eup %3760 }
 0x5e7   : > { %v1513_v42 = vmul.f32 %v3761_v40, %v3745_v7  ;;  %v1756_v51 = vpop.permute.xlu0 %1755  ;;  %v1814_v7 = vsel %vm740_vm1, %v1809_v55, 0 }
 0x5e8   : > { %v1761_v53 = vsel %vm740_vm1, %v1756_v51, 0 }
 0x5e9   : > { %v1519_v44 = vpack.c.bf16 %v1513_v42, %v1512_v41 }
 0x5ea   : > { %v3763_v47 = vpop.eup %3762 }
 0x5eb   : > { %v3765_v48 = vpop.eup %3764  ;;  %v1514_v49 = vmul.f32 %v3763_v47, %v3749_v5  ;;  %3437 = vmatmul.mubr.msk.bf16.vlgmr.msra.gmra.mrb[44].mxu1 %vm929_vm2, %v1519_v44  ;;  %v1753_v54 = vpop.permute.xlu0 %1752 }
 0x5ec   : > { %v1515_v50 = vmul.f32 %v3765_v48, %v3747_v9  ;;  %3447 = vmatpush3.bf16.msra.mxu1 %v1668_v22  ;;  %3448 = vmatprep.mubr.msk.bf16.mxu1 %vm4022_vm0, %v4021_v29 }
 0x5ed   : > { %3458 = vmatprep.subr.bf16.mxu1 %v4021_v29 }
 0x5ee   : > { %v1520_v52 = vpack.c.bf16 %v1515_v50, %v1514_v49  ;;  %v3767_v62 = vpop.eup %3766 }
 0x5ef   : > { %v1806_v61 = vpop.permute.xlu0 %1805  ;;  %v1516_v0 = vmul.f32 %v3767_v62, %v4469_v12 }
 0x5f0   : > { %3443 = vmatmul.mubr.msk.bf16.vlgmr.msra.gmra.mrb[32].mxu0 %vm929_vm2, %v1520_v52 }
 0x5f1   : > { %3453 = vmatpush3.bf16.xpose.msra.mxu0 %v1761_v53  ;;  %3454 = vmatprep.mubr.msk.bf16.mxu0 %vm4022_vm0, %v4021_v29 }
 0x5f2   : > { %3464 = vmatprep.subr.bf16.mxu0 %v4021_v29 }
 0x5f3   : > { %v1859_v1 = vpop.permute.xlu0 %1858 }
 0x5f8   : > { %3455 = vmatmul.mubr.msk.bf16.vlgmr.msra.gmra.mrb[36].mxu0 %vm740_vm1, %v1753_v54 }
 0x5f9   : > { %3466 = vmatprep.mubr.msk.bf16.mxu0 %vm4022_vm0, %v4021_v29 }
 0x614   : > { %v1501_v58 = vpop.xlane.xlu1 %1500 }
 0x615   : > { %3768 = vrcp.f32 %v1501_v58 }
 0x618   : > { %v1862_v59 = vpop.permute.xlu1 %1861 }
 0x619   : > { %v1867_v60 = vsel %vm740_vm1, %v1862_v59, 0 }
 0x61a   : > { %3465 = vmatpush3.bf16.xpose.msra.mxu0 %v1867_v60 }
 0x61b   : > { %3476 = vmatprep.subr.bf16.mxu0 %v4021_v29 }
 0x61c   : > { %v1915_v8 = vpop.permute.xlu1 %1914 }
 0x61d   : > { %v1920_v9 = vsel %vm740_vm1, %v1915_v8, 0 }
 0x61f   : > { %v3769_v63 = vpop.eup %3768 }
 0x620   : > { %v1517_v2 = vmul.f32 %v3769_v63, %v4484_v20  ;;  %v1912_v5 = vpop.permute.xlu1 %1911 }
 0x621   : > { %3467 = vmatmul.mubr.msk.bf16.vlgmr.msra.gmra.mrb[40].mxu0 %vm740_vm1, %v1859_v1 }
 0x622   : > { %v1521_v6 = vpack.c.bf16 %v1517_v2, %v1516_v0  ;;  %3478 = vmatprep.mubr.msk.bf16.mxu0 %vm4022_vm0, %v4021_v29 }
 0x624   : > { %3449 = vmatmul.mubr.msk.bf16.vlgmr.msra.gmra.mrb[48].mxu1 %vm929_vm2, %v1521_v6 }
 0x625   : > { %3459 = vmatpush3.bf16.xpose.msra.mxu1 %v1814_v7  ;;  %3460 = vmatprep.mubr.msk.bf16.mxu1 %vm4022_vm0, %v4021_v29 }
 0x626   : > { %3470 = vmatprep.subr.bf16.mxu1 %v4021_v29 }
 0x62c   : > { %3461 = vmatmul.mubr.msk.bf16.vlgmr.msra.gmra.mrb[52].mxu1 %vm740_vm1, %v1806_v61 }
 0x62d   : > { %3471 = vmatpush3.bf16.xpose.msra.mxu1 %v1920_v9  ;;  %3472 = vmatprep.mubr.msk.bf16.mxu1 %vm4022_vm0, %v4021_v29 }
 0x62e   : > { %3482 = vmatprep.subr.bf16.mxu1 %v4021_v29 }
 0x634   : > { %3473 = vmatmul.mubr.msk.bf16.vlgmr.msra.gmra.mrb[56].mxu1 %vm740_vm1, %v1912_v5 }
 0x635   : > { %3484 = vmatprep.mubr.msk.bf16.mxu1 %vm4022_vm0, %v4021_v29 }
 0x683   : > { %v4532_v10 = vpop.f32.mrb[28].mxu0 }
 0x684   : > { %v3432_v11 = vpop.f32.mrb[29].mxu0 }
 0x685   : > { %v4534_v12 = vpop.f32.mrb[30].mxu0 }
 0x686   : > { %v1714_v13 = vpack.c.bf16 %v4534_v12, %v4532_v10  ;;  %v3433_v16 = vpop.f32.mrb[31].mxu0 }
 0x6be   : > { %v4538_v17 = vpop.f32.mrb[44].mxu1 }
 0x6bf   : > { %v3438_v18 = vpop.f32.mrb[45].mxu1 }
 0x6c0   : > { %v4540_v19 = vpop.f32.mrb[46].mxu1 }
 0x6c1   : > { %v1715_v20 = vpack.c.bf16 %v4540_v19, %v4538_v17  ;;  %v3439_v21 = vpop.f32.mrb[47].mxu1 }
 0x6c3   : > { %v4544_v22 = vpop.f32.mrb[32].mxu0 }
 0x6c4   : > { %v3444_v23 = vpop.f32.mrb[33].mxu0 }
 0x6c5   : > { %v4546_v24 = vpop.f32.mrb[34].mxu0 }
 0x6c6   : > { %v1716_v25 = vpack.c.bf16 %v4546_v24, %v4544_v22  ;;  %v3445_v26 = vpop.f32.mrb[35].mxu0 }
 0x6cb   : > { %v1797_v30 = vpop.f32.mrb[36].mxu0 }
 0x6cc   : > { %v3456_v31 = vpop.f32.mrb[37].mxu0  ;;  %v1963_v32 = vsel %vm929_vm2, %v1797_v30, -inf }
 0x6cd   : > { %1964 = vmax.xlane.f32.xlu0 %v1963_v32  ;;  %v1800_v33 = vpop.f32.mrb[38].mxu0 }
 0x6ce   : > { %v3457_v34 = vpop.f32.mrb[39].mxu0  ;;  %v1966_v35 = vsel %vm929_vm2, %v1800_v33, -inf }
 0x6cf   : > { %1967 = vmax.xlane.f32.xlu1 %v1966_v35 }
 0x6f4   : > { %v4552_v36 = vpop.f32.mrb[40].mxu0 }
 0x6f5   : > { %v3468_v37 = vpop.f32.mrb[41].mxu0  ;;  %v1975_v60 = vsel %vm929_vm2, %v4552_v36, -inf }
 0x6f6   : > { %v1906_v40 = vpop.f32.mrb[42].mxu0 }
 0x6f7   : > { %v4554_v41 = vpop.f32.mrb[48].mxu1  ;;  %v3469_v42 = vpop.f32.mrb[43].mxu0  ;;  %v1978_v43 = vsel %vm929_vm2, %v1906_v40, -inf }
 0x6f8   : > { %1979 = vmax.xlane.f32.xlu1 %v1978_v43  ;;  %v3450_v44 = vpop.f32.mrb[49].mxu1 }
 0x6f9   : > { %v4557_v47 = vpop.f32.mrb[50].mxu1 }
 0x6fa   : > { %v1717_v48 = vpack.c.bf16 %v4557_v47, %v4554_v41  ;;  %v3451_v49 = vpop.f32.mrb[51].mxu1 }
 0x6ff   : > { %v1850_v50 = vpop.f32.mrb[52].mxu1 }
 0x700   : > { %v3462_v51 = vpop.f32.mrb[53].mxu1  ;;  %v1969_v52 = vsel %vm929_vm2, %v1850_v50, -inf }
 0x701   : > { %1970 = vmax.xlane.f32.xlu0 %v1969_v52  ;;  %v1853_v53 = vpop.f32.mrb[54].mxu1 }
 0x702   : > { %v3463_v54 = vpop.f32.mrb[55].mxu1  ;;  %v1972_v55 = vsel %vm929_vm2, %v1853_v53, -inf }
 0x705   : > { %1973 = vmax.xlane.f32.xlu0 %v1972_v55 }
 0x707   : > { %v1956_v58 = vpop.f32.mrb[56].mxu1 }
 0x708   : > { %v3474_v59 = vpop.f32.mrb[57].mxu1  ;;  %v1981_v63 = vsel %vm929_vm2, %v1956_v58, -inf }
 0x709   : > { %2104 = vrot.lane.b32.xlu1 %v4340_v27, %s4024_s11  ;;  %1976 = vmax.xlane.f32.xlu0 %v1975_v60  ;;  %v4567_v61 = vpop.f32.mrb[58].mxu1 }
 0x70a   : > { %v3475_v62 = vpop.f32.mrb[59].mxu1  ;;  %v1984_v0 = vsel %vm929_vm2, %v4567_v61, -inf }
 0x70d   : > { %2152 = vrot.lane.b32.xlu1 %v4350_v39, %s4024_s11  ;;  %1982 = vmax.xlane.f32.xlu0 %v1981_v63 }
 0x723   : > { %2056 = vrot.lane.b32.xlu0 %v4342_v28, %s4024_s11 }
 0x731   : > { %1985 = vmax.xlane.f32.xlu1 %v1984_v0 }
 0x742   : > { %2200 = vrot.lane.b32.xlu1 %v4348_v38, %s4024_s11 }
 0x75a   : > { %v1965_v1 = vpop.xlane.xlu0 %1964 }
 0x75b   : > { %v1987_v2 = vsub.f32 %v1797_v30, %v1965_v1 }
 0x75c   : > { %v1968_v6 = vpop.xlane.xlu1 %1967 }
 0x75d   : > { %v1995_v7 = vmul.f32 1.442695, %v1987_v2  ;;  %v1988_v8 = vsub.f32 %v1800_v33, %v1968_v6 }
 0x75f   : > { %3770 = vpow2.f32 %v1995_v7  ;;  %v1997_v9 = vmul.f32 1.442695, %v1988_v8 }
 0x761   : > { %3772 = vpow2.f32 %v1997_v9 }
 0x769   : > { %v4578_v5 = vpop.eup %3770 }
 0x76a   : > { %v2011_v11 = vsel %vm929_vm2, %v4578_v5, 0.0 }
 0x76b   : > { %v4582_v16 = vpop.eup %3772  ;;  %2012 = vadd.xlane.f32.xlu0 %v2011_v11 }
 0x76c   : > { %v2014_v18 = vsel %vm929_vm2, %v4582_v16, 0.0 }
 0x76d   : > { %2015 = vadd.xlane.f32.xlu1 %v2014_v18 }
 0x785   : > { %v1980_v21 = vpop.xlane.xlu1 %1979 }
 0x786   : > { %v1992_v31 = vsub.f32 %v1906_v40, %v1980_v21 }
 0x788   : > { %v2005_v35 = vmul.f32 1.442695, %v1992_v31 }
 0x789   : > { %v2105_v23 = vpop.permute.xlu1 %2104 }
 0x78a   : > { %3483 = vmatpush3.bf16.msra.mxu1 %v2105_v23 }
 0x78b   : > { %3494 = vmatprep.subr.bf16.mxu1 %v4021_v29 }
 0x78d   : > { %v2153_v0 = vpop.permute.xlu1 %2152 }
 0x78e   : > { %v1971_v26 = vpop.xlane.xlu0 %1970 }
 0x78f   : > { %v1989_v30 = vsub.f32 %v1850_v50, %v1971_v26 }
 0x791   : > { %v1999_v32 = vmul.f32 1.442695, %v1989_v30 }
 0x792   : > { %v1974_v33 = vpop.xlane.xlu0 %1973 }
 0x793   : > { %3774 = vpow2.f32 %v1999_v32  ;;  %v1990_v34 = vsub.f32 %v1853_v53, %v1974_v33 }
 0x795   : > { %v2001_v37 = vmul.f32 1.442695, %v1990_v34 }
 0x796   : > { %v1977_v42 = vpop.xlane.xlu0 %1976 }
 0x797   : > { %3776 = vpow2.f32 %v2001_v37  ;;  %v1991_v43 = vsub.f32 %v4552_v36, %v1977_v42 }
 0x798   : > { %3778 = vpow2.f32 %v2005_v35 }
 0x799   : > { %v2003_v44 = vmul.f32 1.442695, %v1991_v43 }
 0x79a   : > { %v1983_v49 = vpop.xlane.xlu0 %1982 }
 0x79b   : > { %3780 = vpow2.f32 %v2003_v44  ;;  %v1993_v51 = vsub.f32 %v1956_v58, %v1983_v49 }
 0x79d   : > { %v3775_v52 = vpop.eup %3774  ;;  %v2007_v54 = vmul.f32 1.442695, %v1993_v51 }
 0x79e   : > { %v2057_v55 = vpop.permute.xlu0 %2056  ;;  %v2017_v40 = vsel %vm929_vm2, %v3775_v52, 0.0 }
 0x79f   : > { %3782 = vpow2.f32 %v2007_v54  ;;  %2018 = vadd.xlane.f32.xlu0 %v2017_v40  ;;  %3477 = vmatpush3.bf16.msra.mxu0 %v2057_v55 }
 0x7a0   : > { %3488 = vmatprep.subr.bf16.mxu0 %v4021_v29 }
 0x7a1   : > { %v3777_v50 = vpop.eup %3776 }
 0x7a2   : > { %v2020_v53 = vsel %vm929_vm2, %v3777_v50, 0.0  ;;  %v3779_v59 = vpop.eup %3778 }
 0x7a3   : > { %2021 = vadd.xlane.f32.xlu1 %v2020_v53  ;;  %v2026_v58 = vsel %vm929_vm2, %v3779_v59, 0.0 }
 0x7a5   : > { %v3781_v36 = vpop.eup %3780 }
 0x7a6   : > { %v2023_v60 = vsel %vm929_vm2, %v3781_v36, 0.0 }
 0x7a7   : > { %2024 = vadd.xlane.f32.xlu0 %v2023_v60  ;;  %2027 = vadd.xlane.f32.xlu1 %v2026_v58 }
 0x7a9   : > { %v4593_v62 = vpop.eup %3782 }
 0x7aa   : > { %v2029_v63 = vsel %vm929_vm2, %v4593_v62, 0.0 }
 0x7ab   : > { %2030 = vadd.xlane.f32.xlu0 %v2029_v63 }
 0x7b8   : > { %2341 = vrot.lane.b32.xlu1 %v4303_v57, %s4025_s15 }
 0x7be   : > { %v1986_v1 = vpop.xlane.xlu1 %1985 }
 0x7bf   : > { %v1994_v2 = vsub.f32 %v4567_v61, %v1986_v1 }
 0x7c1   : > { %2288 = vrot.lane.b32.xlu0 %v4296_v46, %s4025_s15  ;;  %v2009_v6 = vmul.f32 1.442695, %v1994_v2 }
 0x7c3   : > { %3784 = vpow2.f32 %v2009_v6 }
 0x7c5   : > { %2285 = vrot.lane.b32.xlu0 %v4294_v45, %s4025_s15  ;;  %v2201_v45 = vpop.permute.xlu1 %2200 }
 0x7c9   : > { %2338 = vrot.lane.b32.xlu0 %v4301_v56, %s4025_s15 }
 0x7cd   : > { %2391 = vrot.lane.b32.xlu0 %v4312_v3, %s4025_s15  ;;  %v4608_v7 = vpop.eup %3784 }
 0x7ce   : > { %v2032_v57 = vsel %vm929_vm2, %v4608_v7, 0.0 }
 0x7dc   : > { %2033 = vadd.xlane.f32.xlu1 %v2032_v57 }
 0x7ed   : > { %2394 = vrot.lane.b32.xlu1 %v4314_v4, %s4025_s15 }
 0x7f1   : > { %2447 = vrot.lane.b32.xlu1 %v4325_v15, %s4025_s15 }
 0x7f5   : > { %2444 = vrot.lane.b32.xlu1 %v4323_v14, %s4025_s15 }
 0x7f8   : > { %v2013_v46 = vpop.xlane.xlu0 %2012 }
 0x7f9   : > { %3786 = vrcp.f32 %v2013_v46 }
 0x7fa   : > { %v2016_v56 = vpop.xlane.xlu1 %2015 }
 0x7fb   : > { %3788 = vrcp.f32 %v2016_v56 }
 0x803   : > { %v3787_v3 = vpop.eup %3786 }
 0x804   : > { %v2043_v8 = vmul.f32 %v3787_v3, %v4578_v5 }
 0x805   : > { %v3789_v61 = vpop.eup %3788 }
 0x806   : > { %v2044_v9 = vmul.f32 %v3789_v61, %v4582_v16 }
 0x808   : > { %v2051_v11 = vpack.c.bf16 %v2044_v9, %v2043_v8 }
 0x80a   : > { %3479 = vmatmul.mubr.msk.bf16.vlgmr.msra.gmra.mrb[44].mxu0 %vm929_vm2, %v2051_v11 }
 0x80b   : > { %3489 = vmatpush3.bf16.msra.mxu0 %v2153_v0  ;;  %3490 = vmatprep.mubr.msk.bf16.mxu0 %vm4022_vm0, %v4021_v29 }
 0x80c   : > { %3500 = vmatprep.subr.bf16.mxu0 %v4021_v29 }
 0x82c   : > { %v2019_v4 = vpop.xlane.xlu0 %2018 }
 0x82d   : > { %3790 = vrcp.f32 %v2019_v4 }
 0x830   : > { %v2022_v14 = vpop.xlane.xlu1 %2021 }
 0x831   : > { %3792 = vrcp.f32 %v2022_v14 }
 0x834   : > { %v2025_v15 = vpop.xlane.xlu0 %2024  ;;  %v2028_v18 = vpop.xlane.xlu1 %2027 }
 0x835   : > { %3794 = vrcp.f32 %v2025_v15 }
 0x836   : > { %3796 = vrcp.f32 %v2028_v18 }
 0x837   : > { %v3791_v5 = vpop.eup %3790 }
 0x838   : > { %v2045_v16 = vmul.f32 %v3791_v5, %v3775_v52  ;;  %v2031_v26 = vpop.xlane.xlu0 %2030  ;;  %v2342_v44 = vpop.permute.xlu1 %2341 }
 0x839   : > { %3798 = vrcp.f32 %v2031_v26  ;;  %v2347_v60 = vsel %vm740_vm1, %v2342_v44, 0 }
 0x83b   : > { %v3793_v21 = vpop.eup %3792 }
 0x83c   : > { %v2046_v23 = vmul.f32 %v3793_v21, %v3777_v50  ;;  %v2289_v35 = vpop.permute.xlu0 %2288 }
 0x83d   : > { %v2294_v42 = vsel %vm740_vm1, %v2289_v35, 0 }
 0x83e   : > { %v2052_v30 = vpack.c.bf16 %v2046_v23, %v2045_v16 }
 0x83f   : > { %v3795_v31 = vpop.eup %3794 }
 0x840   : > { %v3797_v32 = vpop.eup %3796  ;;  %v2047_v33 = vmul.f32 %v3795_v31, %v3781_v36  ;;  %3485 = vmatmul.mubr.msk.bf16.vlgmr.msra.gmra.mrb[60].mxu1 %vm929_vm2, %v2052_v30  ;;  %v2286_v43 = vpop.permute.xlu0 %2285 }
 0x841   : > { %v2048_v34 = vmul.f32 %v3797_v32, %v3779_v59  ;;  %3495 = vmatpush3.bf16.msra.mxu1 %v2201_v45  ;;  %3496 = vmatprep.mubr.msk.bf16.mxu1 %vm4022_vm0, %v4021_v29 }
 0x842   : > { %3506 = vmatprep.subr.bf16.mxu1 %v4021_v29 }
 0x843   : > { %v2053_v37 = vpack.c.bf16 %v2048_v34, %v2047_v33  ;;  %v3799_v55 = vpop.eup %3798 }
 0x844   : > { %v2339_v54 = vpop.permute.xlu0 %2338  ;;  %v2049_v50 = vmul.f32 %v3799_v55, %v4593_v62 }
 0x845   : > { %3491 = vmatmul.mubr.msk.bf16.vlgmr.msra.gmra.mrb[48].mxu0 %vm929_vm2, %v2053_v37 }
 0x846   : > { %3501 = vmatpush3.bf16.xpose.msra.mxu0 %v2294_v42  ;;  %3502 = vmatprep.mubr.msk.bf16.mxu0 %vm4022_vm0, %v4021_v29 }
 0x847   : > { %3512 = vmatprep.subr.bf16.mxu0 %v4021_v29 }
 0x848   : > { %v2392_v53 = vpop.permute.xlu0 %2391 }
 0x84d   : > { %3503 = vmatmul.mubr.msk.bf16.vlgmr.msra.gmra.mrb[52].mxu0 %vm740_vm1, %v2286_v43 }
 0x84e   : > { %3514 = vmatprep.mubr.msk.bf16.mxu0 %vm4022_vm0, %v4021_v29 }
 0x869   : > { %v2034_v49 = vpop.xlane.xlu1 %2033 }
 0x86a   : > { %3800 = vrcp.f32 %v2034_v49 }
 0x86d   : > { %v2395_v51 = vpop.permute.xlu1 %2394 }
 0x86e   : > { %v2400_v52 = vsel %vm740_vm1, %v2395_v51, 0 }
 0x86f   : > { %3513 = vmatpush3.bf16.xpose.msra.mxu0 %v2400_v52 }
 0x870   : > { %3524 = vmatprep.subr.bf16.mxu0 %v4021_v29 }
 0x871   : > { %v2448_v58 = vpop.permute.xlu1 %2447 }
 0x872   : > { %v2453_v62 = vsel %vm740_vm1, %v2448_v58, 0 }
 0x874   : > { %v3801_v40 = vpop.eup %3800 }
 0x875   : > { %v2050_v59 = vmul.f32 %v3801_v40, %v4608_v7  ;;  %v2445_v63 = vpop.permute.xlu1 %2444 }
 0x876   : > { %3515 = vmatmul.mubr.msk.bf16.vlgmr.msra.gmra.mrb[56].mxu0 %vm740_vm1, %v2392_v53 }
 0x877   : > { %v2054_v36 = vpack.c.bf16 %v2050_v59, %v2049_v50  ;;  %3526 = vmatprep.mubr.msk.bf16.mxu0 %vm4022_vm0, %v4021_v29 }
 0x879   : > { %3497 = vmatmul.mubr.msk.bf16.vlgmr.msra.gmra.mrb[64].mxu1 %vm929_vm2, %v2054_v36 }
 0x87a   : > { %3507 = vmatpush3.bf16.xpose.msra.mxu1 %v2347_v60  ;;  %3508 = vmatprep.mubr.msk.bf16.mxu1 %vm4022_vm0, %v4021_v29 }
 0x87b   : > { %3518 = vmatprep.subr.bf16.mxu1 %v4021_v29 }
 0x881   : > { %3509 = vmatmul.mubr.msk.bf16.vlgmr.msra.gmra.mrb[68].mxu1 %vm740_vm1, %v2339_v54 }
 0x882   : > { %3519 = vmatpush3.bf16.xpose.msra.mxu1 %v2453_v62  ;;  %3520 = vmatprep.mubr.msk.bf16.mxu1 %vm4022_vm0, %v4021_v29 }
 0x883   : > { %3530 = vmatprep.subr.bf16.mxu1 %v4021_v29 }
 0x889   : > { %3521 = vmatmul.mubr.msk.bf16.vlgmr.msra.gmra.mrb[72].mxu1 %vm740_vm1, %v2445_v63 }
 0x88a   : > { %3532 = vmatprep.mubr.msk.bf16.mxu1 %vm4022_vm0, %v4021_v29 }
 0x8dd   : > { %v4656_v0 = vpop.f32.mrb[44].mxu0 }
 0x8de   : > { %v3480_v1 = vpop.f32.mrb[45].mxu0 }
 0x8df   : > { %v4658_v2 = vpop.f32.mrb[46].mxu0 }
 0x8e0   : > { %v2247_v6 = vpack.c.bf16 %v4658_v2, %v4656_v0  ;;  %v3481_v7 = vpop.f32.mrb[47].mxu0 }
 0x913   : > { %v4662_v57 = vpop.f32.mrb[60].mxu1 }
 0x914   : > { %v3486_v45 = vpop.f32.mrb[61].mxu1 }
 0x915   : > { %v4664_v46 = vpop.f32.mrb[62].mxu1 }
 0x916   : > { %v2248_v56 = vpack.c.bf16 %v4664_v46, %v4662_v57  ;;  %v3487_v3 = vpop.f32.mrb[63].mxu1 }
 0x918   : > { %v4668_v61 = vpop.f32.mrb[48].mxu0 }
 0x919   : > { %v3492_v8 = vpop.f32.mrb[49].mxu0 }
 0x91a   : > { %v4670_v9 = vpop.f32.mrb[50].mxu0 }
 0x91b   : > { %v2249_v11 = vpack.c.bf16 %v4670_v9, %v4668_v61  ;;  %v3493_v4 = vpop.f32.mrb[51].mxu0 }
 0x920   : > { %v2330_v14 = vpop.f32.mrb[52].mxu0 }
 0x921   : > { %v3504_v15 = vpop.f32.mrb[53].mxu0  ;;  %v2496_v18 = vsel %vm929_vm2, %v2330_v14, -inf }
 0x922   : > { %2497 = vmax.xlane.f32.xlu0 %v2496_v18  ;;  %v2333_v5 = vpop.f32.mrb[54].mxu0 }
 0x923   : > { %v3505_v21 = vpop.f32.mrb[55].mxu0  ;;  %v2499_v16 = vsel %vm929_vm2, %v2333_v5, -inf }
 0x924   : > { %2500 = vmax.xlane.f32.xlu1 %v2499_v16 }
 0x949   : > { %v2436_v23 = vpop.f32.mrb[56].mxu0 }
 0x94a   : > { %v3516_v26 = vpop.f32.mrb[57].mxu0  ;;  %v2508_v50 = vsel %vm929_vm2, %v2436_v23, -inf }
 0x94b   : > { %v2439_v30 = vpop.f32.mrb[58].mxu0 }
 0x94c   : > { %v4676_v31 = vpop.f32.mrb[64].mxu1  ;;  %v3517_v32 = vpop.f32.mrb[59].mxu0  ;;  %v2511_v33 = vsel %vm929_vm2, %v2439_v30, -inf }
 0x94d   : > { %2512 = vmax.xlane.f32.xlu1 %v2511_v33  ;;  %v3498_v34 = vpop.f32.mrb[65].mxu1 }
 0x94e   : > { %v4679_v35 = vpop.f32.mrb[66].mxu1 }
 0x94f   : > { %v2250_v37 = vpack.c.bf16 %v4679_v35, %v4676_v31  ;;  %v3499_v42 = vpop.f32.mrb[67].mxu1 }
 0x954   : > { %v2383_v43 = vpop.f32.mrb[68].mxu1 }
 0x955   : > { %v3510_v44 = vpop.f32.mrb[69].mxu1  ;;  %v2502_v49 = vsel %vm929_vm2, %v2383_v43, -inf }
 0x956   : > { %2503 = vmax.xlane.f32.xlu0 %v2502_v49  ;;  %v2386_v51 = vpop.f32.mrb[70].mxu1 }
 0x957   : > { %v3511_v52 = vpop.f32.mrb[71].mxu1  ;;  %v2505_v54 = vsel %vm929_vm2, %v2386_v51, -inf }
 0x95a   : > { %2506 = vmax.xlane.f32.xlu0 %v2505_v54 }
 0x95c   : > { %v2489_v55 = vpop.f32.mrb[72].mxu1 }
 0x95d   : > { %v3522_v40 = vpop.f32.mrb[73].mxu1  ;;  %v2514_v60 = vsel %vm929_vm2, %v2489_v55, -inf }
 0x95e   : > { %2509 = vmax.xlane.f32.xlu0 %v2508_v50  ;;  %v4686_v53 = vpop.f32.mrb[74].mxu1 }
 0x95f   : > { %v3523_v59 = vpop.f32.mrb[75].mxu1  ;;  %v2517_v36 = vsel %vm929_vm2, %v4686_v53, -inf }
 0x960   : > { %2518 = vmax.xlane.f32.xlu1 %v2517_v36 }
 0x962   : > { %2515 = vmax.xlane.f32.xlu0 %v2514_v60 }
 0x9af   : > { %v2498_v58 = vpop.xlane.xlu0 %2497 }
 0x9b0   : > { %v2520_v62 = vsub.f32 %v2330_v14, %v2498_v58 }
 0x9b1   : > { %v2501_v63 = vpop.xlane.xlu1 %2500 }
 0x9b2   : > { %v2528_v1 = vmul.f32 1.442695, %v2520_v62  ;;  %v2521_v7 = vsub.f32 %v2333_v5, %v2501_v63 }
 0x9b4   : > { %3802 = vpow2.f32 %v2528_v1  ;;  %v2530_v45 = vmul.f32 1.442695, %v2521_v7 }
 0x9b6   : > { %3804 = vpow2.f32 %v2530_v45 }
 0x9be   : > { %v4691_v3 = vpop.eup %3802 }
 0x9bf   : > { %v2544_v8 = vsel %vm929_vm2, %v4691_v3, 0.0 }
 0x9c0   : > { %v4695_v4 = vpop.eup %3804  ;;  %2545 = vadd.xlane.f32.xlu0 %v2544_v8 }
 0x9c1   : > { %v2547_v15 = vsel %vm929_vm2, %v4695_v4, 0.0 }
 0x9c2   : > { %2548 = vadd.xlane.f32.xlu1 %v2547_v15 }
 0x9da   : > { %v2513_v18 = vpop.xlane.xlu1 %2512 }
 0x9db   : > { %v2525_v16 = vsub.f32 %v2439_v30, %v2513_v18 }
 0x9dd   : > { %v2538_v33 = vmul.f32 1.442695, %v2525_v16 }
 0x9e3   : > { %v2504_v14 = vpop.xlane.xlu0 %2503 }
 0x9e4   : > { %v2522_v21 = vsub.f32 %v2383_v43, %v2504_v14 }
 0x9e6   : > { %v2532_v5 = vmul.f32 1.442695, %v2522_v21 }
 0x9e7   : > { %v2507_v26 = vpop.xlane.xlu0 %2506 }
 0x9e8   : > { %3806 = vpow2.f32 %v2532_v5  ;;  %v2523_v32 = vsub.f32 %v2386_v51, %v2507_v26 }
 0x9ea   : > { %v2534_v34 = vmul.f32 1.442695, %v2523_v32 }
 0x9eb   : > { %v2510_v42 = vpop.xlane.xlu0 %2509 }
 0x9ec   : > { %3808 = vpow2.f32 %v2534_v34  ;;  %v2524_v44 = vsub.f32 %v2436_v23, %v2510_v42 }
 0x9ed   : > { %3810 = vpow2.f32 %v2538_v33  ;;  %v2519_v62 = vpop.xlane.xlu1 %2518 }
 0x9ee   : > { %v2536_v49 = vmul.f32 1.442695, %v2524_v44  ;;  %v2527_v63 = vsub.f32 %v4686_v53, %v2519_v62  ;;  %v3698_v44 = vld [vmem:[#allocation11] sm:$0xff]  }
 0x9ef   : > { %v2516_v52 = vpop.xlane.xlu0 %2515 }
 0x9f0   : > { %3812 = vpow2.f32 %v2536_v49  ;;  %v2526_v54 = vsub.f32 %v2489_v55, %v2516_v52  ;;  %v3699_v49 = vld [vmem:[#allocation11 + $0x8] sm:$0xff]   ;;  %v3700_v52 = vld [vmem:[#allocation11 + $0x10] sm:$0xff]  }
 0x9f2   : > { %v3807_v40 = vpop.eup %3806  ;;  %v2540_v50 = vmul.f32 1.442695, %v2526_v54  ;;  %v3701_v54 = vld [vmem:[#allocation11 + $0x18] sm:$0xff]  }
 0x9f3   : > { %v2550_v59 = vsel %vm929_vm2, %v3807_v40, 0.0 }
 0x9f4   : > { %3814 = vpow2.f32 %v2540_v50  ;;  %2551 = vadd.xlane.f32.xlu0 %v2550_v59  ;;  %v3703_v50 = vld [vmem:[#allocation11 + $0x28] sm:$0xff]   ;;  %v3704_v59 = vld [vmem:[#allocation11 + $0x30] sm:$0xff]  }
 0x9f6   : > { %v3809_v30 = vpop.eup %3808 }
 0x9f7   : > { %v2553_v43 = vsel %vm929_vm2, %v3809_v30, 0.0  ;;  %v4701_v51 = vpop.eup %3810 }
 0x9f8   : > { %2554 = vadd.xlane.f32.xlu1 %v2553_v43  ;;  %v2559_v55 = vsel %vm929_vm2, %v4701_v51, 0.0 }
 0x9fa   : > { %v4703_v36 = vpop.eup %3812 }
 0x9fb   : > { %v2556_v23 = vsel %vm929_vm2, %v4703_v36, 0.0 }
 0x9fc   : > { %2557 = vadd.xlane.f32.xlu0 %v2556_v23  ;;  %2560 = vadd.xlane.f32.xlu1 %v2559_v55 }
 0x9fe   : > { %v4709_v60 = vpop.eup %3814 }
 0x9ff   : > { %v2562_v58 = vsel %vm929_vm2, %v4709_v60, 0.0 }
 0xa00   : > { %2563 = vadd.xlane.f32.xlu0 %v2562_v58 }
 0xa0d   : > { %2637 = vrot.lane.b32.xlu1 %v4340_v27, %s4025_s15  ;;  %v2542_v27 = vmul.f32 1.442695, %v2527_v63 }
 0xa0f   : > { %3816 = vpow2.f32 %v2542_v27 }
 0xa11   : > { %2685 = vrot.lane.b32.xlu1 %v4350_v39, %s4025_s15 }
 0xa16   : > { %2589 = vrot.lane.b32.xlu0 %v4342_v28, %s4025_s15 }
 0xa19   : > { %v4732_v28 = vpop.eup %3816 }
 0xa1a   : > { %1722 = vrot.lane.b32.xlu0 %v1714_v13, %s4025_s15  ;;  %v2565_v39 = vsel %vm929_vm2, %v4732_v28, 0.0 }
 0xa1e   : > { %2255 = vrot.lane.b32.xlu0 %v2247_v6, %s4024_s11 }
 0xa22   : > { %1726 = vrot.lane.b32.xlu0 %v1716_v25, %s4025_s15 }
 0xa35   : > { %2566 = vadd.xlane.f32.xlu1 %v2565_v39 }
 0xa46   : > { %2733 = vrot.lane.b32.xlu1 %v4348_v38, %s4025_s15 }
 0xa4a   : > { %1724 = vrot.lane.b32.xlu1 %v1715_v20, %s4025_s15 }
 0xa4d   : > { %v2546_v10 = vpop.xlane.xlu0 %2545 }
 0xa4e   : > { %2257 = vrot.lane.b32.xlu1 %v2248_v56, %s4024_s11 }
 0xa4f   : > { %v2549_v12 = vpop.xlane.xlu1 %2548 }
 0xa50   : > { %3818 = vrcp.f32 %v2549_v12 }
 0xa51   : > { %3820 = vrcp.f32 %v2546_v10 }
 0xa52   : > { %1728 = vrot.lane.b32.xlu1 %v1717_v48, %s4025_s15 }
 0xa5a   : > { %v3819_v20 = vpop.eup %3818 }
 0xa5b   : > { %v3821_v22 = vpop.eup %3820  ;;  %v2577_v41 = vmul.f32 %v3819_v20, %v4695_v4 }
 0xa5c   : > { %v2576_v48 = vmul.f32 %v3821_v22, %v4691_v3 }
 0xa5e   : > { %v2584_v46 = vpack.c.bf16 %v2577_v41, %v2576_v48  ;;  %v3191_v48 = vld [vmem:[%s337_s16] ss:$0 sm:$0xff] }
 0xa81   : > { %v2552_v13 = vpop.xlane.xlu0 %2551 }
 0xa82   : > { %3822 = vrcp.f32 %v2552_v13 }
 0xa85   : > { %v2555_v38 = vpop.xlane.xlu1 %2554 }
 0xa86   : > { %3824 = vrcp.f32 %v2555_v38 }
 0xa89   : > { %v2558_v17 = vpop.xlane.xlu0 %2557  ;;  %v2561_v19 = vpop.xlane.xlu1 %2560 }
 0xa8a   : > { %3826 = vrcp.f32 %v2558_v17 }
 0xa8b   : > { %3828 = vrcp.f32 %v2561_v19 }
 0xa8c   : > { %v3823_v0 = vpop.eup %3822 }
 0xa8d   : > { %v2564_v24 = vpop.xlane.xlu0 %2563  ;;  %v2638_v25 = vpop.permute.xlu1 %2637  ;;  %v2578_v2 = vmul.f32 %v3823_v0, %v3807_v40  ;;  %v3702_v40 = vld [vmem:[#allocation11 + $0x20] sm:$0xff]  }
 0xa8e   : > { %3531 = vmatpush3.bf16.msra.mxu1 %v2638_v25  ;;  %3830 = vrcp.f32 %v2564_v24 }
 0xa8f   : > { %3542 = vmatprep.subr.bf16.mxu1 %v4021_v29 }
 0xa90   : > { %v3825_v47 = vpop.eup %3824 }
 0xa91   : > { %v2579_v6 = vmul.f32 %v3825_v47, %v3809_v30  ;;  %v2590_v57 = vpop.permute.xlu0 %2589  ;;  %v2686_v7 = vpop.permute.xlu1 %2685  ;;  %v3705_v30 = vld [vmem:[#allocation11 + $0x38] sm:$0xff]  }
 0xa92   : > { %3525 = vmatpush3.bf16.msra.mxu0 %v2590_v57 }
 0xa93   : > { %3536 = vmatprep.subr.bf16.mxu0 %v4021_v29  ;;  %v2585_v56 = vpack.c.bf16 %v2579_v6, %v2578_v2 }
 0xa94   : > { %v3827_v53 = vpop.eup %3826 }
 0xa95   : > { %v3829_v1 = vpop.eup %3828  ;;  %v1723_v45 = vpop.permute.xlu0 %1722  ;;  %3527 = vmatmul.mubr.msk.bf16.vlgmr.msra.gmra.mrb[60].mxu0 %vm929_vm2, %v2584_v46  ;;  %3533 = vmatmul.mubr.msk.bf16.vlgmr.msra.gmra.mrb[76].mxu1 %vm929_vm2, %v2585_v56  ;;  %v2580_v3 = vmul.f32 %v3827_v53, %v4703_v36 }
 0xa96   : > { %1735 = vst.msk [vmem:[#allocation5] sm:$0xff] %vm1734_vm3, %v1723_v45  ;;  %3537 = vmatpush3.bf16.msra.mxu0 %v2686_v7  ;;  %3538 = vmatprep.mubr.msk.bf16.mxu0 %vm4022_vm0, %v4021_v29  ;;  %v2581_v8 = vmul.f32 %v3829_v1, %v4701_v51 }
 0xa97   : > { %3544 = vmatprep.mubr.msk.bf16.mxu1 %vm4022_vm0, %v4021_v29  ;;  %3548 = vmatprep.subr.bf16.mxu0 %v3698_v44 }
 0xa98   : > { %v2586_v15 = vpack.c.bf16 %v2581_v8, %v2580_v3  ;;  %v3831_v5 = vpop.eup %3830 }
 0xa99   : > { %v2256_v4 = vpop.permute.xlu0 %2255  ;;  %v2582_v29 = vmul.f32 %v3831_v5, %v4709_v60 }
 0xa9a   : > { %2268 = vst.msk [vmem:[#allocation5] sm:$0xff] %vm2267_vm4, %v2256_v4 }
 0xa9d   : > { %v1727_v18 = vpop.permute.xlu0 %1726  ;;  %3539 = vmatmul.mubr.msk.bf16.vlgmr.msra.gmra.mrb[64].mxu0 %vm929_vm2, %v2586_v15 }
 0xa9e   : > { %1737 = vst.msk [vmem:[#allocation5 + $0x10] sm:$0xff] %vm1734_vm3, %v1727_v18  ;;  %3549 = vmatpush3.bf16.msra.mxu0 %v3698_v44 }
 0xa9f   : > { %3550 = vmatprep.subr.bf16.mxu0 %v3699_v49 }
 0xaa2   : > { %3551 = vmatpush3.bf16.msra.mxu0 %v3699_v49 }
 0xaa3   : > { %3552 = vmatprep.subr.bf16.mxu0 %v3700_v52 }
 0xaa6   : > { %3553 = vmatpush3.bf16.msra.mxu0 %v3700_v52 }
 0xaa7   : > { %3554 = vmatprep.subr.bf16.mxu0 %v3701_v54 }
 0xaaa   : > { %3555 = vmatpush3.bf16.msra.mxu0 %v3701_v54 }
 0xaab   : > { %3556 = vmatprep.subr.bf16.mxu0 %v3702_v40 }
 0xaae   : > { %3557 = vmatpush3.bf16.msra.mxu0 %v3702_v40 }
 0xaaf   : > { %3558 = vmatprep.subr.bf16.mxu0 %v3703_v50 }
 0xab2   : > { %3559 = vmatpush3.bf16.msra.mxu0 %v3703_v50 }
 0xab3   : > { %3560 = vmatprep.subr.bf16.mxu0 %v3704_v59 }
 0xab6   : > { %3561 = vmatpush3.bf16.msra.mxu0 %v3704_v59 }
 0xab7   : > { %3562 = vmatprep.subr.bf16.mxu0 %v3705_v30 }
 0xaba   : > { %3563 = vmatpush3.bf16.msra.mxu0 %v3705_v30 }
 0xac2   : > { %v2567_v14 = vpop.xlane.xlu1 %2566 }
 0xac3   : > { %3832 = vrcp.f32 %v2567_v14 }
 0xac6   : > { %v2734_v21 = vpop.permute.xlu1 %2733 }
 0xac7   : > { %3543 = vmatpush3.bf16.msra.mxu1 %v2734_v21 }
 0xaca   : > { %v1725_v16 = vpop.permute.xlu1 %1724 }
 0xacb   : > { %1736 = vst.msk [vmem:[#allocation5 + $0x8] sm:$0xff] %vm1734_vm3, %v1725_v16 }
 0xacd   : > { %v3833_v26 = vpop.eup %3832 }
 0xace   : > { %v2583_v32 = vmul.f32 %v3833_v26, %v4732_v28  ;;  %v2258_v33 = vpop.permute.xlu1 %2257 }
 0xacf   : > { %2269 = vst.msk [vmem:[#allocation5 + $0x8] sm:$0xff] %vm2267_vm4, %v2258_v33 }
 0xad0   : > { %v2587_v34 = vpack.c.bf16 %v2583_v32, %v2582_v29 }
 0xad2   : > { %3545 = vmatmul.mubr.msk.bf16.vlgmr.msra.gmra.mrb[80].mxu1 %vm929_vm2, %v2587_v34  ;;  %v1729_v42 = vpop.permute.xlu1 %1728 }
 0xad3   : > { %1738 = vst.msk [vmem:[#allocation5 + $0x18] sm:$0xff] %vm1734_vm3, %v1729_v42 }
 0xb68   : > { %v2629_v43 = vpop.f32.mrb[60].mxu0  ;;  %v2677_v51 = vpop.f32.mrb[76].mxu1 }
 0xb69   : > { %v3528_v36 = vpop.f32.mrb[61].mxu0  ;;  %v3534_v23 = vpop.f32.mrb[77].mxu1 }
 0xb6a   : > { %v2632_v55 = vpop.f32.mrb[62].mxu0  ;;  %v2680_v60 = vpop.f32.mrb[78].mxu1 }
 0xb6b   : > { %v2780_v58 = vpack.c.bf16 %v2632_v55, %v2629_v43  ;;  %v2781_v62 = vpack.c.bf16 %v2680_v60, %v2677_v51  ;;  %v3529_v63 = vpop.f32.mrb[63].mxu0  ;;  %v3535_v27 = vpop.f32.mrb[79].mxu1 }
 0xb6d   : > { %2788 = vrot.lane.b32.xlu0 %v2780_v58, %s4023_s8  ;;  %2790 = vrot.lane.b32.xlu1 %v2781_v62, %s4023_s8 }
 0xb70   : > { %v2725_v28 = vpop.f32.mrb[64].mxu0 }
 0xb71   : > { %2259 = vrot.lane.b32.xlu0 %v2249_v11, %s4024_s11  ;;  %v3540_v39 = vpop.f32.mrb[65].mxu0  ;;  %2261 = vrot.lane.b32.xlu1 %v2250_v37, %s4024_s11 }
 0xb72   : > { %v2728_v10 = vpop.f32.mrb[66].mxu0 }
 0xb73   : > { %v2782_v12 = vpack.c.bf16 %v2728_v10, %v2725_v28  ;;  %v3541_v13 = vpop.f32.mrb[67].mxu0 }
 0xb75   : > { %2792 = vrot.lane.b32.xlu0 %v2782_v12, %s4023_s8 }
 0xba5   : > { %v2773_v38 = vpop.f32.mrb[80].mxu1 }
 0xba6   : > { %v3546_v17 = vpop.f32.mrb[81].mxu1 }
 0xba7   : > { %v2776_v19 = vpop.f32.mrb[82].mxu1 }
 0xba8   : > { %v2783_v20 = vpack.c.bf16 %v2776_v19, %v2773_v38  ;;  %v3547_v22 = vpop.f32.mrb[83].mxu1 }
 0xbaa   : > { %2794 = vrot.lane.b32.xlu1 %v2783_v20, %s4023_s8  ;;  %s3928_s8 = sshll.u32 %s4026_s26, 4  ;;  %s3929_s8 = int_to_ptr.vmem [resolvable:$false] %s3928_s8 }
 0xbab   : > { %s3930_s15 = scalar_lea.vmem %s3929_s8, 1024  ;;  %p3931_p0 = scmp.lt.s32.totalorder %s4797_s7, %s3929_s8 }
 0xbac   : > { %p3932_p3 = scmp.lt.s32.totalorder %s3930_s15, %s3924_s9 }
 0xbae   : > { %p3933_p5 = por %p3932_p3, %p3931_p0 }
 0xbb0   : > { %p3934_p2 = pnand %p3933_p5, %p3927_p12 }
 0xbdf   : > { %v2789_v61 = vpop.permute.xlu0 %2788  ;;  %v2791_v9 = vpop.permute.xlu1 %2790 }
 0xbe0   : > { %2801 = vst.msk [vmem:[#allocation5] sm:$0xff] %vm2800_vm5, %v2789_v61  ;;  %2802 = vst.msk [vmem:[#allocation5 + $0x8] sm:$0xff] %vm2800_vm5, %v2791_v9 }
 0xbe3   : > { %v2260_v11 = vpop.permute.xlu0 %2259  ;;  %v2262_v31 = vpop.permute.xlu1 %2261 }
 0xbe4   : > { %2270 = vst.msk [vmem:[#allocation5 + $0x10] sm:$0xff] %vm2267_vm4, %v2260_v11  ;;  %2271 = vst.msk [vmem:[#allocation5 + $0x18] sm:$0xff] %vm2267_vm4, %v2262_v31 }
 0xbe7   : > { %v2793_v35 = vpop.permute.xlu0 %2792  ;;  %v2805_v37 = vld [vmem:[#allocation5] sm:$0xff]  ;;  %v2806_v24 = vld [vmem:[#allocation5 + $0x8] sm:$0xff] }
 0xbe8   : > { %2803 = vst.msk [vmem:[#allocation5 + $0x10] sm:$0xff] %vm2800_vm5, %v2793_v35  ;;  %3564 = vmatprep.mubr.bf16.mxu0 %v2805_v37 }
 0xbe9   : > { %3565 = vmatmul.mubr.bf16.vlgmr.msra.gmra.mrb[68].mxu0 %v2806_v24 }
 0xbef   : > { %v2807_v25 = vld [vmem:[#allocation5 + $0x10] sm:$0xff] }
 0xbf0   : > { %3568 = vmatprep.mubr.bf16.mxu0 %v2807_v25 }
 0xc1c   : > { %v2795_v0 = vpop.permute.xlu1 %2794 }
 0xc1d   : > { %2804 = vst.msk [vmem:[#allocation5 + $0x18] sm:$0xff] %vm2800_vm5, %v2795_v0 }
 0xc24   : > { %v2808_v41 = vld [vmem:[#allocation5 + $0x18] sm:$0xff] }
 0xc25   : > { %3569 = vmatmul.mubr.bf16.gmra.mrb[72].mxu0 %v2808_v41 }
 0xcbc   : > { %v3566_v47 = vpop.f32.mrb[68].mxu0 }
 0xcbd   : > { %v2897_v2 = vpop.f32.mrb[69].mxu0  ;;  %v2906_v57 = vadd.f32 %v3566_v47, %v3191_v48 }
 0xcbe   : > { %v3567_v6 = vpop.f32.mrb[70].mxu0  ;;  %v2898_v53 = vadd.f32 %v3191_v48, %v2897_v2 }
 0xcbf   : > { %v2909_v46 = vadd.f32 %v3567_v6, %v3191_v48  ;;  %v2900_v56 = vpop.f32.mrb[71].mxu0 }
 0xcc0   : > { %v2901_v1 = vadd.f32 %v3191_v48, %v2900_v56 }
 0xcc1   : > { %v3229_v7 = vpack.c.bf16 %v2909_v46, %v2906_v57 }
 0xcc2   : > { %v3224_v45 = vpack.c.bf16 %v2901_v1, %v2898_v53 }
 0xcc3   : > { %3241 = vst [vmem:[%s329_s12 + $0x8] sm:$0xff] %v3229_v7  }
 0xcc4   : > { %3225 = vst [vmem:[%s329_s12] sm:$0xff] %v3224_v45  }
 0xcf8   : > { %v3570_v3 = vpop.f32.mrb[72].mxu0 }
 0xcf9   : > { %v2913_v8 = vpop.f32.mrb[73].mxu0  ;;  %v2922_v15 = vadd.f32 %v3570_v3, %v3191_v48 }
 0xcfa   : > { %v3571_v4 = vpop.f32.mrb[74].mxu0  ;;  %v2914_v21 = vadd.f32 %v3191_v48, %v2913_v8 }
 0xcfb   : > { %v2925_v18 = vadd.f32 %v3571_v4, %v3191_v48  ;;  %v2916_v14 = vpop.f32.mrb[75].mxu0 }
 0xcfc   : > { %v2917_v16 = vadd.f32 %v3191_v48, %v2916_v14 }
 0xcfd   : > { %v3239_v5 = vpack.c.bf16 %v2925_v18, %v2922_v15 }
 0xcfe   : > { %v3234_v26 = vpack.c.bf16 %v2917_v16, %v2914_v21 }
 0xcff   : > { %3243 = vst [vmem:[%s329_s12 + $0x18] sm:$0xff] %v3239_v5  }
 0xd00   : > { %3242 = vst [vmem:[%s329_s12 + $0x10] sm:$0xff] %v3234_v26  }
 0xd01   : > { %3937 = shalt.err (!%p3934_p2)
}
 0xd02   : > { %s3938_s17 = scalar_lea.hbm %s4802_s10, 512  ;;  %s3942_s12 = scalar_lea.hbm %s4857_s5, 1024 }
 0xd03   : > { %p3939_p11 = scmp.ne.s32.totalorder %s4802_s10, %s3938_s17  ;;  %p3943_p6 = scmp.lt.u32.totalorder %s4802_s10, %s4857_s5 }
 0xd04   : > { %p3944_p8 = scmp.lt.u32.totalorder %s3942_s12, %s3938_s17  ;;  %p3946_p1 = scmp.lt.u32.totalorder %s3938_s17, %s4802_s10 }
 0xd05   : > { %p3940_p13 = pnand %p3939_p11, %p4192_p9 }
 0xd06   : > { %p3945_p10 = por %p3944_p8, %p3943_p6 }
 0xd07   : > { %p3941_p4 = pneg %p3940_p13 }
 0xd08   : > { %p3947_p7 = por %p3946_p1, %p3945_p10 }
 0xd0a   : > { %p3948_p12 = pnand %p3947_p7, %p3941_p4 }
 0xd0c   : > { %3951 = shalt.err (!%p3948_p12)
}
 0xd0d   : > { %s4027_s30 = smov 128   ;;  %s4028_s9 = smov 4  }
 0xd0e   : > { %3580 = dma.vmem_to_hbm [thread:$0]  (%p4192_p9), %s4797_s7, 512, %s4802_s10, %s2969_s21, %s4024_s11, %s4027_s30, %s4028_s9  }
 0xd0f PF: > { %s2999_s26 = sand.u32 1, %s3990_s18   ;;  %p4871_p0 = scmp.ne.s32.totalorder %s4863_s28, 0 }
 0xd10   : > { %p4872_p3 = scmp.ge.s32.totalorder %s4010_s23, 2  ;;  %s3000_s8 = scalar_lea.sflag [#allocation8], %s2999_s26 }
 0xd12   : > { %p3594_p5 = pnand %p4872_p3, %p4871_p0 }
 0xd14   : > { %3985 = dma.done.wait (!%p3594_p5), %s3000_s8, 512  }
 0xd15   : > { %3987 = vsyncadd (!%p3594_p5), %s3000_s8, 4294966784  ;;  %s22_s23 = sadd.s32 1, %s4010_s23   ;;  %s4873_s18 = smov %s3994_s19 }
 0xd16   : > { %p19_p2 = scmp.ge.s32.totalorder %s22_s23, 4   ;;  %s4874_s19 = smov %s3998_s20 }
 0xd17   : > { %s4875_s20 = smov %s4204_s24  ;;  %s4876_s21 = smov %s4006_s22 }
 0xd18   : > { %s4877_s22 = smov %s4879_s13  ;;  %21 = sbr.rel (!%p19_p2) target bundleno = 7 (0x7), region = 101 }
 0xd1f   :  { %3005 = vsyncpa [#allocation7], 1 }
 0xd20   :  { %3007 = vsyncpa [#allocation7 + $0x1], 1 }
 0xd21   :  { %3008 = vsyncpa [#allocation10], 1 }
 0xd22   :  { %3009 = vsyncpa [#allocation8], 1 }
 0xd23   :  { %3011 = vsyncpa [#allocation8 + $0x1], 1 }

// kernel: tpu_custom_call.1
= control target key start
LH: loop header
LB: loop body
LE: loop exit
PB: predicated region body
PF: predicated region fallthrough
CT: control target
= control target key end

     0   :  { %s4932_s0 = inlined_call_operand.hbm [shape: bf16[4,16,256], index: 0, kind: input, shape index: {}]   ;;  %s4933_s1 = inlined_call_operand.hbm [shape: bf16[2,128,384], index: 1, kind: input, shape index: {}]   ;;  %s4934_s2 = inlined_call_operand.vmem [shape: f32[2,1,384], index: 2, kind: input, shape index: {}]   ;;  %s4935_s3 = inlined_call_operand.hbm [shape: bf16[2,128,128], index: 3, kind: input, shape index: {}]   ;;  %s4936_s4 = inlined_call_operand.vmem [shape: f32[2,1,128], index: 4, kind: input, shape index: {}]   ;;  %s4937_s5 = inlined_call_operand.hbm [shape: bf16[4,16,256], index: 5, kind: output, shape index: {}]  }
   0x1   :  { %4944 = sst [smem:[#allocation20_spill]] %s4932_s0 }
   0x2   :  { %4945 = sst [smem:[#allocation21_spill]] %s4933_s1 }
   0x3   :  { %10 = vsyncpa [#allocation7], 0 }
   0x4   :  { %12 = vsyncpa [#allocation7 + $0x1], 0 }
   0x5   :  { %13 = vsyncpa [#allocation10], 0 }
   0x6   :  { %15 = vsyncpa [#allocation10 + $0x1], 0 }
   0x7   :  { %16 = vsyncpa [#allocation8], 0 }
   0x8   :  { %18 = vsyncpa [#allocation8 + $0x1], 0  ;;  %s4106_s18 = smov 0   ;;  %s4108_s19 = smov 0  }
   0x9   :  { %s4110_s20 = smov 0   ;;  %s4112_s21 = smov 0  }
   0xa   :  { %s4114_s22 = smov 0   ;;  %s4116_s23 = smov 0  }
   0xb LB: > { %4946 = sst [smem:[#allocation16_spill]] %s4045_s20  ;;  %s4137_s24 = sadd.s32 4294967295, %s4057_s23   ;;  %s4057_s23 = sphi %s4116_s23, %s24_s23   ;;  %s4053_s22 = sphi %s4114_s22, %s4971_s22   ;;  %s4049_s21 = sphi %s4112_s21, %s4970_s21   ;;  %s4045_s20 = sphi %s4110_s20, %s4966_s20   ;;  %s4041_s19 = sphi %s4108_s19, %s4969_s19   ;;  %s4037_s18 = sphi %s4106_s18, %s4968_s18  }
   0xc   : > { %4947 = sst [smem:[#allocation17_spill]] %s4057_s23  ;;  %s3166_s25 = sadd.s32 4294967294, %s4057_s23  }
   0xd   : > { %s36_s26 = sadd.s32 1, %s4053_s22  ;;  %s45_s27 = sadd.s32 1, %s4045_s20 }
   0xe   : > { %p38_p0 = scmp.ge.s32.totalorder %s36_s26, 2  ;;  %p52_p1 = scmp.ne.s32.totalorder %s4045_s20, %s4041_s19 }
   0xf   : > { %p53_p2 = scmp.eq.s32.totalorder %s4057_s23, 0  ;;  %p58_p3 = scmp.ne.s32.totalorder %s4041_s19, %s4037_s18 }
  0x10   : > { %s4973_s26 = smov (%p38_p0, %s36_s26), 0  ;;  %p59_p5 = scmp.eq.s32.totalorder %s4137_s24, 0 }
  0x11   : > { %4948 = sst [smem:[#allocation18_spill]] %s4973_s26  ;;  %p4149_p4 = por %p53_p2, %p52_p1 }
  0x12   : > { %s41_s29 = ssub.s32 %s4053_s22, %s4973_s26  ;;  %p188_p6 = scmp.eq.s32.totalorder %s4137_s24, 1 }
  0x13   : > { %p43_p7 = scmp.eq.s32.totalorder %s41_s29, 0  ;;  %p4157_p8 = por %p59_p5, %p58_p3 }
  0x14   : > { %p4161_p9 = por %p188_p6, %p52_p1  ;;  %p194_p10 = scmp.eq.s32.totalorder %s3166_s25, 1 }
  0x15   : > { %s4950_s30 = scalar_select %p4157_p8, 1, 0 }
  0x16   : > { %s4951_s6 = scalar_select %p4161_p9, 1, 0 }
  0x17   : > { %s4166_s7 = scalar_select %p43_p7, %s4045_s20, %s45_s27  }
  0x18   : > { %p4168_p11 = por %p194_p10, %p58_p3  ;;  %p3646_p13 = scmp.lt.s32.totalorder %s4057_s23, 2 }
  0x19   : > { %4952 = sst [smem:[#allocation19_spill]] %s4166_s7  ;;  %s4175_s9 = sand.u32 1, %s4045_s20  }
  0x1a   : > { %s4953_s8 = scalar_select %p4168_p11, 1, 0 }
  0x1b   : > { %s237_s10 = sand.u32 1, %s4057_s23   ;;  %s3620_s11 = smul.u32 192, %s4175_s9 }
  0x1c   : > { %p4181_p0 = pnand %p3646_p13, %p4149_p4  ;;  %s3621_s13 = smul.u32 3072, %s4053_s22 }
  0x1d   : > { %s241_s14 = scalar_lea.vmem [#allocation9], %s3620_s11  ;;  %s4955_s1 = sld [smem:[#allocation21_spill]] }
  0x1e   : > { %s248_s15 = sshll.u32 %s241_s14, 4  ;;  %s4193_s27 = scalar_lea.sflag [#allocation10], %s237_s10  ;;  %s4191_s15 = int_to_ptr.vmem [resolvable:$true] %s248_s15 }
  0x1f   : > { %p4199_p2 = pneg %p4181_p0 }
  0x23   : > { %s4189_s25 = scalar_lea.hbm %s4955_s1, %s3621_s13  ;;  %s3886_s14 = scalar_lea.hbm %s4955_s1, 6144 }
  0x24   : > { %s3881_s28 = scalar_lea.hbm %s4189_s25, 3072  ;;  %p3887_p5 = scmp.lt.u32.totalorder %s4189_s25, %s4955_s1 }
  0x25   : > { %p3882_p1 = scmp.ne.s32.totalorder %s4189_s25, %s3881_s28  ;;  %p3888_p6 = scmp.lt.u32.totalorder %s3886_s14, %s3881_s28 }
  0x26   : > { %p3890_p10 = scmp.lt.u32.totalorder %s3881_s28, %s4189_s25 }
  0x27   : > { %p3884_p3 = pnand %p4199_p2, %p3882_p1  ;;  %p3889_p7 = por %p3888_p6, %p3887_p5 }
  0x29   : > { %p3885_p4 = pneg %p3884_p3  ;;  %p3891_p13 = por %p3890_p10, %p3889_p7 }
  0x2b   : > { %p3892_p12 = pnand %p3891_p13, %p3885_p4 }
  0x2d   : > { %3895 = shalt.err (!%p3892_p12)
}
  0x2e   : > { %s3896_s10 = scalar_lea.vmem %s4191_s15, 3072  ;;  %s4059_s11 = smov [#allocation9]  }
  0x2f   : > { %p3897_p1 = scmp.ne.s32.totalorder %s4191_s15, %s3896_s10  ;;  %s3901_s13 = sshll.u32 %s4059_s11, 4  ;;  %s3902_s13 = int_to_ptr.vmem [resolvable:$false] %s3901_s13 }
  0x30   : > { %s3903_s16 = scalar_lea.vmem %s3902_s13, 6144  ;;  %p3904_p9 = scmp.lt.s32.totalorder %s4191_s15, %s3902_s13 }
  0x31   : > { %p3899_p3 = pnand %p3897_p1, %p4199_p2  ;;  %p3905_p8 = scmp.lt.s32.totalorder %s3903_s16, %s3896_s10 }
  0x33   : > { %p3900_p11 = pneg %p3899_p3  ;;  %p3906_p5 = por %p3905_p8, %p3904_p9 }
  0x35   : > { %p3907_p6 = pnand %p3906_p5, %p3900_p11 }
  0x37   : > { %3910 = shalt.err (!%p3907_p6)
}
  0x38   : > { %s4060_s28 = smov 192   ;;  %s4061_s14 = smov 12  }
  0x39   : > { %3638 = dma.hbm_to_vmem [thread:$0]  (!%p4181_p0), %s4189_s25, 3072, %s4191_s15, %s4193_s27, %s4060_s28, %s4060_s28, %s4061_s14  }
  0x3a   : > { %p3175_p12 = scmp.ge.s32.totalorder %s4057_s23, 1  ;;  %p290_p4 = scmp.lt.s32.totalorder %s4057_s23, 3 }
  0x3b   : > { %s3169_s10 = sshll.u32 %s4175_s9, 5  ;;  %s3170_s11 = sshll.u32 %s4053_s22, 6 }
  0x3c   : > { %p4225_p8 = pnand %p3175_p12, %p290_p4  ;;  %s4958_s0 = sld [smem:[#allocation20_spill]] }
  0x3d   : > { %s218_s26 = scalar_lea.vmem [#allocation6], %s3169_s10  ;;  %s3172_s15 = sshll.u32 %s4175_s9, 6 }
  0x3e   : > { %s4957_s17 = scalar_select %p4225_p8, 1, 0 }
  0x3f   : > { %s227_s7 = sshll.u32 %s218_s26, 4  ;;  %s215_s25 = scalar_lea.sflag [#allocation7], %s4175_s9  ;;  %s4236_s7 = int_to_ptr.vmem [resolvable:$true] %s227_s7 }
  0x42   : > { %s4234_s1 = scalar_lea.hbm %s4958_s0, %s3170_s11  ;;  %s3916_s11 = scalar_lea.hbm %s4958_s0, 1024 }
  0x43   : > { %s3911_s28 = scalar_lea.hbm %s4234_s1, 512  ;;  %p3917_p10 = scmp.lt.u32.totalorder %s4234_s1, %s4958_s0 }
  0x44   : > { %p3912_p9 = scmp.ne.s32.totalorder %s4234_s1, %s3911_s28  ;;  %p3918_p13 = scmp.lt.u32.totalorder %s3916_s11, %s3911_s28 }
  0x45   : > { %p3920_p3 = scmp.lt.u32.totalorder %s3911_s28, %s4234_s1 }
  0x46   : > { %p3914_p11 = pnand %p3912_p9, %p4199_p2  ;;  %p3919_p1 = por %p3918_p13, %p3917_p10 }
  0x48   : > { %p3915_p7 = pneg %p3914_p11  ;;  %p3921_p5 = por %p3920_p3, %p3919_p1 }
  0x4a   : > { %p3922_p6 = pnand %p3921_p5, %p3915_p7 }
  0x4c   : > { %3925 = shalt.err (!%p3922_p6)
}
  0x4d   : > { %s3926_s26 = scalar_lea.vmem %s4236_s7, 512  ;;  %s4062_s20 = smov [#allocation6]  }
  0x4e   : > { %p3927_p12 = scmp.ne.s32.totalorder %s4236_s7, %s3926_s26  ;;  %s3931_s10 = sshll.u32 %s4062_s20, 4  ;;  %s3932_s10 = int_to_ptr.vmem [resolvable:$false] %s3931_s10 }
  0x4f   : > { %s3933_s14 = scalar_lea.vmem %s3932_s10, 1024  ;;  %p3934_p11 = scmp.lt.s32.totalorder %s4236_s7, %s3932_s10 }
  0x50   : > { %p3929_p4 = pnand %p3927_p12, %p4199_p2  ;;  %p3935_p8 = scmp.lt.s32.totalorder %s3933_s14, %s3926_s26 }
  0x52   : > { %p3930_p9 = pneg %p3929_p4  ;;  %p3936_p10 = por %p3935_p8, %p3934_p11 }
  0x54   : > { %p3937_p13 = pnand %p3936_p10, %p3930_p9 }
  0x56   : > { %3940 = shalt.err (!%p3937_p13)
}
  0x57   : > { %s4063_s28 = smov 128   ;;  %s4064_s11 = smov 64  }
  0x58   : > { %s4065_s13 = smov 4   ;;  %s3260_s16 = sshll.u32 %s4053_s22, 10 }
  0x59   : > { %3635 = dma.hbm_to_vmem [thread:$0]  (!%p4181_p0), %s4234_s1, 512, %s4236_s7, %s215_s25, %s4063_s28, %s4064_s11, %s4065_s13  }
  0x5a   : > { %s4269_s10 = scalar_lea.hbm %s4935_s3, %s3260_s16  ;;  %s269_s14 = scalar_lea.vmem [#allocation11], %s3172_s15 }
  0x5b   : > { %s276_s0 = sshll.u32 %s269_s14, 4  ;;  %s3941_s23 = scalar_lea.hbm %s4269_s10, 1024  ;;  %s4273_s0 = int_to_ptr.vmem [resolvable:$true] %s276_s0 }
  0x5c   : > { %p3942_p8 = scmp.ne.s32.totalorder %s4269_s10, %s3941_s23  ;;  %s3946_s25 = scalar_lea.hbm %s4935_s3, 2048 }
  0x5d   : > { %p3947_p3 = scmp.lt.u32.totalorder %s4269_s10, %s4935_s3  ;;  %p3948_p5 = scmp.lt.u32.totalorder %s3946_s25, %s3941_s23 }
  0x5e   : > { %p3944_p7 = pnand %p3942_p8, %p4199_p2  ;;  %p3950_p12 = scmp.lt.u32.totalorder %s3941_s23, %s4269_s10 }
  0x5f   : > { %p3949_p6 = por %p3948_p5, %p3947_p3 }
  0x60   : > { %p3945_p1 = pneg %p3944_p7 }
  0x61   : > { %p3951_p4 = por %p3950_p12, %p3949_p6 }
  0x63   : > { %p3952_p9 = pnand %p3951_p4, %p3945_p1 }
  0x65   : > { %3955 = shalt.err (!%p3952_p9)
}
  0x66   : > { %s3956_s9 = scalar_lea.vmem %s4273_s0, 1024  ;;  %s4066_s15 = smov [#allocation11]  }
  0x67   : > { %p3957_p11 = scmp.ne.s32.totalorder %s4273_s0, %s3956_s9  ;;  %s3961_s26 = sshll.u32 %s4066_s15, 4  ;;  %s3962_s26 = int_to_ptr.vmem [resolvable:$false] %s3961_s26 }
  0x68   : > { %s3963_s20 = scalar_lea.vmem %s3962_s26, 2048  ;;  %p3964_p8 = scmp.lt.s32.totalorder %s4273_s0, %s3962_s26 }
  0x69   : > { %p3959_p10 = pnand %p3957_p11, %p4199_p2  ;;  %p3965_p7 = scmp.lt.s32.totalorder %s3963_s20, %s3956_s9 }
  0x6b   : > { %p3960_p13 = pneg %p3959_p10  ;;  %p3966_p3 = por %p3965_p7, %p3964_p8 }
  0x6d   : > { %p3967_p5 = pnand %p3966_p3, %p3960_p13 }
  0x6f   : > { %3970 = shalt.err (!%p3967_p5)
}
  0x70   : > { %3641 = dma.hbm_to_vmem [thread:$0]  (!%p4181_p0), %s4269_s10, 1024, %s4273_s0, %s4193_s27, %s4064_s11, %s4064_s11, %s4065_s13  }
  0x71   : > { %p4959_p2 = scmp.ne.s32.totalorder %s4957_s17, 0 }
  0x72   : > { %s4303_s23 = sand.u32 (!%p4959_p2), 1, %s4041_s19   ;;  %p4960_p1 = scmp.ne.s32.totalorder (!%p4959_p2), %s4950_s30, 0 }
  0x73   : > { %294 = sbr.rel (%p4959_p2) target bundleno = 3358 (0xd1e), region = 40  ;;  %s3176_s29 = sshll.u32 (!%p4959_p2), %s4303_s23, 5 }
  0x74   : > { %s297_s14 = scalar_lea.sflag (!%p4959_p2), [#allocation7], %s4303_s23  ;;  %s4309_s12 = scalar_lea.vmem (!%p4959_p2), [#allocation6], %s3176_s29 }
  0x7a   : > { %4024 = dma.done.wait (%p4960_p1), %s297_s14, 512  }
  0x7b   : > { %4026 = vsyncadd (%p4960_p1), %s297_s14, 4294966784  ;;  %s305_s0 = sand.u32 1, %s4137_s24   ;;  %s3622_s27 = smul.u32 192, %s4303_s23 }
  0x7c   : > { %s306_s17 = scalar_lea.sflag [#allocation10], %s305_s0 }
  0x7d   : > { %s4317_s11 = scalar_lea.vmem [#allocation9], %s3622_s27 }
  0x7e   : > { %4028 = dma.done.wait (%p4960_p1), %s306_s17, 4096  }
  0x7f   : > { %4030 = vsyncadd (%p4960_p1), %s306_s17, 4294963200  ;;  %v4067_v0 = vmov 0   ;;  %v3709_v1 = vld [vmem:[%s4317_s11 + $0x4] ss:$12 sps:$4 sm:$0xff]   ;;  %v3711_v2 = vld [vmem:[%s4317_s11] ss:$12 sps:$4 sm:$0xff]   ;;  %v431_v30 = vlaneseq }
  0x80   : > { %630 = vmatprep.mubr.bf16.mxu1 %v4067_v0  ;;  %598 = vmatprep.subr.bf16.mxu1 %v3709_v1  ;;  %v3712_v3 = vld [vmem:[%s4317_s11 + $0x1c] ss:$12 sps:$4 sm:$0xff]   ;;  %v3714_v4 = vld [vmem:[%s4317_s11 + $0x18] ss:$12 sps:$4 sm:$0xff]   ;;  %v3715_v5 = vld [vmem:[%s4317_s11 + $0x34] ss:$12 sps:$4 sm:$0xff]  }
  0x81   : > { %599 = vmatpush1.bf16.msra.mxu1 %v3711_v2  ;;  %v3717_v6 = vld [vmem:[%s4317_s11 + $0x30] ss:$12 sps:$4 sm:$0xff]   ;;  %v3718_v7 = vld [vmem:[%s4317_s11 + $0x4c] ss:$12 sps:$4 sm:$0xff]   ;;  %v3720_v8 = vld [vmem:[%s4317_s11 + $0x48] ss:$12 sps:$4 sm:$0xff]  }
  0x82   : > { %600 = vmatprep.subr.bf16.mxu1 %v3712_v3  ;;  %v3733_v9 = vld [vmem:[%s4309_s12] sm:$0xff]   ;;  %v3724_v12 = vld [vmem:[%s4317_s11 + $0x7c] ss:$12 sps:$4 sm:$0xff]   ;;  %v3730_v20 = vld [vmem:[%s4317_s11 + $0xac] ss:$12 sps:$4 sm:$0xff]   ;;  %v4068_v29 = vmov 0.0  }
  0x83   : > { %v3721_v10 = vld [vmem:[%s4317_s11 + $0x64] ss:$12 sps:$4 sm:$0xff]   ;;  %v3723_v11 = vld [vmem:[%s4317_s11 + $0x60] ss:$12 sps:$4 sm:$0xff]   ;;  %3396 = vmatprep.mubr.bf16.mxu0 %v3733_v9  ;;  %v3737_v13 = vld [vmem:[%s4317_s11 + $0x8] ss:$12 sps:$4 sm:$0xff]  }
  0x84   : > { %v3738_v14 = vld [vmem:[%s4317_s11 + $0x20] ss:$12 sps:$4 sm:$0xff]   ;;  %v3726_v15 = vld [vmem:[%s4317_s11 + $0x78] ss:$12 sps:$4 sm:$0xff]   ;;  %3380 = vmatprep.subr.bf16.mxu0 %v3737_v13  ;;  %v3729_v18 = vld [vmem:[%s4317_s11 + $0x90] ss:$12 sps:$4 sm:$0xff]  }
  0x85   : > { %601 = vmatpush1.bf16.msra.mxu1 %v3714_v4  ;;  %v3727_v16 = vld [vmem:[%s4317_s11 + $0x94] ss:$12 sps:$4 sm:$0xff]   ;;  %3381 = vmatpush3.bf16.msra.mxu0 %v3737_v13  ;;  %v3739_v17 = vld [vmem:[%s4317_s11 + $0x38] ss:$12 sps:$4 sm:$0xff]   ;;  %v3740_v19 = vld [vmem:[%s4317_s11 + $0x50] ss:$12 sps:$4 sm:$0xff]  }
  0x86   : > { %602 = vmatprep.subr.bf16.mxu1 %v3715_v5  ;;  %3382 = vmatprep.subr.bf16.mxu0 %v3738_v14  ;;  %v3732_v21 = vld [vmem:[%s4317_s11 + $0xa8] ss:$12 sps:$4 sm:$0xff]   ;;  %v3736_v24 = vld [vmem:[%s4309_s12 + $0x18] sm:$0xff]   ;;  %v3742_v26 = vld [vmem:[%s4317_s11 + $0x80] ss:$12 sps:$4 sm:$0xff]   ;;  %vm4069_vm0 = vmmov 0  }
  0x87   : > { %v3734_v22 = vld [vmem:[%s4309_s12 + $0x8] sm:$0xff]   ;;  %v3735_v23 = vld [vmem:[%s4309_s12 + $0x10] sm:$0xff]   ;;  %v3743_v27 = vld [vmem:[%s4317_s11 + $0x98] ss:$12 sps:$4 sm:$0xff]   ;;  %p363_p0 = scmp.lt.s32.totalorder %s4049_s21, 1  ;;  %v4362_v31 = vshrl.u32 %v431_v30, 7 }
  0x88   : > { %v3741_v25 = vld [vmem:[%s4317_s11 + $0x68] ss:$12 sps:$4 sm:$0xff]   ;;  %v3744_v28 = vld [vmem:[%s4317_s11 + $0xb0] ss:$12 sps:$4 sm:$0xff]   ;;  %vm772_vm1 = vcmask 261120   ;;  %vm961_vm2 = vcmask 130048  }
  0x89   : > { %603 = vmatpush1.bf16.msra.mxu1 %v3717_v6  ;;  %3383 = vmatpush3.bf16.msra.mxu0 %v3738_v14  ;;  %s4359_s24 = scalar_select %p363_p0, %s4049_s21, 1  ;;  %v433_v32 = vsub.s32 0, %v4362_v31  ;;  %v437_v34 = vsub.s32 1, %v4362_v31  ;;  %vm1766_vm3 = vcmask 523520   ;;  %vm2299_vm4 = vcmask 785920  }
  0x8a   : > { %604 = vmatprep.subr.bf16.mxu1 %v3718_v7  ;;  %3384 = vmatprep.subr.bf16.mxu0 %v3739_v17  ;;  %s4070_s7 = smov 96   ;;  %s4071_s25 = smov 64   ;;  %vm2832_vm5 = vcmask 1048320  }
  0x8b   : > { %s3623_s30 = smul.u32 3, %s4359_s24  ;;  %s4072_s28 = smov 32  }
  0x8c   : > { %s3177_s16 = sshll.u32 %s4303_s23, 6  ;;  %s369_s20 = scalar_lea.vmem %s4936_s4, %s4359_s24 }
  0x8d   : > { %605 = vmatpush1.bf16.msra.mxu1 %v3720_v8  ;;  %3385 = vmatpush3.bf16.msra.mxu0 %v3739_v17  ;;  %s366_s1 = scalar_lea.vmem %s4934_s2, %s3623_s30  ;;  %v441_v17 = vsub.s32 2, %v4362_v31  ;;  %s318_s9 = scalar_lea.vmem [#allocation11], %s3177_s16 }
  0x8e   : > { %606 = vmatprep.subr.bf16.mxu1 %v3721_v10  ;;  %3386 = vmatprep.subr.bf16.mxu0 %v3740_v19  ;;  %v4368_v33 = vld [vmem:[%s366_s1] sm:$0x7]  ;;  %s361_s14 = scalar_lea.vmem [#allocation12], %s3176_s29  ;;  %s3257_s0 = sshll.u32 %s4049_s21, 6 }
  0x8f   : > { %v434_v35 = vrot.slane %v4368_v33, %v433_v32  ;;  %v438_v37 = vrot.slane %v4368_v33, %v437_v34  ;;  %s3016_s12 = sshll.u32 %s361_s14, 4  ;;  %s4882_s17 = scalar_lea.hbm %s4937_s5, %s3257_s0  ;;  %s4877_s12 = int_to_ptr.vmem [resolvable:$true] %s3016_s12 }
  0x90   : > { %s3001_s21 = scalar_lea.sflag [#allocation8], %s4303_s23  ;;  %s3971_s11 = scalar_lea.vmem %s4877_s12, 512 }
  0x91   : > { %607 = vmatpush1.bf16.msra.mxu1 %v3723_v11  ;;  %3387 = vmatpush3.bf16.msra.mxu0 %v3740_v19  ;;  %p3972_p6 = scmp.ne.s32.totalorder %s4877_s12, %s3971_s11  ;;  %p4961_p12 = scmp.ne.s32.totalorder %s4951_s6, 0 }
  0x92   : > { %608 = vmatprep.subr.bf16.mxu1 %v3724_v12  ;;  %3388 = vmatprep.subr.bf16.mxu0 %v3741_v25  ;;  %s4073_s24 = smov [#allocation12]  }
  0x93   : > { %p3973_p4 = pnand %p3972_p6, %p4961_p12  ;;  %s3975_s30 = sshll.u32 %s4073_s24, 4  ;;  %s3976_s30 = int_to_ptr.vmem [resolvable:$false] %s3975_s30 }
  0x94   : > { %s3977_s13 = scalar_lea.vmem %s3976_s30, 1024  ;;  %p3978_p11 = scmp.lt.s32.totalorder %s4877_s12, %s3976_s30 }
  0x95   : > { %609 = vmatpush1.bf16.msra.mxu1 %v3726_v15  ;;  %3389 = vmatpush3.bf16.msra.mxu0 %v3741_v25  ;;  %p3974_p9 = pneg %p3973_p4  ;;  %p3979_p10 = scmp.lt.s32.totalorder %s3977_s13, %s3971_s11 }
  0x96   : > { %610 = vmatprep.subr.bf16.mxu1 %v3727_v16  ;;  %3390 = vmatprep.subr.bf16.mxu0 %v3742_v26 }
  0x97   : > { %p3980_p13 = por %p3979_p10, %p3978_p11 }
  0x99   : > { %611 = vmatpush1.bf16.msra.mxu1 %v3729_v18  ;;  %3391 = vmatpush3.bf16.msra.mxu0 %v3742_v26  ;;  %p3981_p8 = pnand %p3980_p13, %p3974_p9 }
  0x9a   : > { %612 = vmatprep.subr.bf16.mxu1 %v3730_v20  ;;  %3392 = vmatprep.subr.bf16.mxu0 %v3743_v27  ;;  %v442_v20 = vrot.slane %v4368_v33, %v441_v17 }
  0x9d   : > { %613 = vmatpush1.bf16.msra.mxu1 %v3732_v21  ;;  %3393 = vmatpush3.bf16.msra.mxu0 %v3743_v27 }
  0x9e   : > { %3404 = vmatprep.subr.bf16.mxu1 %v4068_v29  ;;  %3394 = vmatprep.subr.bf16.mxu0 %v3744_v28 }
  0xa0   : > { %631 = vmatmul.mubr.bf16.vlgmr.msra.gmra.mrb[0].mxu1 %v3733_v9 }
  0xa1   : > { %640 = vmatprep.mubr.bf16.mxu1 %v4067_v0  ;;  %3395 = vmatpush3.bf16.msra.mxu0 %v3744_v28 }
  0xa2   : > { %3416 = vmatprep.subr.bf16.mxu0 %v4068_v29 }
  0xa4   : > { %3397 = vmatmul.mubr.bf16.vlgmr.msra.gmra.mrb[0].mxu0 %v3734_v22 }
  0xa5   : > { %3400 = vmatprep.mubr.bf16.mxu0 %v3735_v23 }
  0xa8   : > { %641 = vmatmul.mubr.bf16.gmra.mrb[4].mxu1 %v3734_v22 }
  0xa9   : > { %650 = vmatprep.mubr.bf16.mxu1 %v4067_v0 }
  0xac   : > { %3401 = vmatmul.mubr.bf16.gmra.mrb[4].mxu0 %v3736_v24 }
  0xad   : > { %3418 = vmatprep.mubr.msk.bf16.mxu0 %vm4069_vm0, %v4068_v29 }
  0xb0   : > { %651 = vmatmul.mubr.bf16.gmra.mrb[8].mxu1 %v3735_v23 }
  0xb1   : > { %660 = vmatprep.mubr.bf16.mxu1 %v4067_v0 }
  0xb8   : > { %661 = vmatmul.mubr.bf16.gmra.mrb[12].mxu1 %v3736_v24 }
  0xb9   : > { %3406 = vmatprep.mubr.msk.bf16.mxu1 %vm4069_vm0, %v4068_v29 }
 0x173   : > { %v632_v36 = vpop.f32.mrb[0].mxu1 }
 0x174   : > { %v634_v38 = vpop.f32.mrb[1].mxu1  ;;  %v633_v40 = vadd.f32 %v632_v36, %v434_v35 }
 0x175   : > { %v636_v39 = vpop.f32.mrb[2].mxu1  ;;  %v635_v43 = vadd.f32 %v634_v38, %v438_v37 }
 0x176   : > { %v637_v41 = vadd.f32 %v636_v39, %v434_v35  ;;  %v638_v42 = vpop.f32.mrb[3].mxu1 }
 0x177   : > { %v639_v44 = vadd.f32 %v638_v42, %v438_v37  ;;  %v3398_v18 = vpop.f32.mrb[0].mxu0 }
 0x178   : > { %v4373_v45 = vpack.c.bf16 %v637_v41, %v633_v40  ;;  %v705_v19 = vpop.f32.mrb[1].mxu0  ;;  %v714_v23 = vadd.f32 %v3398_v18, %v442_v20 }
 0x179   : > { %v4375_v46 = vpack.c.bf16 %v639_v44, %v635_v43  ;;  %v3399_v21 = vpop.f32.mrb[2].mxu0  ;;  %v706_v24 = vadd.f32 %v705_v19, %v442_v20 }
 0x17a   : > { %v708_v22 = vpop.f32.mrb[3].mxu0  ;;  %v717_v25 = vadd.f32 %v3399_v21, %v442_v20 }
 0x17b   : > { %v642_v47 = vpop.f32.mrb[4].mxu1  ;;  %v777_v48 = vsel %vm772_vm1, %v4375_v46, 0  ;;  %v709_v26 = vadd.f32 %v708_v22, %v442_v20 }
 0x17c   : > { %v644_v49 = vpop.f32.mrb[5].mxu1  ;;  %3405 = vmatpush3.bf16.xpose.msra.mxu1 %v777_v48  ;;  %v643_v51 = vadd.f32 %v642_v47, %v434_v35  ;;  %v4419_v27 = vpack.c.bf16 %v717_v25, %v714_v23 }
 0x17d   : > { %v646_v50 = vpop.f32.mrb[6].mxu1  ;;  %3410 = vmatprep.subr.bf16.mxu1 %v4068_v29  ;;  %v645_v54 = vadd.f32 %v644_v49, %v438_v37  ;;  %v4421_v28 = vpack.c.bf16 %v709_v26, %v706_v24 }
 0x17e   : > { %v647_v52 = vadd.f32 %v646_v50, %v434_v35  ;;  %v648_v53 = vpop.f32.mrb[7].mxu1 }
 0x17f   : > { %v649_v55 = vadd.f32 %v648_v53, %v438_v37  ;;  %v3402_v30 = vpop.f32.mrb[4].mxu0 }
 0x180   : > { %v4380_v56 = vpack.c.bf16 %v647_v52, %v643_v51  ;;  %v721_v31 = vpop.f32.mrb[5].mxu0  ;;  %v730_v34 = vadd.f32 %v3402_v30, %v442_v20 }
 0x181   : > { %v4382_v57 = vpack.c.bf16 %v649_v55, %v645_v54  ;;  %v3403_v32 = vpop.f32.mrb[6].mxu0 }
 0x182   : > { %v724_v33 = vpop.f32.mrb[7].mxu0  ;;  %v733_v36 = vadd.f32 %v3403_v32, %v442_v20 }
 0x183   : > { %v652_v58 = vpop.f32.mrb[8].mxu1  ;;  %3407 = vmatmul.mubr.msk.bf16.vlgmr.msra.gmra.mrb[16].mxu1 %vm772_vm1, %v4373_v45  ;;  %v824_v59 = vsel %vm772_vm1, %v4382_v57, 0 }
 0x184   : > { %v654_v60 = vpop.f32.mrb[9].mxu1  ;;  %3411 = vmatpush3.bf16.xpose.msra.mxu1 %v824_v59  ;;  %3412 = vmatprep.mubr.msk.bf16.mxu1 %vm4069_vm0, %v4068_v29  ;;  %v653_v62 = vadd.f32 %v652_v58, %v434_v35  ;;  %v4427_v38 = vpack.c.bf16 %v733_v36, %v730_v34 }
 0x185   : > { %v656_v61 = vpop.f32.mrb[10].mxu1  ;;  %3422 = vmatprep.subr.bf16.mxu1 %v4068_v29  ;;  %v655_v1 = vadd.f32 %v654_v60, %v438_v37 }
 0x186   : > { %v657_v63 = vadd.f32 %v656_v61, %v434_v35  ;;  %v658_v0 = vpop.f32.mrb[11].mxu1 }
 0x187   : > { %v659_v2 = vadd.f32 %v658_v0, %v438_v37 }
 0x188   : > { %v4391_v3 = vpack.c.bf16 %v657_v63, %v653_v62 }
 0x189   : > { %v4393_v4 = vpack.c.bf16 %v659_v2, %v655_v1 }
 0x18b   : > { %v662_v5 = vpop.f32.mrb[12].mxu1  ;;  %3413 = vmatmul.mubr.msk.bf16.vlgmr.msra.gmra.mrb[20].mxu1 %vm772_vm1, %v4380_v56  ;;  %v871_v6 = vsel %vm772_vm1, %v4393_v4, 0 }
 0x18c   : > { %v663_v7 = vadd.f32 %v662_v5, %v434_v35  ;;  %v664_v8 = vpop.f32.mrb[13].mxu1  ;;  %3417 = vmatpush3.bf16.xpose.msra.mxu0 %v871_v6  ;;  %3424 = vmatprep.mubr.msk.bf16.mxu1 %vm4069_vm0, %v4068_v29 }
 0x18d   : > { %v665_v9 = vadd.f32 %v664_v8, %v438_v37  ;;  %v666_v10 = vpop.f32.mrb[14].mxu1  ;;  %3428 = vmatprep.subr.bf16.mxu0 %v4068_v29 }
 0x18e   : > { %v667_v11 = vadd.f32 %v666_v10, %v434_v35  ;;  %v668_v12 = vpop.f32.mrb[15].mxu1  ;;  %v722_v35 = vadd.f32 %v721_v31, %v442_v20 }
 0x18f   : > { %v669_v13 = vadd.f32 %v668_v12, %v438_v37  ;;  %v725_v37 = vadd.f32 %v724_v33, %v442_v20 }
 0x190   : > { %v4402_v14 = vpack.c.bf16 %v667_v11, %v663_v7 }
 0x191   : > { %v4404_v15 = vpack.c.bf16 %v669_v13, %v665_v9  ;;  %v4429_v39 = vpack.c.bf16 %v725_v37, %v722_v35 }
 0x193   : > { %3419 = vmatmul.mubr.msk.bf16.vlgmr.msra.gmra.mrb[8].mxu0 %vm772_vm1, %v4391_v3  ;;  %v918_v16 = vsel %vm772_vm1, %v4404_v15, 0 }
 0x194   : > { %3423 = vmatpush3.bf16.xpose.msra.mxu1 %v918_v16  ;;  %3430 = vmatprep.mubr.msk.bf16.mxu0 %vm4069_vm0, %v4068_v29 }
 0x195   : > { %3434 = vmatprep.subr.bf16.mxu1 %v4068_v29  ;;  %3429 = vmatpush3.bf16.msra.mxu0 %v4421_v28 }
 0x196   : > { %3440 = vmatprep.subr.bf16.mxu0 %v4068_v29 }
 0x19b   : > { %3425 = vmatmul.mubr.msk.bf16.vlgmr.msra.gmra.mrb[24].mxu1 %vm772_vm1, %v4402_v14 }
 0x19c   : > { %3436 = vmatprep.mubr.msk.bf16.mxu1 %vm4069_vm0, %v4068_v29  ;;  %3435 = vmatpush3.bf16.msra.mxu1 %v4419_v27 }
 0x19d   : > { %3446 = vmatprep.subr.bf16.mxu1 %v4068_v29 }
 0x256   : > { %v813_v40 = vpop.f32.mrb[16].mxu1 }
 0x257   : > { %v3408_v41 = vpop.f32.mrb[17].mxu1  ;;  %v962_v42 = vsel %vm961_vm2, %v813_v40, -inf }
 0x258   : > { %963 = vmax.xlane.f32.xlu0 %v962_v42  ;;  %v816_v43 = vpop.f32.mrb[18].mxu1 }
 0x259   : > { %v3409_v44 = vpop.f32.mrb[19].mxu1  ;;  %v965_v47 = vsel %vm961_vm2, %v816_v43, -inf }
 0x25c   : > { %966 = vmax.xlane.f32.xlu0 %v965_v47 }
 0x25e   : > { %v860_v48 = vpop.f32.mrb[20].mxu1 }
 0x25f   : > { %v3414_v49 = vpop.f32.mrb[21].mxu1  ;;  %v968_v50 = vsel %vm961_vm2, %v860_v48, -inf }
 0x260   : > { %969 = vmax.xlane.f32.xlu1 %v968_v50  ;;  %v863_v51 = vpop.f32.mrb[22].mxu1 }
 0x261   : > { %v3415_v52 = vpop.f32.mrb[23].mxu1  ;;  %v971_v53 = vsel %vm961_vm2, %v863_v51, -inf }
 0x264   : > { %972 = vmax.xlane.f32.xlu1 %v971_v53 }
 0x266   : > { %v907_v54 = vpop.f32.mrb[8].mxu0 }
 0x267   : > { %v3420_v55 = vpop.f32.mrb[9].mxu0  ;;  %v974_v58 = vsel %vm961_vm2, %v907_v54, -inf }
 0x268   : > { %v910_v59 = vpop.f32.mrb[10].mxu0  ;;  %975 = vmax.xlane.f32.xlu0 %v974_v58 }
 0x269   : > { %v3421_v60 = vpop.f32.mrb[11].mxu0  ;;  %v977_v61 = vsel %vm961_vm2, %v910_v59, -inf }
 0x26a   : > { %978 = vmax.xlane.f32.xlu1 %v977_v61 }
 0x26e   : > { %v954_v62 = vpop.f32.mrb[24].mxu1 }
 0x26f   : > { %v3426_v63 = vpop.f32.mrb[25].mxu1  ;;  %v980_v0 = vsel %vm961_vm2, %v954_v62, -inf }
 0x270   : > { %981 = vmax.xlane.f32.xlu0 %v980_v0  ;;  %v957_v1 = vpop.f32.mrb[26].mxu1 }
 0x271   : > { %v983_v2 = vsel %vm961_vm2, %v957_v1, -inf  ;;  %v3427_v5 = vpop.f32.mrb[27].mxu1 }
 0x272   : > { %984 = vmax.xlane.f32.xlu1 %v983_v2 }
 0x2e5   : > { %v964_v6 = vpop.xlane.xlu0 %963 }
 0x2e6   : > { %v986_v7 = vsub.f32 %v813_v40, %v964_v6 }
 0x2e8   : > { %v994_v8 = vmul.f32 1.442695, %v986_v7 }
 0x2e9   : > { %v967_v9 = vpop.xlane.xlu0 %966 }
 0x2ea   : > { %3753 = vpow2.f32 %v994_v8  ;;  %v987_v10 = vsub.f32 %v816_v43, %v967_v9 }
 0x2ec   : > { %v996_v11 = vmul.f32 1.442695, %v987_v10 }
 0x2ed   : > { %v970_v12 = vpop.xlane.xlu1 %969 }
 0x2ee   : > { %3755 = vpow2.f32 %v996_v11  ;;  %v988_v13 = vsub.f32 %v860_v48, %v970_v12 }
 0x2f0   : > { %v998_v16 = vmul.f32 1.442695, %v988_v13 }
 0x2f1   : > { %v973_v17 = vpop.xlane.xlu1 %972 }
 0x2f2   : > { %3757 = vpow2.f32 %v998_v16  ;;  %v989_v18 = vsub.f32 %v863_v51, %v973_v17 }
 0x2f4   : > { %v3754_v19 = vpop.eup %3753  ;;  %v1000_v20 = vmul.f32 1.442695, %v989_v18 }
 0x2f5   : > { %v976_v21 = vpop.xlane.xlu0 %975  ;;  %v1010_v22 = vsel %vm961_vm2, %v3754_v19, 0.0 }
 0x2f6   : > { %3759 = vpow2.f32 %v1000_v20  ;;  %v990_v23 = vsub.f32 %v907_v54, %v976_v21  ;;  %1011 = vadd.xlane.f32.xlu0 %v1010_v22 }
 0x2f7   : > { %v979_v24 = vpop.xlane.xlu1 %978 }
 0x2f8   : > { %v3756_v25 = vpop.eup %3755  ;;  %v1002_v26 = vmul.f32 1.442695, %v990_v23  ;;  %v991_v30 = vsub.f32 %v910_v59, %v979_v24 }
 0x2f9   : > { %v1013_v31 = vsel %vm961_vm2, %v3756_v25, 0.0 }
 0x2fa   : > { %3761 = vpow2.f32 %v1002_v26  ;;  %v1004_v32 = vmul.f32 1.442695, %v991_v30  ;;  %1014 = vadd.xlane.f32.xlu1 %v1013_v31 }
 0x2fc   : > { %v3758_v33 = vpop.eup %3757  ;;  %3763 = vpow2.f32 %v1004_v32 }
 0x2fd   : > { %v982_v34 = vpop.xlane.xlu0 %981  ;;  %v1016_v35 = vsel %vm961_vm2, %v3758_v33, 0.0 }
 0x2fe   : > { %v992_v36 = vsub.f32 %v954_v62, %v982_v34  ;;  %1017 = vadd.xlane.f32.xlu0 %v1016_v35 }
 0x2ff   : > { %v985_v50 = vpop.xlane.xlu1 %984 }
 0x300   : > { %v3760_v37 = vpop.eup %3759  ;;  %v1006_v40 = vmul.f32 1.442695, %v992_v36  ;;  %v993_v51 = vsub.f32 %v957_v1, %v985_v50 }
 0x301   : > { %v1019_v41 = vsel %vm961_vm2, %v3760_v37, 0.0 }
 0x302   : > { %3765 = vpow2.f32 %v1006_v40  ;;  %1020 = vadd.xlane.f32.xlu1 %v1019_v41  ;;  %v1008_v52 = vmul.f32 1.442695, %v993_v51 }
 0x304   : > { %v3762_v42 = vpop.eup %3761  ;;  %3767 = vpow2.f32 %v1008_v52 }
 0x305   : > { %v1022_v43 = vsel %vm961_vm2, %v3762_v42, 0.0 }
 0x306   : > { %v3764_v44 = vpop.eup %3763  ;;  %1023 = vadd.xlane.f32.xlu0 %v1022_v43 }
 0x307   : > { %v1025_v47 = vsel %vm961_vm2, %v3764_v44, 0.0 }
 0x308   : > { %1026 = vadd.xlane.f32.xlu1 %v1025_v47 }
 0x30c   : > { %v4445_v48 = vpop.eup %3765 }
 0x30d   : > { %v1028_v49 = vsel %vm961_vm2, %v4445_v48, 0.0 }
 0x30e   : > { %1029 = vadd.xlane.f32.xlu0 %v1028_v49  ;;  %v4459_v53 = vpop.eup %3767 }
 0x30f   : > { %v1031_v54 = vsel %vm961_vm2, %v4459_v53, 0.0 }
 0x319   : > { %1307 = vrot.lane.b32.xlu1 %v4382_v57, %s4070_s7 }
 0x31d   : > { %1251 = vrot.lane.b32.xlu1 %v4373_v45, %s4070_s7 }
 0x324   : > { %1254 = vrot.lane.b32.xlu0 %v4375_v46, %s4070_s7 }
 0x328   : > { %1304 = vrot.lane.b32.xlu0 %v4380_v56, %s4070_s7 }
 0x32c   : > { %1357 = vrot.lane.b32.xlu0 %v4391_v3, %s4070_s7 }
 0x341   : > { %1032 = vadd.xlane.f32.xlu1 %v1031_v54 }
 0x352   : > { %1360 = vrot.lane.b32.xlu1 %v4393_v4, %s4070_s7 }
 0x356   : > { %1413 = vrot.lane.b32.xlu1 %v4404_v15, %s4070_s7 }
 0x35a   : > { %1410 = vrot.lane.b32.xlu1 %v4402_v14, %s4070_s7 }
 0x383   : > { %v1012_v55 = vpop.xlane.xlu0 %1011 }
 0x384   : > { %3769 = vrcp.f32 %v1012_v55 }
 0x387   : > { %v1015_v58 = vpop.xlane.xlu1 %1014 }
 0x388   : > { %3771 = vrcp.f32 %v1015_v58 }
 0x38b   : > { %v1018_v59 = vpop.xlane.xlu0 %1017 }
 0x38c   : > { %3773 = vrcp.f32 %v1018_v59 }
 0x38e   : > { %v3770_v61 = vpop.eup %3769 }
 0x38f   : > { %v1021_v60 = vpop.xlane.xlu1 %1020  ;;  %v1042_v63 = vmul.f32 %v3770_v61, %v3754_v19 }
 0x390   : > { %3775 = vrcp.f32 %v1021_v60 }
 0x392   : > { %v3772_v62 = vpop.eup %3771 }
 0x393   : > { %v1043_v0 = vmul.f32 %v3772_v62, %v3756_v25  ;;  %v1024_v1 = vpop.xlane.xlu0 %1023 }
 0x394   : > { %3777 = vrcp.f32 %v1024_v1 }
 0x395   : > { %v1027_v2 = vpop.xlane.xlu1 %1026  ;;  %v1050_v5 = vpack.c.bf16 %v1043_v0, %v1042_v63 }
 0x396   : > { %3779 = vrcp.f32 %v1027_v2  ;;  %v3774_v6 = vpop.eup %3773 }
 0x397   : > { %3431 = vmatmul.mubr.msk.bf16.vlgmr.msra.gmra.mrb[12].mxu0 %vm961_vm2, %v1050_v5  ;;  %v1044_v8 = vmul.f32 %v3774_v6, %v3758_v33 }
 0x398   : > { %3441 = vmatpush3.bf16.msra.mxu0 %v4429_v39  ;;  %3442 = vmatprep.mubr.msk.bf16.mxu0 %vm4069_vm0, %v4068_v29 }
 0x399   : > { %3452 = vmatprep.subr.bf16.mxu0 %v4068_v29  ;;  %v1308_v21 = vpop.permute.xlu1 %1307 }
 0x39a   : > { %v3776_v7 = vpop.eup %3775  ;;  %v1313_v36 = vsel %vm772_vm1, %v1308_v21, 0 }
 0x39b   : > { %v1045_v9 = vmul.f32 %v3776_v7, %v3760_v37  ;;  %v1030_v10 = vpop.xlane.xlu0 %1029 }
 0x39c   : > { %3781 = vrcp.f32 %v1030_v10 }
 0x39d   : > { %v1051_v11 = vpack.c.bf16 %v1045_v9, %v1044_v8  ;;  %v1252_v22 = vpop.permute.xlu1 %1251 }
 0x39e   : > { %v3778_v12 = vpop.eup %3777 }
 0x39f   : > { %3437 = vmatmul.mubr.msk.bf16.vlgmr.msra.gmra.mrb[28].mxu1 %vm961_vm2, %v1051_v11  ;;  %v1046_v16 = vmul.f32 %v3778_v12, %v3762_v42  ;;  %v1255_v18 = vpop.permute.xlu0 %1254 }
 0x3a0   : > { %v3780_v13 = vpop.eup %3779  ;;  %3447 = vmatpush3.bf16.msra.mxu1 %v4427_v38  ;;  %3448 = vmatprep.mubr.msk.bf16.mxu1 %vm4069_vm0, %v4068_v29  ;;  %v1260_v20 = vsel %vm772_vm1, %v1255_v18, 0 }
 0x3a1   : > { %v1047_v17 = vmul.f32 %v3780_v13, %v3764_v44  ;;  %3458 = vmatprep.subr.bf16.mxu1 %v4068_v29 }
 0x3a3   : > { %v1052_v19 = vpack.c.bf16 %v1047_v17, %v1046_v16  ;;  %v1305_v26 = vpop.permute.xlu0 %1304 }
 0x3a5   : > { %3443 = vmatmul.mubr.msk.bf16.vlgmr.msra.gmra.mrb[16].mxu0 %vm961_vm2, %v1052_v19 }
 0x3a6   : > { %3453 = vmatpush3.bf16.xpose.msra.mxu0 %v1260_v20  ;;  %3454 = vmatprep.mubr.msk.bf16.mxu0 %vm4069_vm0, %v4068_v29  ;;  %v3782_v30 = vpop.eup %3781 }
 0x3a7   : > { %3464 = vmatprep.subr.bf16.mxu0 %v4068_v29  ;;  %v1048_v32 = vmul.f32 %v3782_v30, %v4445_v48  ;;  %v1358_v33 = vpop.permute.xlu0 %1357 }
 0x3ad   : > { %3455 = vmatmul.mubr.msk.bf16.vlgmr.msra.gmra.mrb[20].mxu0 %vm772_vm1, %v1252_v22 }
 0x3ae   : > { %3466 = vmatprep.mubr.msk.bf16.mxu0 %vm4069_vm0, %v4068_v29 }
 0x3ce   : > { %v1033_v23 = vpop.xlane.xlu1 %1032 }
 0x3cf   : > { %3783 = vrcp.f32 %v1033_v23 }
 0x3d2   : > { %v1361_v24 = vpop.permute.xlu1 %1360 }
 0x3d3   : > { %v1366_v25 = vsel %vm772_vm1, %v1361_v24, 0 }
 0x3d4   : > { %3465 = vmatpush3.bf16.xpose.msra.mxu0 %v1366_v25 }
 0x3d5   : > { %3476 = vmatprep.subr.bf16.mxu0 %v4068_v29 }
 0x3d6   : > { %v1414_v37 = vpop.permute.xlu1 %1413 }
 0x3d7   : > { %v1419_v40 = vsel %vm772_vm1, %v1414_v37, 0 }
 0x3d9   : > { %v3784_v31 = vpop.eup %3783 }
 0x3da   : > { %v1049_v34 = vmul.f32 %v3784_v31, %v4459_v53  ;;  %v1411_v41 = vpop.permute.xlu1 %1410 }
 0x3db   : > { %3467 = vmatmul.mubr.msk.bf16.vlgmr.msra.gmra.mrb[24].mxu0 %vm772_vm1, %v1358_v33 }
 0x3dc   : > { %v1053_v35 = vpack.c.bf16 %v1049_v34, %v1048_v32  ;;  %3478 = vmatprep.mubr.msk.bf16.mxu0 %vm4069_vm0, %v4068_v29 }
 0x3de   : > { %3449 = vmatmul.mubr.msk.bf16.vlgmr.msra.gmra.mrb[32].mxu1 %vm961_vm2, %v1053_v35 }
 0x3df   : > { %3459 = vmatpush3.bf16.xpose.msra.mxu1 %v1313_v36  ;;  %3460 = vmatprep.mubr.msk.bf16.mxu1 %vm4069_vm0, %v4068_v29 }
 0x3e0   : > { %3470 = vmatprep.subr.bf16.mxu1 %v4068_v29 }
 0x3e6   : > { %3461 = vmatmul.mubr.msk.bf16.vlgmr.msra.gmra.mrb[36].mxu1 %vm772_vm1, %v1305_v26 }
 0x3e7   : > { %3471 = vmatpush3.bf16.xpose.msra.mxu1 %v1419_v40  ;;  %3472 = vmatprep.mubr.msk.bf16.mxu1 %vm4069_vm0, %v4068_v29 }
 0x3e8   : > { %3482 = vmatprep.subr.bf16.mxu1 %v4068_v29 }
 0x3ee   : > { %3473 = vmatmul.mubr.msk.bf16.vlgmr.msra.gmra.mrb[40].mxu1 %vm772_vm1, %v1411_v41 }
 0x3ef   : > { %3484 = vmatprep.mubr.msk.bf16.mxu1 %vm4069_vm0, %v4068_v29 }
 0x46a   : > { %v1091_v42 = vpop.f32.mrb[12].mxu0 }
 0x46b   : > { %v3432_v43 = vpop.f32.mrb[13].mxu0 }
 0x46c   : > { %v1094_v44 = vpop.f32.mrb[14].mxu0 }
 0x46d   : > { %v1230_v47 = vpack.c.bf16 %v1094_v44, %v1091_v42  ;;  %v3433_v48 = vpop.f32.mrb[15].mxu0 }
 0x46f   : > { %1234 = vst.msk [vmem:[#allocation5] sm:$0xff] %vm772_vm1, %v1230_v47 }
 0x472   : > { %v1135_v49 = vpop.f32.mrb[28].mxu1 }
 0x473   : > { %v3438_v50 = vpop.f32.mrb[29].mxu1 }
 0x474   : > { %v1138_v51 = vpop.f32.mrb[30].mxu1 }
 0x475   : > { %v1231_v52 = vpack.c.bf16 %v1138_v51, %v1135_v49  ;;  %v3439_v53 = vpop.f32.mrb[31].mxu1 }
 0x477   : > { %1235 = vst.msk [vmem:[#allocation5 + $0x8] sm:$0xff] %vm772_vm1, %v1231_v52 }
 0x478   : > { %v1179_v54 = vpop.f32.mrb[16].mxu0 }
 0x479   : > { %v3444_v55 = vpop.f32.mrb[17].mxu0 }
 0x47a   : > { %v1182_v58 = vpop.f32.mrb[18].mxu0 }
 0x47b   : > { %v1232_v59 = vpack.c.bf16 %v1182_v58, %v1179_v54  ;;  %v3445_v60 = vpop.f32.mrb[19].mxu0 }
 0x47d   : > { %1236 = vst.msk [vmem:[#allocation5 + $0x10] sm:$0xff] %vm772_vm1, %v1232_v59 }
 0x480   : > { %v1296_v61 = vpop.f32.mrb[20].mxu0 }
 0x481   : > { %v3456_v62 = vpop.f32.mrb[21].mxu0  ;;  %v1462_v63 = vsel %vm961_vm2, %v1296_v61, -inf }
 0x482   : > { %1463 = vmax.xlane.f32.xlu0 %v1462_v63  ;;  %v1299_v0 = vpop.f32.mrb[22].mxu0 }
 0x483   : > { %v3457_v1 = vpop.f32.mrb[23].mxu0  ;;  %v1465_v2 = vsel %vm961_vm2, %v1299_v0, -inf }
 0x484   : > { %1466 = vmax.xlane.f32.xlu1 %v1465_v2 }
 0x4ae   : > { %v4512_v5 = vpop.f32.mrb[24].mxu0 }
 0x4af   : > { %v3468_v6 = vpop.f32.mrb[25].mxu0  ;;  %v1474_v25 = vsel %vm961_vm2, %v4512_v5, -inf }
 0x4b0   : > { %v1405_v7 = vpop.f32.mrb[26].mxu0 }
 0x4b1   : > { %v1223_v8 = vpop.f32.mrb[32].mxu1  ;;  %v3469_v9 = vpop.f32.mrb[27].mxu0  ;;  %v1477_v10 = vsel %vm961_vm2, %v1405_v7, -inf }
 0x4b2   : > { %1478 = vmax.xlane.f32.xlu1 %v1477_v10  ;;  %v3450_v11 = vpop.f32.mrb[33].mxu1 }
 0x4b3   : > { %v1226_v12 = vpop.f32.mrb[34].mxu1 }
 0x4b4   : > { %v1233_v13 = vpack.c.bf16 %v1226_v12, %v1223_v8  ;;  %v3451_v16 = vpop.f32.mrb[35].mxu1 }
 0x4b6   : > { %1237 = vst.msk [vmem:[#allocation5 + $0x18] sm:$0xff] %vm772_vm1, %v1233_v13 }
 0x4b9   : > { %v1349_v17 = vpop.f32.mrb[36].mxu1 }
 0x4ba   : > { %v3462_v18 = vpop.f32.mrb[37].mxu1  ;;  %v1468_v19 = vsel %vm961_vm2, %v1349_v17, -inf }
 0x4bb   : > { %1469 = vmax.xlane.f32.xlu0 %v1468_v19  ;;  %v1352_v20 = vpop.f32.mrb[38].mxu1 }
 0x4bc   : > { %v3463_v21 = vpop.f32.mrb[39].mxu1  ;;  %v1471_v22 = vsel %vm961_vm2, %v1352_v20, -inf }
 0x4bf   : > { %1472 = vmax.xlane.f32.xlu0 %v1471_v22 }
 0x4c1   : > { %v1455_v23 = vpop.f32.mrb[40].mxu1 }
 0x4c2   : > { %v3474_v24 = vpop.f32.mrb[41].mxu1  ;;  %v1480_v31 = vsel %vm961_vm2, %v1455_v23, -inf }
 0x4c3   : > { %1603 = vrot.lane.b32.xlu1 %v4419_v27, %s4070_s7  ;;  %1475 = vmax.xlane.f32.xlu0 %v1474_v25  ;;  %v4522_v26 = vpop.f32.mrb[42].mxu1 }
 0x4c4   : > { %v3475_v30 = vpop.f32.mrb[43].mxu1  ;;  %v1483_v32 = vsel %vm961_vm2, %v4522_v26, -inf }
 0x4c7   : > { %1651 = vrot.lane.b32.xlu1 %v4429_v39, %s4070_s7  ;;  %1481 = vmax.xlane.f32.xlu0 %v1480_v31 }
 0x4dd   : > { %1555 = vrot.lane.b32.xlu0 %v4421_v28, %s4070_s7 }
 0x4eb   : > { %1484 = vmax.xlane.f32.xlu1 %v1483_v32 }
 0x4fc   : > { %1699 = vrot.lane.b32.xlu1 %v4427_v38, %s4070_s7 }
 0x50f   : > { %v1464_v33 = vpop.xlane.xlu0 %1463 }
 0x510   : > { %v1486_v34 = vsub.f32 %v1296_v61, %v1464_v33 }
 0x511   : > { %v1467_v35 = vpop.xlane.xlu1 %1466 }
 0x512   : > { %v1494_v36 = vmul.f32 1.442695, %v1486_v34  ;;  %v1487_v37 = vsub.f32 %v1299_v0, %v1467_v35 }
 0x514   : > { %3785 = vpow2.f32 %v1494_v36  ;;  %v1496_v40 = vmul.f32 1.442695, %v1487_v37 }
 0x516   : > { %3787 = vpow2.f32 %v1496_v40 }
 0x51e   : > { %v4533_v41 = vpop.eup %3785 }
 0x51f   : > { %v1510_v42 = vsel %vm961_vm2, %v4533_v41, 0.0 }
 0x520   : > { %v4537_v43 = vpop.eup %3787  ;;  %1511 = vadd.xlane.f32.xlu0 %v1510_v42 }
 0x521   : > { %v1513_v44 = vsel %vm961_vm2, %v4537_v43, 0.0 }
 0x522   : > { %1514 = vadd.xlane.f32.xlu1 %v1513_v44 }
 0x53f   : > { %v1479_v47 = vpop.xlane.xlu1 %1478 }
 0x540   : > { %v1491_v51 = vsub.f32 %v1405_v7, %v1479_v47 }
 0x542   : > { %v1504_v55 = vmul.f32 1.442695, %v1491_v51 }
 0x543   : > { %v1604_v48 = vpop.permute.xlu1 %1603 }
 0x544   : > { %3483 = vmatpush3.bf16.msra.mxu1 %v1604_v48 }
 0x545   : > { %3494 = vmatprep.subr.bf16.mxu1 %v4068_v29 }
 0x547   : > { %v1652_v16 = vpop.permute.xlu1 %1651 }
 0x548   : > { %v1470_v49 = vpop.xlane.xlu0 %1469 }
 0x549   : > { %v1488_v50 = vsub.f32 %v1349_v17, %v1470_v49 }
 0x54b   : > { %v1498_v52 = vmul.f32 1.442695, %v1488_v50 }
 0x54c   : > { %v1473_v53 = vpop.xlane.xlu0 %1472 }
 0x54d   : > { %3789 = vpow2.f32 %v1498_v52  ;;  %v1489_v54 = vsub.f32 %v1352_v20, %v1473_v53 }
 0x54f   : > { %v1500_v58 = vmul.f32 1.442695, %v1489_v54 }
 0x550   : > { %v1476_v59 = vpop.xlane.xlu0 %1475 }
 0x551   : > { %3791 = vpow2.f32 %v1500_v58  ;;  %v1490_v60 = vsub.f32 %v4512_v5, %v1476_v59 }
 0x552   : > { %3793 = vpow2.f32 %v1504_v55 }
 0x553   : > { %v1502_v61 = vmul.f32 1.442695, %v1490_v60 }
 0x554   : > { %v1482_v62 = vpop.xlane.xlu0 %1481 }
 0x555   : > { %3795 = vpow2.f32 %v1502_v61  ;;  %v1492_v63 = vsub.f32 %v1455_v23, %v1482_v62 }
 0x557   : > { %v3790_v0 = vpop.eup %3789  ;;  %v1506_v1 = vmul.f32 1.442695, %v1492_v63 }
 0x558   : > { %v1556_v2 = vpop.permute.xlu0 %1555  ;;  %v1516_v6 = vsel %vm961_vm2, %v3790_v0, 0.0 }
 0x559   : > { %3797 = vpow2.f32 %v1506_v1  ;;  %1517 = vadd.xlane.f32.xlu0 %v1516_v6  ;;  %3477 = vmatpush3.bf16.msra.mxu0 %v1556_v2 }
 0x55a   : > { %3488 = vmatprep.subr.bf16.mxu0 %v4068_v29 }
 0x55b   : > { %v3792_v7 = vpop.eup %3791 }
 0x55c   : > { %v1519_v8 = vsel %vm961_vm2, %v3792_v7, 0.0  ;;  %v3794_v9 = vpop.eup %3793 }
 0x55d   : > { %1520 = vadd.xlane.f32.xlu1 %v1519_v8  ;;  %v1525_v11 = vsel %vm961_vm2, %v3794_v9, 0.0 }
 0x55f   : > { %v3796_v5 = vpop.eup %3795 }
 0x560   : > { %v1522_v10 = vsel %vm961_vm2, %v3796_v5, 0.0 }
 0x561   : > { %1523 = vadd.xlane.f32.xlu0 %v1522_v10  ;;  %1526 = vadd.xlane.f32.xlu1 %v1525_v11 }
 0x563   : > { %v4548_v12 = vpop.eup %3797 }
 0x564   : > { %v1528_v13 = vsel %vm961_vm2, %v4548_v12, 0.0 }
 0x565   : > { %1529 = vadd.xlane.f32.xlu0 %v1528_v13 }
 0x572   : > { %1840 = vrot.lane.b32.xlu1 %v4382_v57, %s4071_s25 }
 0x578   : > { %v1485_v17 = vpop.xlane.xlu1 %1484 }
 0x579   : > { %v1493_v18 = vsub.f32 %v4522_v26, %v1485_v17 }
 0x57b   : > { %1787 = vrot.lane.b32.xlu0 %v4375_v46, %s4071_s25  ;;  %v1508_v19 = vmul.f32 1.442695, %v1493_v18 }
 0x57c   : > { %v1700_v22 = vpop.permute.xlu1 %1699 }
 0x57d   : > { %3799 = vpow2.f32 %v1508_v19 }
 0x57f   : > { %1784 = vrot.lane.b32.xlu0 %v4373_v45, %s4071_s25 }
 0x583   : > { %1837 = vrot.lane.b32.xlu0 %v4380_v56, %s4071_s25 }
 0x587   : > { %1890 = vrot.lane.b32.xlu0 %v4391_v3, %s4071_s25  ;;  %v4563_v20 = vpop.eup %3799 }
 0x588   : > { %v1531_v21 = vsel %vm961_vm2, %v4563_v20, 0.0 }
 0x596   : > { %1532 = vadd.xlane.f32.xlu1 %v1531_v21 }
 0x5a7   : > { %1893 = vrot.lane.b32.xlu1 %v4393_v4, %s4071_s25 }
 0x5ab   : > { %1946 = vrot.lane.b32.xlu1 %v4404_v15, %s4071_s25 }
 0x5ad   : > { %v1512_v23 = vpop.xlane.xlu0 %1511 }
 0x5ae   : > { %3801 = vrcp.f32 %v1512_v23 }
 0x5af   : > { %1943 = vrot.lane.b32.xlu1 %v4402_v14, %s4071_s25  ;;  %v1515_v24 = vpop.xlane.xlu1 %1514 }
 0x5b0   : > { %3803 = vrcp.f32 %v1515_v24 }
 0x5b8   : > { %v3802_v25 = vpop.eup %3801 }
 0x5b9   : > { %v1542_v30 = vmul.f32 %v3802_v25, %v4533_v41 }
 0x5ba   : > { %v3804_v26 = vpop.eup %3803 }
 0x5bb   : > { %v1543_v31 = vmul.f32 %v3804_v26, %v4537_v43 }
 0x5bd   : > { %v1550_v32 = vpack.c.bf16 %v1543_v31, %v1542_v30 }
 0x5bf   : > { %3479 = vmatmul.mubr.msk.bf16.vlgmr.msra.gmra.mrb[28].mxu0 %vm961_vm2, %v1550_v32 }
 0x5c0   : > { %3489 = vmatpush3.bf16.msra.mxu0 %v1652_v16  ;;  %3490 = vmatprep.mubr.msk.bf16.mxu0 %vm4069_vm0, %v4068_v29 }
 0x5c1   : > { %3500 = vmatprep.subr.bf16.mxu0 %v4068_v29 }
 0x5e6   : > { %v1518_v33 = vpop.xlane.xlu0 %1517 }
 0x5e7   : > { %3805 = vrcp.f32 %v1518_v33 }
 0x5ea   : > { %v1521_v34 = vpop.xlane.xlu1 %1520 }
 0x5eb   : > { %3807 = vrcp.f32 %v1521_v34 }
 0x5ee   : > { %v1524_v35 = vpop.xlane.xlu0 %1523  ;;  %v1527_v36 = vpop.xlane.xlu1 %1526 }
 0x5ef   : > { %3809 = vrcp.f32 %v1524_v35 }
 0x5f0   : > { %3811 = vrcp.f32 %v1527_v36 }
 0x5f1   : > { %v3806_v37 = vpop.eup %3805 }
 0x5f2   : > { %v1544_v41 = vmul.f32 %v3806_v37, %v3790_v0  ;;  %v1530_v43 = vpop.xlane.xlu0 %1529  ;;  %v1841_v55 = vpop.permute.xlu1 %1840 }
 0x5f3   : > { %3813 = vrcp.f32 %v1530_v43 }
 0x5f5   : > { %v3808_v40 = vpop.eup %3807 }
 0x5f6   : > { %v1545_v42 = vmul.f32 %v3808_v40, %v3792_v7  ;;  %v1788_v51 = vpop.permute.xlu0 %1787  ;;  %v1846_v7 = vsel %vm772_vm1, %v1841_v55, 0 }
 0x5f7   : > { %v1793_v53 = vsel %vm772_vm1, %v1788_v51, 0 }
 0x5f8   : > { %v1551_v44 = vpack.c.bf16 %v1545_v42, %v1544_v41 }
 0x5f9   : > { %v3810_v47 = vpop.eup %3809 }
 0x5fa   : > { %v3812_v48 = vpop.eup %3811  ;;  %v1546_v49 = vmul.f32 %v3810_v47, %v3796_v5  ;;  %3485 = vmatmul.mubr.msk.bf16.vlgmr.msra.gmra.mrb[44].mxu1 %vm961_vm2, %v1551_v44  ;;  %v1785_v54 = vpop.permute.xlu0 %1784 }
 0x5fb   : > { %v1547_v50 = vmul.f32 %v3812_v48, %v3794_v9  ;;  %3495 = vmatpush3.bf16.msra.mxu1 %v1700_v22  ;;  %3496 = vmatprep.mubr.msk.bf16.mxu1 %vm4069_vm0, %v4068_v29 }
 0x5fc   : > { %3506 = vmatprep.subr.bf16.mxu1 %v4068_v29 }
 0x5fd   : > { %v1552_v52 = vpack.c.bf16 %v1547_v50, %v1546_v49  ;;  %v3814_v62 = vpop.eup %3813 }
 0x5fe   : > { %v1838_v61 = vpop.permute.xlu0 %1837  ;;  %v1548_v0 = vmul.f32 %v3814_v62, %v4548_v12 }
 0x5ff   : > { %3491 = vmatmul.mubr.msk.bf16.vlgmr.msra.gmra.mrb[32].mxu0 %vm961_vm2, %v1552_v52 }
 0x600   : > { %3501 = vmatpush3.bf16.xpose.msra.mxu0 %v1793_v53  ;;  %3502 = vmatprep.mubr.msk.bf16.mxu0 %vm4069_vm0, %v4068_v29 }
 0x601   : > { %3512 = vmatprep.subr.bf16.mxu0 %v4068_v29 }
 0x602   : > { %v1891_v1 = vpop.permute.xlu0 %1890 }
 0x607   : > { %3503 = vmatmul.mubr.msk.bf16.vlgmr.msra.gmra.mrb[36].mxu0 %vm772_vm1, %v1785_v54 }
 0x608   : > { %3514 = vmatprep.mubr.msk.bf16.mxu0 %vm4069_vm0, %v4068_v29 }
 0x623   : > { %v1533_v58 = vpop.xlane.xlu1 %1532 }
 0x624   : > { %3815 = vrcp.f32 %v1533_v58 }
 0x627   : > { %v1894_v59 = vpop.permute.xlu1 %1893 }
 0x628   : > { %v1899_v60 = vsel %vm772_vm1, %v1894_v59, 0 }
 0x629   : > { %3513 = vmatpush3.bf16.xpose.msra.mxu0 %v1899_v60 }
 0x62a   : > { %3524 = vmatprep.subr.bf16.mxu0 %v4068_v29 }
 0x62b   : > { %v1947_v8 = vpop.permute.xlu1 %1946 }
 0x62c   : > { %v1952_v9 = vsel %vm772_vm1, %v1947_v8, 0 }
 0x62e   : > { %v3816_v63 = vpop.eup %3815 }
 0x62f   : > { %v1549_v2 = vmul.f32 %v3816_v63, %v4563_v20  ;;  %v1944_v5 = vpop.permute.xlu1 %1943 }
 0x630   : > { %3515 = vmatmul.mubr.msk.bf16.vlgmr.msra.gmra.mrb[40].mxu0 %vm772_vm1, %v1891_v1 }
 0x631   : > { %v1553_v6 = vpack.c.bf16 %v1549_v2, %v1548_v0  ;;  %3526 = vmatprep.mubr.msk.bf16.mxu0 %vm4069_vm0, %v4068_v29 }
 0x633   : > { %3497 = vmatmul.mubr.msk.bf16.vlgmr.msra.gmra.mrb[48].mxu1 %vm961_vm2, %v1553_v6 }
 0x634   : > { %3507 = vmatpush3.bf16.xpose.msra.mxu1 %v1846_v7  ;;  %3508 = vmatprep.mubr.msk.bf16.mxu1 %vm4069_vm0, %v4068_v29 }
 0x635   : > { %3518 = vmatprep.subr.bf16.mxu1 %v4068_v29 }
 0x63b   : > { %3509 = vmatmul.mubr.msk.bf16.vlgmr.msra.gmra.mrb[52].mxu1 %vm772_vm1, %v1838_v61 }
 0x63c   : > { %3519 = vmatpush3.bf16.xpose.msra.mxu1 %v1952_v9  ;;  %3520 = vmatprep.mubr.msk.bf16.mxu1 %vm4069_vm0, %v4068_v29 }
 0x63d   : > { %3530 = vmatprep.subr.bf16.mxu1 %v4068_v29 }
 0x643   : > { %3521 = vmatmul.mubr.msk.bf16.vlgmr.msra.gmra.mrb[56].mxu1 %vm772_vm1, %v1944_v5 }
 0x644   : > { %3532 = vmatprep.mubr.msk.bf16.mxu1 %vm4069_vm0, %v4068_v29 }
 0x692   : > { %v4611_v10 = vpop.f32.mrb[28].mxu0 }
 0x693   : > { %v3480_v11 = vpop.f32.mrb[29].mxu0 }
 0x694   : > { %v4613_v12 = vpop.f32.mrb[30].mxu0 }
 0x695   : > { %v1746_v13 = vpack.c.bf16 %v4613_v12, %v4611_v10  ;;  %v3481_v16 = vpop.f32.mrb[31].mxu0 }
 0x6cd   : > { %v4617_v17 = vpop.f32.mrb[44].mxu1 }
 0x6ce   : > { %v3486_v18 = vpop.f32.mrb[45].mxu1 }
 0x6cf   : > { %v4619_v19 = vpop.f32.mrb[46].mxu1 }
 0x6d0   : > { %v1747_v20 = vpack.c.bf16 %v4619_v19, %v4617_v17  ;;  %v3487_v21 = vpop.f32.mrb[47].mxu1 }
 0x6d2   : > { %v4623_v22 = vpop.f32.mrb[32].mxu0 }
 0x6d3   : > { %v3492_v23 = vpop.f32.mrb[33].mxu0 }
 0x6d4   : > { %v4625_v24 = vpop.f32.mrb[34].mxu0 }
 0x6d5   : > { %v1748_v25 = vpack.c.bf16 %v4625_v24, %v4623_v22  ;;  %v3493_v26 = vpop.f32.mrb[35].mxu0 }
 0x6da   : > { %v1829_v30 = vpop.f32.mrb[36].mxu0 }
 0x6db   : > { %v3504_v31 = vpop.f32.mrb[37].mxu0  ;;  %v1995_v32 = vsel %vm961_vm2, %v1829_v30, -inf }
 0x6dc   : > { %1996 = vmax.xlane.f32.xlu0 %v1995_v32  ;;  %v1832_v33 = vpop.f32.mrb[38].mxu0 }
 0x6dd   : > { %v3505_v34 = vpop.f32.mrb[39].mxu0  ;;  %v1998_v35 = vsel %vm961_vm2, %v1832_v33, -inf }
 0x6de   : > { %1999 = vmax.xlane.f32.xlu1 %v1998_v35 }
 0x703   : > { %v4631_v36 = vpop.f32.mrb[40].mxu0 }
 0x704   : > { %v3516_v37 = vpop.f32.mrb[41].mxu0  ;;  %v2007_v60 = vsel %vm961_vm2, %v4631_v36, -inf }
 0x705   : > { %v1938_v40 = vpop.f32.mrb[42].mxu0 }
 0x706   : > { %v4633_v41 = vpop.f32.mrb[48].mxu1  ;;  %v3517_v42 = vpop.f32.mrb[43].mxu0  ;;  %v2010_v43 = vsel %vm961_vm2, %v1938_v40, -inf }
 0x707   : > { %2011 = vmax.xlane.f32.xlu1 %v2010_v43  ;;  %v3498_v44 = vpop.f32.mrb[49].mxu1 }
 0x708   : > { %v4636_v47 = vpop.f32.mrb[50].mxu1 }
 0x709   : > { %v1749_v48 = vpack.c.bf16 %v4636_v47, %v4633_v41  ;;  %v3499_v49 = vpop.f32.mrb[51].mxu1 }
 0x70e   : > { %v1882_v50 = vpop.f32.mrb[52].mxu1 }
 0x70f   : > { %v3510_v51 = vpop.f32.mrb[53].mxu1  ;;  %v2001_v52 = vsel %vm961_vm2, %v1882_v50, -inf }
 0x710   : > { %2002 = vmax.xlane.f32.xlu0 %v2001_v52  ;;  %v1885_v53 = vpop.f32.mrb[54].mxu1 }
 0x711   : > { %v3511_v54 = vpop.f32.mrb[55].mxu1  ;;  %v2004_v55 = vsel %vm961_vm2, %v1885_v53, -inf }
 0x714   : > { %2005 = vmax.xlane.f32.xlu0 %v2004_v55 }
 0x716   : > { %v1988_v58 = vpop.f32.mrb[56].mxu1 }
 0x717   : > { %v3522_v59 = vpop.f32.mrb[57].mxu1  ;;  %v2013_v63 = vsel %vm961_vm2, %v1988_v58, -inf }
 0x718   : > { %2136 = vrot.lane.b32.xlu1 %v4419_v27, %s4071_s25  ;;  %2008 = vmax.xlane.f32.xlu0 %v2007_v60  ;;  %v4646_v61 = vpop.f32.mrb[58].mxu1 }
 0x719   : > { %v3523_v62 = vpop.f32.mrb[59].mxu1  ;;  %v2016_v0 = vsel %vm961_vm2, %v4646_v61, -inf }
 0x71c   : > { %2184 = vrot.lane.b32.xlu1 %v4429_v39, %s4071_s25  ;;  %2014 = vmax.xlane.f32.xlu0 %v2013_v63 }
 0x732   : > { %2088 = vrot.lane.b32.xlu0 %v4421_v28, %s4071_s25 }
 0x740   : > { %2017 = vmax.xlane.f32.xlu1 %v2016_v0 }
 0x751   : > { %2232 = vrot.lane.b32.xlu1 %v4427_v38, %s4071_s25 }
 0x769   : > { %v1997_v1 = vpop.xlane.xlu0 %1996 }
 0x76a   : > { %v2019_v2 = vsub.f32 %v1829_v30, %v1997_v1 }
 0x76b   : > { %v2000_v6 = vpop.xlane.xlu1 %1999 }
 0x76c   : > { %v2027_v7 = vmul.f32 1.442695, %v2019_v2  ;;  %v2020_v8 = vsub.f32 %v1832_v33, %v2000_v6 }
 0x76e   : > { %3817 = vpow2.f32 %v2027_v7  ;;  %v2029_v9 = vmul.f32 1.442695, %v2020_v8 }
 0x770   : > { %3819 = vpow2.f32 %v2029_v9 }
 0x778   : > { %v4657_v5 = vpop.eup %3817 }
 0x779   : > { %v2043_v11 = vsel %vm961_vm2, %v4657_v5, 0.0 }
 0x77a   : > { %v4661_v16 = vpop.eup %3819  ;;  %2044 = vadd.xlane.f32.xlu0 %v2043_v11 }
 0x77b   : > { %v2046_v18 = vsel %vm961_vm2, %v4661_v16, 0.0 }
 0x77c   : > { %2047 = vadd.xlane.f32.xlu1 %v2046_v18 }
 0x794   : > { %v2012_v21 = vpop.xlane.xlu1 %2011 }
 0x795   : > { %v2024_v31 = vsub.f32 %v1938_v40, %v2012_v21 }
 0x797   : > { %v2037_v35 = vmul.f32 1.442695, %v2024_v31 }
 0x798   : > { %v2137_v23 = vpop.permute.xlu1 %2136 }
 0x799   : > { %3531 = vmatpush3.bf16.msra.mxu1 %v2137_v23 }
 0x79a   : > { %3542 = vmatprep.subr.bf16.mxu1 %v4068_v29 }
 0x79c   : > { %v2185_v0 = vpop.permute.xlu1 %2184 }
 0x79d   : > { %v2003_v26 = vpop.xlane.xlu0 %2002 }
 0x79e   : > { %v2021_v30 = vsub.f32 %v1882_v50, %v2003_v26 }
 0x7a0   : > { %v2031_v32 = vmul.f32 1.442695, %v2021_v30 }
 0x7a1   : > { %v2006_v33 = vpop.xlane.xlu0 %2005 }
 0x7a2   : > { %3821 = vpow2.f32 %v2031_v32  ;;  %v2022_v34 = vsub.f32 %v1885_v53, %v2006_v33 }
 0x7a4   : > { %v2033_v37 = vmul.f32 1.442695, %v2022_v34 }
 0x7a5   : > { %v2009_v42 = vpop.xlane.xlu0 %2008 }
 0x7a6   : > { %3823 = vpow2.f32 %v2033_v37  ;;  %v2023_v43 = vsub.f32 %v4631_v36, %v2009_v42 }
 0x7a7   : > { %3825 = vpow2.f32 %v2037_v35 }
 0x7a8   : > { %v2035_v44 = vmul.f32 1.442695, %v2023_v43 }
 0x7a9   : > { %v2015_v49 = vpop.xlane.xlu0 %2014 }
 0x7aa   : > { %3827 = vpow2.f32 %v2035_v44  ;;  %v2025_v51 = vsub.f32 %v1988_v58, %v2015_v49 }
 0x7ac   : > { %v3822_v52 = vpop.eup %3821  ;;  %v2039_v54 = vmul.f32 1.442695, %v2025_v51 }
 0x7ad   : > { %v2089_v55 = vpop.permute.xlu0 %2088  ;;  %v2049_v40 = vsel %vm961_vm2, %v3822_v52, 0.0 }
 0x7ae   : > { %3829 = vpow2.f32 %v2039_v54  ;;  %2050 = vadd.xlane.f32.xlu0 %v2049_v40  ;;  %3525 = vmatpush3.bf16.msra.mxu0 %v2089_v55 }
 0x7af   : > { %3536 = vmatprep.subr.bf16.mxu0 %v4068_v29 }
 0x7b0   : > { %v3824_v50 = vpop.eup %3823 }
 0x7b1   : > { %v2052_v53 = vsel %vm961_vm2, %v3824_v50, 0.0  ;;  %v3826_v59 = vpop.eup %3825 }
 0x7b2   : > { %2053 = vadd.xlane.f32.xlu1 %v2052_v53  ;;  %v2058_v58 = vsel %vm961_vm2, %v3826_v59, 0.0 }
 0x7b4   : > { %v3828_v36 = vpop.eup %3827 }
 0x7b5   : > { %v2055_v60 = vsel %vm961_vm2, %v3828_v36, 0.0 }
 0x7b6   : > { %2056 = vadd.xlane.f32.xlu0 %v2055_v60  ;;  %2059 = vadd.xlane.f32.xlu1 %v2058_v58 }
 0x7b8   : > { %v4672_v62 = vpop.eup %3829 }
 0x7b9   : > { %v2061_v63 = vsel %vm961_vm2, %v4672_v62, 0.0 }
 0x7ba   : > { %2062 = vadd.xlane.f32.xlu0 %v2061_v63 }
 0x7c7   : > { %2373 = vrot.lane.b32.xlu1 %v4382_v57, %s4072_s28 }
 0x7cd   : > { %v2018_v1 = vpop.xlane.xlu1 %2017 }
 0x7ce   : > { %v2026_v2 = vsub.f32 %v4646_v61, %v2018_v1 }
 0x7d0   : > { %2320 = vrot.lane.b32.xlu0 %v4375_v46, %s4072_s28  ;;  %v2041_v6 = vmul.f32 1.442695, %v2026_v2 }
 0x7d2   : > { %3831 = vpow2.f32 %v2041_v6 }
 0x7d4   : > { %2317 = vrot.lane.b32.xlu0 %v4373_v45, %s4072_s28  ;;  %v2233_v45 = vpop.permute.xlu1 %2232 }
 0x7d8   : > { %2370 = vrot.lane.b32.xlu0 %v4380_v56, %s4072_s28 }
 0x7dc   : > { %2423 = vrot.lane.b32.xlu0 %v4391_v3, %s4072_s28  ;;  %v4687_v7 = vpop.eup %3831 }
 0x7dd   : > { %v2064_v57 = vsel %vm961_vm2, %v4687_v7, 0.0 }
 0x7eb   : > { %2065 = vadd.xlane.f32.xlu1 %v2064_v57 }
 0x7fc   : > { %2426 = vrot.lane.b32.xlu1 %v4393_v4, %s4072_s28 }
 0x800   : > { %2479 = vrot.lane.b32.xlu1 %v4404_v15, %s4072_s28 }
 0x804   : > { %2476 = vrot.lane.b32.xlu1 %v4402_v14, %s4072_s28 }
 0x807   : > { %v2045_v46 = vpop.xlane.xlu0 %2044 }
 0x808   : > { %3833 = vrcp.f32 %v2045_v46 }
 0x809   : > { %v2048_v56 = vpop.xlane.xlu1 %2047 }
 0x80a   : > { %3835 = vrcp.f32 %v2048_v56 }
 0x812   : > { %v3834_v3 = vpop.eup %3833 }
 0x813   : > { %v2075_v8 = vmul.f32 %v3834_v3, %v4657_v5 }
 0x814   : > { %v3836_v61 = vpop.eup %3835 }
 0x815   : > { %v2076_v9 = vmul.f32 %v3836_v61, %v4661_v16 }
 0x817   : > { %v2083_v11 = vpack.c.bf16 %v2076_v9, %v2075_v8 }
 0x819   : > { %3527 = vmatmul.mubr.msk.bf16.vlgmr.msra.gmra.mrb[44].mxu0 %vm961_vm2, %v2083_v11 }
 0x81a   : > { %3537 = vmatpush3.bf16.msra.mxu0 %v2185_v0  ;;  %3538 = vmatprep.mubr.msk.bf16.mxu0 %vm4069_vm0, %v4068_v29 }
 0x81b   : > { %3548 = vmatprep.subr.bf16.mxu0 %v4068_v29 }
 0x83b   : > { %v2051_v4 = vpop.xlane.xlu0 %2050 }
 0x83c   : > { %3837 = vrcp.f32 %v2051_v4 }
 0x83f   : > { %v2054_v14 = vpop.xlane.xlu1 %2053 }
 0x840   : > { %3839 = vrcp.f32 %v2054_v14 }
 0x843   : > { %v2057_v15 = vpop.xlane.xlu0 %2056  ;;  %v2060_v18 = vpop.xlane.xlu1 %2059 }
 0x844   : > { %3841 = vrcp.f32 %v2057_v15 }
 0x845   : > { %3843 = vrcp.f32 %v2060_v18 }
 0x846   : > { %v3838_v5 = vpop.eup %3837 }
 0x847   : > { %v2077_v16 = vmul.f32 %v3838_v5, %v3822_v52  ;;  %v2063_v26 = vpop.xlane.xlu0 %2062  ;;  %v2374_v44 = vpop.permute.xlu1 %2373 }
 0x848   : > { %3845 = vrcp.f32 %v2063_v26  ;;  %v2379_v60 = vsel %vm772_vm1, %v2374_v44, 0 }
 0x84a   : > { %v3840_v21 = vpop.eup %3839 }
 0x84b   : > { %v2078_v23 = vmul.f32 %v3840_v21, %v3824_v50  ;;  %v2321_v35 = vpop.permute.xlu0 %2320 }
 0x84c   : > { %v2326_v42 = vsel %vm772_vm1, %v2321_v35, 0 }
 0x84d   : > { %v2084_v30 = vpack.c.bf16 %v2078_v23, %v2077_v16 }
 0x84e   : > { %v3842_v31 = vpop.eup %3841 }
 0x84f   : > { %v3844_v32 = vpop.eup %3843  ;;  %v2079_v33 = vmul.f32 %v3842_v31, %v3828_v36  ;;  %3533 = vmatmul.mubr.msk.bf16.vlgmr.msra.gmra.mrb[60].mxu1 %vm961_vm2, %v2084_v30  ;;  %v2318_v43 = vpop.permute.xlu0 %2317 }
 0x850   : > { %v2080_v34 = vmul.f32 %v3844_v32, %v3826_v59  ;;  %3543 = vmatpush3.bf16.msra.mxu1 %v2233_v45  ;;  %3544 = vmatprep.mubr.msk.bf16.mxu1 %vm4069_vm0, %v4068_v29 }
 0x851   : > { %3554 = vmatprep.subr.bf16.mxu1 %v4068_v29 }
 0x852   : > { %v2085_v37 = vpack.c.bf16 %v2080_v34, %v2079_v33  ;;  %v3846_v55 = vpop.eup %3845 }
 0x853   : > { %v2371_v54 = vpop.permute.xlu0 %2370  ;;  %v2081_v50 = vmul.f32 %v3846_v55, %v4672_v62 }
 0x854   : > { %3539 = vmatmul.mubr.msk.bf16.vlgmr.msra.gmra.mrb[48].mxu0 %vm961_vm2, %v2085_v37 }
 0x855   : > { %3549 = vmatpush3.bf16.xpose.msra.mxu0 %v2326_v42  ;;  %3550 = vmatprep.mubr.msk.bf16.mxu0 %vm4069_vm0, %v4068_v29 }
 0x856   : > { %3560 = vmatprep.subr.bf16.mxu0 %v4068_v29 }
 0x857   : > { %v2424_v53 = vpop.permute.xlu0 %2423 }
 0x85c   : > { %3551 = vmatmul.mubr.msk.bf16.vlgmr.msra.gmra.mrb[52].mxu0 %vm772_vm1, %v2318_v43 }
 0x85d   : > { %3562 = vmatprep.mubr.msk.bf16.mxu0 %vm4069_vm0, %v4068_v29 }
 0x878   : > { %v2066_v49 = vpop.xlane.xlu1 %2065 }
 0x879   : > { %3847 = vrcp.f32 %v2066_v49 }
 0x87c   : > { %v2427_v51 = vpop.permute.xlu1 %2426 }
 0x87d   : > { %v2432_v52 = vsel %vm772_vm1, %v2427_v51, 0 }
 0x87e   : > { %3561 = vmatpush3.bf16.xpose.msra.mxu0 %v2432_v52 }
 0x87f   : > { %3572 = vmatprep.subr.bf16.mxu0 %v4068_v29 }
 0x880   : > { %v2480_v58 = vpop.permute.xlu1 %2479 }
 0x881   : > { %v2485_v62 = vsel %vm772_vm1, %v2480_v58, 0 }
 0x883   : > { %v3848_v40 = vpop.eup %3847 }
 0x884   : > { %v2082_v59 = vmul.f32 %v3848_v40, %v4687_v7  ;;  %v2477_v63 = vpop.permute.xlu1 %2476 }
 0x885   : > { %3563 = vmatmul.mubr.msk.bf16.vlgmr.msra.gmra.mrb[56].mxu0 %vm772_vm1, %v2424_v53 }
 0x886   : > { %v2086_v36 = vpack.c.bf16 %v2082_v59, %v2081_v50  ;;  %3574 = vmatprep.mubr.msk.bf16.mxu0 %vm4069_vm0, %v4068_v29 }
 0x888   : > { %3545 = vmatmul.mubr.msk.bf16.vlgmr.msra.gmra.mrb[64].mxu1 %vm961_vm2, %v2086_v36 }
 0x889   : > { %3555 = vmatpush3.bf16.xpose.msra.mxu1 %v2379_v60  ;;  %3556 = vmatprep.mubr.msk.bf16.mxu1 %vm4069_vm0, %v4068_v29 }
 0x88a   : > { %3566 = vmatprep.subr.bf16.mxu1 %v4068_v29 }
 0x890   : > { %3557 = vmatmul.mubr.msk.bf16.vlgmr.msra.gmra.mrb[68].mxu1 %vm772_vm1, %v2371_v54 }
 0x891   : > { %3567 = vmatpush3.bf16.xpose.msra.mxu1 %v2485_v62  ;;  %3568 = vmatprep.mubr.msk.bf16.mxu1 %vm4069_vm0, %v4068_v29 }
 0x892   : > { %3578 = vmatprep.subr.bf16.mxu1 %v4068_v29 }
 0x898   : > { %3569 = vmatmul.mubr.msk.bf16.vlgmr.msra.gmra.mrb[72].mxu1 %vm772_vm1, %v2477_v63 }
 0x899   : > { %3580 = vmatprep.mubr.msk.bf16.mxu1 %vm4069_vm0, %v4068_v29 }
 0x8ec   : > { %v4735_v0 = vpop.f32.mrb[44].mxu0 }
 0x8ed   : > { %v3528_v1 = vpop.f32.mrb[45].mxu0 }
 0x8ee   : > { %v4737_v2 = vpop.f32.mrb[46].mxu0 }
 0x8ef   : > { %v2279_v6 = vpack.c.bf16 %v4737_v2, %v4735_v0  ;;  %v3529_v7 = vpop.f32.mrb[47].mxu0 }
 0x922   : > { %v4741_v57 = vpop.f32.mrb[60].mxu1 }
 0x923   : > { %v3534_v45 = vpop.f32.mrb[61].mxu1 }
 0x924   : > { %v4743_v46 = vpop.f32.mrb[62].mxu1 }
 0x925   : > { %v2280_v56 = vpack.c.bf16 %v4743_v46, %v4741_v57  ;;  %v3535_v3 = vpop.f32.mrb[63].mxu1 }
 0x927   : > { %v4747_v61 = vpop.f32.mrb[48].mxu0 }
 0x928   : > { %v3540_v8 = vpop.f32.mrb[49].mxu0 }
 0x929   : > { %v4749_v9 = vpop.f32.mrb[50].mxu0 }
 0x92a   : > { %v2281_v11 = vpack.c.bf16 %v4749_v9, %v4747_v61  ;;  %v3541_v4 = vpop.f32.mrb[51].mxu0 }
 0x92f   : > { %v2362_v14 = vpop.f32.mrb[52].mxu0 }
 0x930   : > { %v3552_v15 = vpop.f32.mrb[53].mxu0  ;;  %v2528_v18 = vsel %vm961_vm2, %v2362_v14, -inf }
 0x931   : > { %2529 = vmax.xlane.f32.xlu0 %v2528_v18  ;;  %v2365_v5 = vpop.f32.mrb[54].mxu0 }
 0x932   : > { %v3553_v21 = vpop.f32.mrb[55].mxu0  ;;  %v2531_v16 = vsel %vm961_vm2, %v2365_v5, -inf }
 0x933   : > { %2532 = vmax.xlane.f32.xlu1 %v2531_v16 }
 0x958   : > { %v2468_v23 = vpop.f32.mrb[56].mxu0 }
 0x959   : > { %v3564_v26 = vpop.f32.mrb[57].mxu0  ;;  %v2540_v50 = vsel %vm961_vm2, %v2468_v23, -inf }
 0x95a   : > { %v2471_v30 = vpop.f32.mrb[58].mxu0 }
 0x95b   : > { %v4755_v31 = vpop.f32.mrb[64].mxu1  ;;  %v3565_v32 = vpop.f32.mrb[59].mxu0  ;;  %v2543_v33 = vsel %vm961_vm2, %v2471_v30, -inf }
 0x95c   : > { %2544 = vmax.xlane.f32.xlu1 %v2543_v33  ;;  %v3546_v34 = vpop.f32.mrb[65].mxu1 }
 0x95d   : > { %v4758_v35 = vpop.f32.mrb[66].mxu1 }
 0x95e   : > { %v2282_v37 = vpack.c.bf16 %v4758_v35, %v4755_v31  ;;  %v3547_v42 = vpop.f32.mrb[67].mxu1 }
 0x963   : > { %v2415_v43 = vpop.f32.mrb[68].mxu1 }
 0x964   : > { %v3558_v44 = vpop.f32.mrb[69].mxu1  ;;  %v2534_v49 = vsel %vm961_vm2, %v2415_v43, -inf }
 0x965   : > { %2535 = vmax.xlane.f32.xlu0 %v2534_v49  ;;  %v2418_v51 = vpop.f32.mrb[70].mxu1 }
 0x966   : > { %v3559_v52 = vpop.f32.mrb[71].mxu1  ;;  %v2537_v54 = vsel %vm961_vm2, %v2418_v51, -inf }
 0x969   : > { %2538 = vmax.xlane.f32.xlu0 %v2537_v54 }
 0x96b   : > { %v2521_v55 = vpop.f32.mrb[72].mxu1 }
 0x96c   : > { %v3570_v40 = vpop.f32.mrb[73].mxu1  ;;  %v2546_v60 = vsel %vm961_vm2, %v2521_v55, -inf }
 0x96d   : > { %2541 = vmax.xlane.f32.xlu0 %v2540_v50  ;;  %v4765_v53 = vpop.f32.mrb[74].mxu1 }
 0x96e   : > { %v3571_v59 = vpop.f32.mrb[75].mxu1  ;;  %v2549_v36 = vsel %vm961_vm2, %v4765_v53, -inf }
 0x96f   : > { %2550 = vmax.xlane.f32.xlu1 %v2549_v36 }
 0x971   : > { %2547 = vmax.xlane.f32.xlu0 %v2546_v60 }
 0x9be   : > { %v2530_v58 = vpop.xlane.xlu0 %2529 }
 0x9bf   : > { %v2552_v62 = vsub.f32 %v2362_v14, %v2530_v58 }
 0x9c0   : > { %v2533_v63 = vpop.xlane.xlu1 %2532 }
 0x9c1   : > { %v2560_v1 = vmul.f32 1.442695, %v2552_v62  ;;  %v2553_v7 = vsub.f32 %v2365_v5, %v2533_v63 }
 0x9c3   : > { %3849 = vpow2.f32 %v2560_v1  ;;  %v2562_v45 = vmul.f32 1.442695, %v2553_v7 }
 0x9c5   : > { %3851 = vpow2.f32 %v2562_v45 }
 0x9cd   : > { %v4770_v3 = vpop.eup %3849 }
 0x9ce   : > { %v2576_v8 = vsel %vm961_vm2, %v4770_v3, 0.0 }
 0x9cf   : > { %v4774_v4 = vpop.eup %3851  ;;  %2577 = vadd.xlane.f32.xlu0 %v2576_v8 }
 0x9d0   : > { %v2579_v15 = vsel %vm961_vm2, %v4774_v4, 0.0 }
 0x9d1   : > { %2580 = vadd.xlane.f32.xlu1 %v2579_v15 }
 0x9e9   : > { %v2545_v18 = vpop.xlane.xlu1 %2544 }
 0x9ea   : > { %v2557_v16 = vsub.f32 %v2471_v30, %v2545_v18 }
 0x9ec   : > { %v2570_v33 = vmul.f32 1.442695, %v2557_v16 }
 0x9f2   : > { %v2536_v14 = vpop.xlane.xlu0 %2535 }
 0x9f3   : > { %v2554_v21 = vsub.f32 %v2415_v43, %v2536_v14 }
 0x9f5   : > { %v2564_v5 = vmul.f32 1.442695, %v2554_v21 }
 0x9f6   : > { %v2539_v26 = vpop.xlane.xlu0 %2538 }
 0x9f7   : > { %3853 = vpow2.f32 %v2564_v5  ;;  %v2555_v32 = vsub.f32 %v2418_v51, %v2539_v26 }
 0x9f9   : > { %v2566_v34 = vmul.f32 1.442695, %v2555_v32 }
 0x9fa   : > { %v2542_v42 = vpop.xlane.xlu0 %2541 }
 0x9fb   : > { %3855 = vpow2.f32 %v2566_v34  ;;  %v2556_v44 = vsub.f32 %v2468_v23, %v2542_v42 }
 0x9fc   : > { %3857 = vpow2.f32 %v2570_v33  ;;  %v2551_v62 = vpop.xlane.xlu1 %2550 }
 0x9fd   : > { %v2568_v49 = vmul.f32 1.442695, %v2556_v44  ;;  %v2559_v63 = vsub.f32 %v4765_v53, %v2551_v62  ;;  %v3745_v44 = vld [vmem:[%s318_s9] sm:$0xff]  }
 0x9fe   : > { %v2548_v52 = vpop.xlane.xlu0 %2547 }
 0x9ff   : > { %3859 = vpow2.f32 %v2568_v49  ;;  %v2558_v54 = vsub.f32 %v2521_v55, %v2548_v52  ;;  %v3746_v49 = vld [vmem:[%s318_s9 + $0x8] sm:$0xff]   ;;  %v3747_v52 = vld [vmem:[%s318_s9 + $0x10] sm:$0xff]  }
 0xa01   : > { %v3854_v40 = vpop.eup %3853  ;;  %v2572_v50 = vmul.f32 1.442695, %v2558_v54  ;;  %v3748_v54 = vld [vmem:[%s318_s9 + $0x18] sm:$0xff]  }
 0xa02   : > { %v2582_v59 = vsel %vm961_vm2, %v3854_v40, 0.0 }
 0xa03   : > { %3861 = vpow2.f32 %v2572_v50  ;;  %2583 = vadd.xlane.f32.xlu0 %v2582_v59  ;;  %v3750_v50 = vld [vmem:[%s318_s9 + $0x28] sm:$0xff]   ;;  %v3751_v59 = vld [vmem:[%s318_s9 + $0x30] sm:$0xff]  }
 0xa05   : > { %v3856_v30 = vpop.eup %3855 }
 0xa06   : > { %v2585_v43 = vsel %vm961_vm2, %v3856_v30, 0.0  ;;  %v4780_v51 = vpop.eup %3857 }
 0xa07   : > { %2586 = vadd.xlane.f32.xlu1 %v2585_v43  ;;  %v2591_v55 = vsel %vm961_vm2, %v4780_v51, 0.0 }
 0xa09   : > { %v4782_v36 = vpop.eup %3859 }
 0xa0a   : > { %v2588_v23 = vsel %vm961_vm2, %v4782_v36, 0.0 }
 0xa0b   : > { %2589 = vadd.xlane.f32.xlu0 %v2588_v23  ;;  %2592 = vadd.xlane.f32.xlu1 %v2591_v55 }
 0xa0d   : > { %v4788_v60 = vpop.eup %3861 }
 0xa0e   : > { %v2594_v58 = vsel %vm961_vm2, %v4788_v60, 0.0 }
 0xa0f   : > { %2595 = vadd.xlane.f32.xlu0 %v2594_v58 }
 0xa1c   : > { %2669 = vrot.lane.b32.xlu1 %v4419_v27, %s4072_s28  ;;  %v2574_v27 = vmul.f32 1.442695, %v2559_v63 }
 0xa1e   : > { %3863 = vpow2.f32 %v2574_v27 }
 0xa20   : > { %2717 = vrot.lane.b32.xlu1 %v4429_v39, %s4072_s28 }
 0xa25   : > { %2621 = vrot.lane.b32.xlu0 %v4421_v28, %s4072_s28 }
 0xa28   : > { %v4811_v28 = vpop.eup %3863 }
 0xa29   : > { %1754 = vrot.lane.b32.xlu0 %v1746_v13, %s4072_s28  ;;  %v2597_v39 = vsel %vm961_vm2, %v4811_v28, 0.0 }
 0xa2d   : > { %2287 = vrot.lane.b32.xlu0 %v2279_v6, %s4071_s25 }
 0xa31   : > { %1758 = vrot.lane.b32.xlu0 %v1748_v25, %s4072_s28 }
 0xa44   : > { %2598 = vadd.xlane.f32.xlu1 %v2597_v39 }
 0xa55   : > { %2765 = vrot.lane.b32.xlu1 %v4427_v38, %s4072_s28 }
 0xa59   : > { %1756 = vrot.lane.b32.xlu1 %v1747_v20, %s4072_s28 }
 0xa5c   : > { %v2578_v10 = vpop.xlane.xlu0 %2577 }
 0xa5d   : > { %2289 = vrot.lane.b32.xlu1 %v2280_v56, %s4071_s25 }
 0xa5e   : > { %v2581_v12 = vpop.xlane.xlu1 %2580 }
 0xa5f   : > { %3865 = vrcp.f32 %v2581_v12 }
 0xa60   : > { %3867 = vrcp.f32 %v2578_v10 }
 0xa61   : > { %1760 = vrot.lane.b32.xlu1 %v1749_v48, %s4072_s28 }
 0xa69   : > { %v3866_v20 = vpop.eup %3865 }
 0xa6a   : > { %v3868_v22 = vpop.eup %3867  ;;  %v2609_v41 = vmul.f32 %v3866_v20, %v4774_v4 }
 0xa6b   : > { %v2608_v48 = vmul.f32 %v3868_v22, %v4770_v3 }
 0xa6d   : > { %v2616_v46 = vpack.c.bf16 %v2609_v41, %v2608_v48  ;;  %v3239_v48 = vld [vmem:[%s369_s20] ss:$0 sm:$0xff] }
 0xa90   : > { %v2584_v13 = vpop.xlane.xlu0 %2583 }
 0xa91   : > { %3869 = vrcp.f32 %v2584_v13 }
 0xa94   : > { %v2587_v38 = vpop.xlane.xlu1 %2586 }
 0xa95   : > { %3871 = vrcp.f32 %v2587_v38 }
 0xa98   : > { %v2590_v17 = vpop.xlane.xlu0 %2589  ;;  %v2593_v19 = vpop.xlane.xlu1 %2592 }
 0xa99   : > { %3873 = vrcp.f32 %v2590_v17 }
 0xa9a   : > { %3875 = vrcp.f32 %v2593_v19 }
 0xa9b   : > { %v3870_v0 = vpop.eup %3869 }
 0xa9c   : > { %v2596_v24 = vpop.xlane.xlu0 %2595  ;;  %v2670_v25 = vpop.permute.xlu1 %2669  ;;  %v2610_v2 = vmul.f32 %v3870_v0, %v3854_v40  ;;  %v3749_v40 = vld [vmem:[%s318_s9 + $0x20] sm:$0xff]  }
 0xa9d   : > { %3579 = vmatpush3.bf16.msra.mxu1 %v2670_v25  ;;  %3877 = vrcp.f32 %v2596_v24 }
 0xa9e   : > { %3590 = vmatprep.subr.bf16.mxu1 %v4068_v29 }
 0xa9f   : > { %v3872_v47 = vpop.eup %3871 }
 0xaa0   : > { %v2611_v6 = vmul.f32 %v3872_v47, %v3856_v30  ;;  %v2622_v57 = vpop.permute.xlu0 %2621  ;;  %v2718_v7 = vpop.permute.xlu1 %2717  ;;  %v3752_v30 = vld [vmem:[%s318_s9 + $0x38] sm:$0xff]  }
 0xaa1   : > { %3573 = vmatpush3.bf16.msra.mxu0 %v2622_v57 }
 0xaa2   : > { %3584 = vmatprep.subr.bf16.mxu0 %v4068_v29  ;;  %v2617_v56 = vpack.c.bf16 %v2611_v6, %v2610_v2 }
 0xaa3   : > { %v3874_v53 = vpop.eup %3873 }
 0xaa4   : > { %v3876_v1 = vpop.eup %3875  ;;  %v1755_v45 = vpop.permute.xlu0 %1754  ;;  %3575 = vmatmul.mubr.msk.bf16.vlgmr.msra.gmra.mrb[60].mxu0 %vm961_vm2, %v2616_v46  ;;  %3581 = vmatmul.mubr.msk.bf16.vlgmr.msra.gmra.mrb[76].mxu1 %vm961_vm2, %v2617_v56  ;;  %v2612_v3 = vmul.f32 %v3874_v53, %v4782_v36 }
 0xaa5   : > { %1767 = vst.msk [vmem:[#allocation5] sm:$0xff] %vm1766_vm3, %v1755_v45  ;;  %3585 = vmatpush3.bf16.msra.mxu0 %v2718_v7  ;;  %3586 = vmatprep.mubr.msk.bf16.mxu0 %vm4069_vm0, %v4068_v29  ;;  %v2613_v8 = vmul.f32 %v3876_v1, %v4780_v51 }
 0xaa6   : > { %3592 = vmatprep.mubr.msk.bf16.mxu1 %vm4069_vm0, %v4068_v29  ;;  %3596 = vmatprep.subr.bf16.mxu0 %v3745_v44 }
 0xaa7   : > { %v2618_v15 = vpack.c.bf16 %v2613_v8, %v2612_v3  ;;  %v3878_v5 = vpop.eup %3877 }
 0xaa8   : > { %v2288_v4 = vpop.permute.xlu0 %2287  ;;  %v2614_v26 = vmul.f32 %v3878_v5, %v4788_v60 }
 0xaa9   : > { %2300 = vst.msk [vmem:[#allocation5] sm:$0xff] %vm2299_vm4, %v2288_v4 }
 0xaac   : > { %v1759_v18 = vpop.permute.xlu0 %1758  ;;  %3587 = vmatmul.mubr.msk.bf16.vlgmr.msra.gmra.mrb[64].mxu0 %vm961_vm2, %v2618_v15 }
 0xaad   : > { %1769 = vst.msk [vmem:[#allocation5 + $0x10] sm:$0xff] %vm1766_vm3, %v1759_v18  ;;  %3597 = vmatpush3.bf16.msra.mxu0 %v3745_v44 }
 0xaae   : > { %3598 = vmatprep.subr.bf16.mxu0 %v3746_v49 }
 0xab1   : > { %3599 = vmatpush3.bf16.msra.mxu0 %v3746_v49 }
 0xab2   : > { %3600 = vmatprep.subr.bf16.mxu0 %v3747_v52 }
 0xab5   : > { %3601 = vmatpush3.bf16.msra.mxu0 %v3747_v52 }
 0xab6   : > { %3602 = vmatprep.subr.bf16.mxu0 %v3748_v54 }
 0xab9   : > { %3603 = vmatpush3.bf16.msra.mxu0 %v3748_v54 }
 0xaba   : > { %3604 = vmatprep.subr.bf16.mxu0 %v3749_v40 }
 0xabd   : > { %3605 = vmatpush3.bf16.msra.mxu0 %v3749_v40 }
 0xabe   : > { %3606 = vmatprep.subr.bf16.mxu0 %v3750_v50 }
 0xac1   : > { %3607 = vmatpush3.bf16.msra.mxu0 %v3750_v50 }
 0xac2   : > { %3608 = vmatprep.subr.bf16.mxu0 %v3751_v59 }
 0xac5   : > { %3609 = vmatpush3.bf16.msra.mxu0 %v3751_v59 }
 0xac6   : > { %3610 = vmatprep.subr.bf16.mxu0 %v3752_v30 }
 0xac9   : > { %3611 = vmatpush3.bf16.msra.mxu0 %v3752_v30 }
 0xad1   : > { %v2599_v14 = vpop.xlane.xlu1 %2598 }
 0xad2   : > { %3879 = vrcp.f32 %v2599_v14 }
 0xad5   : > { %v2766_v21 = vpop.permute.xlu1 %2765 }
 0xad6   : > { %3591 = vmatpush3.bf16.msra.mxu1 %v2766_v21 }
 0xad9   : > { %v1757_v16 = vpop.permute.xlu1 %1756 }
 0xada   : > { %1768 = vst.msk [vmem:[#allocation5 + $0x8] sm:$0xff] %vm1766_vm3, %v1757_v16 }
 0xadc   : > { %v3880_v29 = vpop.eup %3879 }
 0xadd   : > { %v2615_v32 = vmul.f32 %v3880_v29, %v4811_v28  ;;  %v2290_v33 = vpop.permute.xlu1 %2289 }
 0xade   : > { %2301 = vst.msk [vmem:[#allocation5 + $0x8] sm:$0xff] %vm2299_vm4, %v2290_v33 }
 0xadf   : > { %v2619_v34 = vpack.c.bf16 %v2615_v32, %v2614_v26 }
 0xae1   : > { %3593 = vmatmul.mubr.msk.bf16.vlgmr.msra.gmra.mrb[80].mxu1 %vm961_vm2, %v2619_v34  ;;  %v1761_v42 = vpop.permute.xlu1 %1760 }
 0xae2   : > { %1770 = vst.msk [vmem:[#allocation5 + $0x18] sm:$0xff] %vm1766_vm3, %v1761_v42 }
 0xb77   : > { %v2661_v43 = vpop.f32.mrb[60].mxu0  ;;  %v2709_v51 = vpop.f32.mrb[76].mxu1 }
 0xb78   : > { %v3576_v36 = vpop.f32.mrb[61].mxu0  ;;  %v3582_v23 = vpop.f32.mrb[77].mxu1 }
 0xb79   : > { %v2664_v55 = vpop.f32.mrb[62].mxu0  ;;  %v2712_v60 = vpop.f32.mrb[78].mxu1 }
 0xb7a   : > { %v2812_v58 = vpack.c.bf16 %v2664_v55, %v2661_v43  ;;  %v2813_v62 = vpack.c.bf16 %v2712_v60, %v2709_v51  ;;  %v3577_v63 = vpop.f32.mrb[63].mxu0  ;;  %v3583_v27 = vpop.f32.mrb[79].mxu1 }
 0xb7c   : > { %2820 = vrot.lane.b32.xlu0 %v2812_v58, %s4070_s7  ;;  %2822 = vrot.lane.b32.xlu1 %v2813_v62, %s4070_s7 }
 0xb7f   : > { %v2757_v28 = vpop.f32.mrb[64].mxu0 }
 0xb80   : > { %2291 = vrot.lane.b32.xlu0 %v2281_v11, %s4071_s25  ;;  %v3588_v39 = vpop.f32.mrb[65].mxu0  ;;  %2293 = vrot.lane.b32.xlu1 %v2282_v37, %s4071_s25 }
 0xb81   : > { %v2760_v10 = vpop.f32.mrb[66].mxu0 }
 0xb82   : > { %v2814_v12 = vpack.c.bf16 %v2760_v10, %v2757_v28  ;;  %v3589_v13 = vpop.f32.mrb[67].mxu0 }
 0xb84   : > { %2824 = vrot.lane.b32.xlu0 %v2814_v12, %s4070_s7 }
 0xbb4   : > { %v2805_v38 = vpop.f32.mrb[80].mxu1 }
 0xbb5   : > { %v3594_v17 = vpop.f32.mrb[81].mxu1 }
 0xbb6   : > { %v2808_v19 = vpop.f32.mrb[82].mxu1 }
 0xbb7   : > { %v2815_v20 = vpack.c.bf16 %v2808_v19, %v2805_v38  ;;  %v3595_v22 = vpop.f32.mrb[83].mxu1 }
 0xbb9   : > { %2826 = vrot.lane.b32.xlu1 %v2815_v20, %s4070_s7 }
 0xbee   : > { %v2821_v61 = vpop.permute.xlu0 %2820  ;;  %v2823_v9 = vpop.permute.xlu1 %2822 }
 0xbef   : > { %2833 = vst.msk [vmem:[#allocation5] sm:$0xff] %vm2832_vm5, %v2821_v61  ;;  %2834 = vst.msk [vmem:[#allocation5 + $0x8] sm:$0xff] %vm2832_vm5, %v2823_v9 }
 0xbf2   : > { %v2292_v11 = vpop.permute.xlu0 %2291  ;;  %v2294_v31 = vpop.permute.xlu1 %2293 }
 0xbf3   : > { %2302 = vst.msk [vmem:[#allocation5 + $0x10] sm:$0xff] %vm2299_vm4, %v2292_v11  ;;  %2303 = vst.msk [vmem:[#allocation5 + $0x18] sm:$0xff] %vm2299_vm4, %v2294_v31 }
 0xbf6   : > { %v2825_v35 = vpop.permute.xlu0 %2824  ;;  %v2837_v37 = vld [vmem:[#allocation5] sm:$0xff]  ;;  %v2838_v24 = vld [vmem:[#allocation5 + $0x8] sm:$0xff] }
 0xbf7   : > { %2835 = vst.msk [vmem:[#allocation5 + $0x10] sm:$0xff] %vm2832_vm5, %v2825_v35  ;;  %3612 = vmatprep.mubr.bf16.mxu0 %v2837_v37 }
 0xbf8   : > { %3613 = vmatmul.mubr.bf16.vlgmr.msra.gmra.mrb[68].mxu0 %v2838_v24 }
 0xbfe   : > { %v2839_v25 = vld [vmem:[#allocation5 + $0x10] sm:$0xff] }
 0xbff   : > { %3616 = vmatprep.mubr.bf16.mxu0 %v2839_v25 }
 0xc2b   : > { %v2827_v0 = vpop.permute.xlu1 %2826 }
 0xc2c   : > { %2836 = vst.msk [vmem:[#allocation5 + $0x18] sm:$0xff] %vm2832_vm5, %v2827_v0 }
 0xc33   : > { %v2840_v41 = vld [vmem:[#allocation5 + $0x18] sm:$0xff] }
 0xc34   : > { %3617 = vmatmul.mubr.bf16.gmra.mrb[72].mxu0 %v2840_v41 }
 0xccb   : > { %v3614_v47 = vpop.f32.mrb[68].mxu0 }
 0xccc   : > { %v2929_v2 = vpop.f32.mrb[69].mxu0  ;;  %v2938_v57 = vadd.f32 %v3614_v47, %v3239_v48 }
 0xccd   : > { %v3615_v6 = vpop.f32.mrb[70].mxu0  ;;  %v2930_v53 = vadd.f32 %v3239_v48, %v2929_v2 }
 0xcce   : > { %v2941_v46 = vadd.f32 %v3615_v6, %v3239_v48  ;;  %v2932_v56 = vpop.f32.mrb[71].mxu0 }
 0xccf   : > { %v2933_v1 = vadd.f32 %v3239_v48, %v2932_v56 }
 0xcd0   : > { %v3277_v7 = vpack.c.bf16 %v2941_v46, %v2938_v57 }
 0xcd1   : > { %v3272_v45 = vpack.c.bf16 %v2933_v1, %v2930_v53 }
 0xcd2   : > { %3289 = vst [vmem:[%s361_s14 + $0x8] sm:$0xff] %v3277_v7  }
 0xcd3   : > { %3273 = vst [vmem:[%s361_s14] sm:$0xff] %v3272_v45  }
 0xd07   : > { %v3618_v3 = vpop.f32.mrb[72].mxu0 }
 0xd08   : > { %v2945_v8 = vpop.f32.mrb[73].mxu0  ;;  %v2954_v15 = vadd.f32 %v3618_v3, %v3239_v48 }
 0xd09   : > { %v3619_v4 = vpop.f32.mrb[74].mxu0  ;;  %v2946_v21 = vadd.f32 %v3239_v48, %v2945_v8 }
 0xd0a   : > { %v2957_v18 = vadd.f32 %v3619_v4, %v3239_v48  ;;  %v2948_v14 = vpop.f32.mrb[75].mxu0 }
 0xd0b   : > { %v2949_v16 = vadd.f32 %v3239_v48, %v2948_v14 }
 0xd0c   : > { %v3287_v5 = vpack.c.bf16 %v2957_v18, %v2954_v15 }
 0xd0d   : > { %v3282_v29 = vpack.c.bf16 %v2949_v16, %v2946_v21 }
 0xd0e   : > { %3291 = vst [vmem:[%s361_s14 + $0x18] sm:$0xff] %v3287_v5  }
 0xd0f   : > { %3290 = vst [vmem:[%s361_s14 + $0x10] sm:$0xff] %v3282_v29  }
 0xd10   : > { %3984 = shalt.err (!%p3981_p8)
}
 0xd11   : > { %s3985_s10 = scalar_lea.hbm %s4882_s17, 512  ;;  %s3989_s28 = scalar_lea.hbm %s4937_s5, 1024 }
 0xd12   : > { %p3986_p7 = scmp.ne.s32.totalorder %s4882_s17, %s3985_s10  ;;  %p3990_p2 = scmp.lt.u32.totalorder %s4882_s17, %s4937_s5 }
 0xd13   : > { %p3991_p1 = scmp.lt.u32.totalorder %s3989_s28, %s3985_s10  ;;  %p3993_p6 = scmp.lt.u32.totalorder %s3985_s10, %s4882_s17 }
 0xd14   : > { %p3987_p3 = pnand %p3986_p7, %p4961_p12 }
 0xd15   : > { %p3992_p0 = por %p3991_p1, %p3990_p2 }
 0xd16   : > { %p3988_p5 = pneg %p3987_p3 }
 0xd17   : > { %p3994_p4 = por %p3993_p6, %p3992_p0 }
 0xd19   : > { %p3995_p9 = pnand %p3994_p4, %p3988_p5 }
 0xd1b   : > { %3998 = shalt.err (!%p3995_p9)
}
 0xd1c   : > { %s4074_s15 = smov 128   ;;  %s4075_s26 = smov 4  }
 0xd1d   : > { %3630 = dma.vmem_to_hbm [thread:$0]  (%p4961_p12), %s4877_s12, 512, %s4882_s17, %s3001_s21, %s4071_s25, %s4074_s15, %s4075_s26  }
 0xd1e PF: > { %s4962_s20 = sld [smem:[#allocation17_spill]]  ;;  %s3031_s14 = sand.u32 1, %s4037_s18  }
 0xd1f   : > { %p4963_p11 = scmp.ne.s32.totalorder %s4953_s8, 0  ;;  %s3032_s0 = scalar_lea.sflag [#allocation8], %s3031_s14 }
 0xd24   : > { %p4964_p10 = scmp.ge.s32.totalorder %s4962_s20, 2 }
 0xd26   : > { %p3643_p13 = pnand %p4964_p10, %p4963_p11 }
 0xd28   : > { %4032 = dma.done.wait (!%p3643_p13), %s3032_s0, 512  }
 0xd29   : > { %4034 = vsyncadd (!%p3643_p13), %s3032_s0, 4294966784  ;;  %s24_s23 = sadd.s32 1, %s4962_s20   ;;  %s4965_s29 = sld [smem:[#allocation16_spill]] }
 0xd2a   : > { %p21_p8 = scmp.ge.s32.totalorder %s24_s23, 4   ;;  %s4966_s20 = sld [smem:[#allocation19_spill]] }
 0xd2b   : > { %s4967_s6 = sld [smem:[#allocation18_spill]]  ;;  %s4968_s18 = smov %s4041_s19 }
 0xd2c   : > { %s4970_s21 = smov %s4053_s22  ;;  %23 = sbr.rel (!%p21_p8) target bundleno = 11 (0xb), region = 115 }
 0xd2f   : > { %s4969_s19 = smov %s4965_s29 }
 0xd31   : > { %s4971_s22 = smov %s4967_s6 }
 0xd33   :  { %3037 = vsyncpa [#allocation7], 1 }
 0xd34   :  { %3039 = vsyncpa [#allocation7 + $0x1], 1 }
 0xd35   :  { %3040 = vsyncpa [#allocation10], 1 }
 0xd36   :  { %3042 = vsyncpa [#allocation10 + $0x1], 1 }
 0xd37   :  { %3043 = vsyncpa [#allocation8], 1 }
 0xd38   :  { %3045 = vsyncpa [#allocation8 + $0x1], 1 }

</bundles_post_ra>
